<compile_context>
chip_gen: v5e
topology: v5e:2x2
jax: 0.10.0
libtpu: 0.0.40
codegen_flags: <defaults>
</compile_context>

<pallas_src>
import jax
import jax.numpy as jnp
import numpy as np
from jax.experimental import pallas as pl
from jax.experimental.pallas import tpu as pltpu


ORIG_DIMS = [(96, 200), (200, 150), (150, 150), (150, 3)]
# Padded (K, N) per layer (lane-aligned N; final N=128 for a lane-dense store).
PAD_DIMS = [(96, 256), (256, 256), (256, 256), (256, 128)]
OUT_FEATURES = 3
MAX_TILE_B = 4096  # per-step VMEM stays <~10 MiB even at this tile on every chip


def _device_kind():
    try:
        return jax.devices()[0].device_kind.lower()
    except Exception:
        return ""


def _default_grid_steps(kind):
    # v7x: 2 TensorCores share the "parallel" grid -> exactly 2 big steps.
    # v5e / v6e: single TC -> one big tile (grid=1) avoids per-step overhead.
    return 2 if "v7" in kind else 1


def _use_bf16_epilogue(kind):
    # v6e / v7x VPU & EUP are bf16-native; v5e is not -> keep f32 epilogue there.
    return ("v6" in kind) or ("v7" in kind)


def make_mlp_kernel(bf16_epilogue):
    hidden_dt = jnp.bfloat16 if bf16_epilogue else jnp.float32

    def mlp_kernel(x_ref, w1_ref, b1_ref, w2_ref, b2_ref,
                   w3_ref, b3_ref, w4_ref, b4_ref, o_ref):
        def hidden_layer(h_bf16, w_ref, b_ref):
            # bf16 MXU matmul with f32 accumulation.
            y = jnp.dot(h_bf16, w_ref[...], preferred_element_type=jnp.float32)
            y = y.astype(hidden_dt) + b_ref[...]      # bias add (VPU)
            y = jnp.tanh(y)                           # tanh (EUP)
            return y.astype(jnp.bfloat16)             # next MXU operand (no-op if bf16)

        # f32 -> bf16 cast of the input fused into the kernel (no wrapper pass).
        h = x_ref[...].astype(jnp.bfloat16)           # (tile_b, 96)
        h = hidden_layer(h, w1_ref, b1_ref)           # (tile_b, 256)
        h = hidden_layer(h, w2_ref, b2_ref)           # (tile_b, 256)
        h = hidden_layer(h, w3_ref, b3_ref)           # (tile_b, 256)
        # Final layer: f32 accumulate + f32 bias, lane-dense (128-wide) f32 store.
        y = jnp.dot(h, w4_ref[...], preferred_element_type=jnp.float32)
        o_ref[...] = y + b4_ref[...]

    return mlp_kernel


def mlp_forward(x, kernel_params, *, bf16_epilogue, num_grid_steps):
    """x: (B, 96) float32.  Returns (B, 3) float32."""
    B, F_in = x.shape
    assert F_in == ORIG_DIMS[0][0]

    # One tile per TensorCore (rounded up to a multiple of 16), capped for VMEM.
    tile_b = pl.cdiv(B, max(1, int(num_grid_steps)))
    tile_b = min(MAX_TILE_B, max(16, ((tile_b + 15) // 16) * 16))
    grid_steps = pl.cdiv(B, tile_b)
    B_pad = grid_steps * tile_b

    # Pad the batch only when it does not divide evenly (demo shapes never hit this).
    x_in = x if B_pad == B else jnp.pad(x, ((0, B_pad - B), (0, 0)))

    w1, b1, w2, b2, w3, b3, w4, b4 = kernel_params

    def resident(a):
        # Small constant-indexed weight/bias block, fully resident in VMEM.
        return pl.BlockSpec(a.shape, lambda i: (0,) * a.ndim)

    out = pl.pallas_call(
        make_mlp_kernel(bf16_epilogue),
        out_shape=jax.ShapeDtypeStruct((B_pad, 128), jnp.float32),
        grid_spec=pltpu.PrefetchScalarGridSpec(
            num_scalar_prefetch=0,
            grid=(grid_steps,),
            in_specs=[
                pl.BlockSpec((tile_b, F_in), lambda i: (i, 0)),   # x batch tile (f32)
                resident(w1), resident(b1),
                resident(w2), resident(b2),
                resident(w3), resident(b3),
                resident(w4), resident(b4),
            ],
            out_specs=pl.BlockSpec((tile_b, 128), lambda i: (i, 0)),
        ),
        compiler_params=pltpu.CompilerParams(
            dimension_semantics=("parallel",)),  # batch tiles shard across v7x's 2 TCs
    )(x_in, w1, b1, w2, b2, w3, b3, w4, b4)

    return out[:B, :OUT_FEATURES]


def init_params(key):
    """Deterministic init mimicking PyTorch nn.Linear default U(-1/sqrt(fan_in), +)."""
    params = {}
    keys = jax.random.split(key, 2 * len(ORIG_DIMS))
    for idx, (fan_in, fan_out) in enumerate(ORIG_DIMS):
        bound = 1.0 / np.sqrt(fan_in)
        w = jax.random.uniform(keys[2 * idx], (fan_in, fan_out),
                               minval=-bound, maxval=bound, dtype=jnp.float32)
        b = jax.random.uniform(keys[2 * idx + 1], (1, fan_out),
                               minval=-bound, maxval=bound, dtype=jnp.float32)
        params[f"w{idx + 1}"] = w
        params[f"b{idx + 1}"] = b
    return params


def prepare_kernel_params(params, *, bf16_epilogue):
    """Zero-pad weights/biases to lane-aligned shapes.

    Weights -> bf16 (MXU operands). Hidden biases -> bf16 on bf16-epilogue chips
    (v6e/v7x), f32 otherwise. Final bias stays f32.
    NOTE: exactness of the padding relies on tanh(0) == 0; if the activation ever
    changes to one with f(0) != 0, padded hidden lanes would leak into later layers.
    """
    hidden_bias_dt = jnp.bfloat16 if bf16_epilogue else jnp.float32
    flat = []
    for idx, (k_pad, n_pad) in enumerate(PAD_DIMS, start=1):
        w = params[f"w{idx}"]
        b = params[f"b{idx}"]
        is_last = idx == len(PAD_DIMS)
        b_dt = jnp.float32 if is_last else hidden_bias_dt
        wp = jnp.zeros((k_pad, n_pad), jnp.bfloat16)
        wp = wp.at[:w.shape[0], :w.shape[1]].set(w.astype(jnp.bfloat16))
        bp = jnp.zeros((1, n_pad), b_dt)
        bp = bp.at[:, :b.shape[1]].set(b.astype(b_dt))
        flat += [wp, bp]
    return flat


def mlp_reference(x, p):
    h = jnp.tanh(x @ p["w1"] + p["b1"])
    h = jnp.tanh(h @ p["w2"] + p["b2"])
    h = jnp.tanh(h @ p["w3"] + p["b3"])
    return h @ p["w4"] + p["b4"]


if __name__ == "__main__":
    kind = _device_kind()
    bf16_epilogue = _use_bf16_epilogue(kind)
    num_grid_steps = _default_grid_steps(kind)

    key = jax.random.PRNGKey(0)
    pkey, xkey = jax.random.split(key)

    params = init_params(pkey)
    kernel_params = prepare_kernel_params(params, bf16_epilogue=bf16_epilogue)

    # Batch of feature rows (original data is scaled by 2**15 -> roughly [-1, 1]).
    # TODO(synk): original script loads 'data_右.txt'; synthetic input used instead.
    B = 512
    x = jax.random.uniform(xkey, (B, 96), minval=-1.0, maxval=1.0,
                           dtype=jnp.float32)

    out = mlp_forward(x, kernel_params, bf16_epilogue=bf16_epilogue,
                      num_grid_steps=num_grid_steps)
    out = jax.block_until_ready(out)

    ref = mlp_reference(x, params)  # f32 reference with unpadded weights
    # bf16 MXU operands (+ bf16 epilogue on v6e/v7x) -> loosened tolerance.
    np.testing.assert_allclose(np.asarray(out), np.asarray(ref),
                               rtol=2.5e-2, atol=2.5e-2)
    print("KERNEL_OK")
</pallas_src>

<mosaic_0001>
module attributes {stable_mosaic.version = 11 : i64} {
  func.func @mlp_kernel(%arg0: i32, %arg1: memref<512x96xf32, #tpu.memory_space<vmem>>, %arg2: memref<96x256xbf16, #tpu.memory_space<vmem>>, %arg3: memref<1x256xf32, #tpu.memory_space<vmem>>, %arg4: memref<256x256xbf16, #tpu.memory_space<vmem>>, %arg5: memref<1x256xf32, #tpu.memory_space<vmem>>, %arg6: memref<256x256xbf16, #tpu.memory_space<vmem>>, %arg7: memref<1x256xf32, #tpu.memory_space<vmem>>, %arg8: memref<256x128xbf16, #tpu.memory_space<vmem>>, %arg9: memref<1x128xf32, #tpu.memory_space<vmem>>, %arg10: memref<512x128xf32, #tpu.memory_space<vmem>>) attributes {dimension_semantics = [#tpu.dimension_semantics<parallel>], iteration_bounds = array<i64: 1>, scalar_prefetch = 0 : i64, scratch_operands = 0 : i64, tpu.core_type = #tpu.core_type<tc>, window_params = [{transform_indices = @transform_0, window_bounds = array<i64: 512, 96>}, {pipeline_mode = #tpu.pipeline_mode<synchronous>, transform_indices = @transform_1, window_bounds = array<i64: 96, 256>}, {pipeline_mode = #tpu.pipeline_mode<synchronous>, transform_indices = @transform_2, window_bounds = array<i64: 1, 256>}, {pipeline_mode = #tpu.pipeline_mode<synchronous>, transform_indices = @transform_3, window_bounds = array<i64: 256, 256>}, {pipeline_mode = #tpu.pipeline_mode<synchronous>, transform_indices = @transform_4, window_bounds = array<i64: 1, 256>}, {pipeline_mode = #tpu.pipeline_mode<synchronous>, transform_indices = @transform_5, window_bounds = array<i64: 256, 256>}, {pipeline_mode = #tpu.pipeline_mode<synchronous>, transform_indices = @transform_6, window_bounds = array<i64: 1, 256>}, {pipeline_mode = #tpu.pipeline_mode<synchronous>, transform_indices = @transform_7, window_bounds = array<i64: 256, 128>}, {pipeline_mode = #tpu.pipeline_mode<synchronous>, transform_indices = @transform_8, window_bounds = array<i64: 1, 128>}, {transform_indices = @transform_9, window_bounds = array<i64: 512, 128>}]} {
    %c0 = arith.constant 0 : index
    %c0_0 = arith.constant 0 : index
    %0 = vector.load %arg1[%c0, %c0_0] : memref<512x96xf32, #tpu.memory_space<vmem>>, vector<512x96xf32>
    %1 = arith.truncf %0 : vector<512x96xf32> to vector<512x96xbf16>
    %c0_1 = arith.constant 0 : index
    %c0_2 = arith.constant 0 : index
    %2 = vector.load %arg2[%c0_1, %c0_2] : memref<96x256xbf16, #tpu.memory_space<vmem>>, vector<96x256xbf16>
    %cst = arith.constant dense<0.000000e+00> : vector<512x256xf32>
    %3 = tpu.matmul %1, %2, %cst {dimension_numbers = #tpu.dot_dimension_numbers<[1], [0], [0], [1], [0, 0, 1, 1], [], []>} : vector<512x96xbf16>, vector<96x256xbf16>, vector<512x256xf32> -> vector<512x256xf32>
    %c0_3 = arith.constant 0 : index
    %c0_4 = arith.constant 0 : index
    %4 = vector.load %arg3[%c0_3, %c0_4] : memref<1x256xf32, #tpu.memory_space<vmem>>, vector<1x256xf32>
    %5 = vector.broadcast %4 : vector<1x256xf32> to vector<512x256xf32>
    %6 = arith.addf %3, %5 : vector<512x256xf32>
    %7 = math.tanh %6 : vector<512x256xf32>
    %8 = arith.truncf %7 : vector<512x256xf32> to vector<512x256xbf16>
    %c0_5 = arith.constant 0 : index
    %c0_6 = arith.constant 0 : index
    %9 = vector.load %arg4[%c0_5, %c0_6] : memref<256x256xbf16, #tpu.memory_space<vmem>>, vector<256x256xbf16>
    %cst_7 = arith.constant dense<0.000000e+00> : vector<512x256xf32>
    %10 = tpu.matmul %8, %9, %cst_7 {dimension_numbers = #tpu.dot_dimension_numbers<[1], [0], [0], [1], [0, 0, 1, 1], [], []>} : vector<512x256xbf16>, vector<256x256xbf16>, vector<512x256xf32> -> vector<512x256xf32>
    %c0_8 = arith.constant 0 : index
    %c0_9 = arith.constant 0 : index
    %11 = vector.load %arg5[%c0_8, %c0_9] : memref<1x256xf32, #tpu.memory_space<vmem>>, vector<1x256xf32>
    %12 = vector.broadcast %11 : vector<1x256xf32> to vector<512x256xf32>
    %13 = arith.addf %10, %12 : vector<512x256xf32>
    %14 = math.tanh %13 : vector<512x256xf32>
    %15 = arith.truncf %14 : vector<512x256xf32> to vector<512x256xbf16>
    %c0_10 = arith.constant 0 : index
    %c0_11 = arith.constant 0 : index
    %16 = vector.load %arg6[%c0_10, %c0_11] : memref<256x256xbf16, #tpu.memory_space<vmem>>, vector<256x256xbf16>
    %cst_12 = arith.constant dense<0.000000e+00> : vector<512x256xf32>
    %17 = tpu.matmul %15, %16, %cst_12 {dimension_numbers = #tpu.dot_dimension_numbers<[1], [0], [0], [1], [0, 0, 1, 1], [], []>} : vector<512x256xbf16>, vector<256x256xbf16>, vector<512x256xf32> -> vector<512x256xf32>
    %c0_13 = arith.constant 0 : index
    %c0_14 = arith.constant 0 : index
    %18 = vector.load %arg7[%c0_13, %c0_14] : memref<1x256xf32, #tpu.memory_space<vmem>>, vector<1x256xf32>
    %19 = vector.broadcast %18 : vector<1x256xf32> to vector<512x256xf32>
    %20 = arith.addf %17, %19 : vector<512x256xf32>
    %21 = math.tanh %20 : vector<512x256xf32>
    %22 = arith.truncf %21 : vector<512x256xf32> to vector<512x256xbf16>
    %c0_15 = arith.constant 0 : index
    %c0_16 = arith.constant 0 : index
    %23 = vector.load %arg8[%c0_15, %c0_16] : memref<256x128xbf16, #tpu.memory_space<vmem>>, vector<256x128xbf16>
    %cst_17 = arith.constant dense<0.000000e+00> : vector<512x128xf32>
    %24 = tpu.matmul %22, %23, %cst_17 {dimension_numbers = #tpu.dot_dimension_numbers<[1], [0], [0], [1], [0, 0, 1, 1], [], []>} : vector<512x256xbf16>, vector<256x128xbf16>, vector<512x128xf32> -> vector<512x128xf32>
    %c0_18 = arith.constant 0 : index
    %c0_19 = arith.constant 0 : index
    %25 = vector.load %arg9[%c0_18, %c0_19] : memref<1x128xf32, #tpu.memory_space<vmem>>, vector<1x128xf32>
    %26 = vector.broadcast %25 : vector<1x128xf32> to vector<512x128xf32>
    %27 = arith.addf %24, %26 : vector<512x128xf32>
    %c0_20 = arith.constant 0 : index
    %c0_21 = arith.constant 0 : index
    %28 = vector.load %arg10[%c0_20, %c0_21] : memref<512x128xf32, #tpu.memory_space<vmem>>, vector<512x128xf32>
    tpu.vector_store %arg10[%c0_20, %c0_21], %27 {strides = array<i32>} : memref<512x128xf32, #tpu.memory_space<vmem>>, vector<512x128xf32>,
    return
  }
  func.func @transform_0(%arg0: i32) -> (i32, i32) {
    %c0_i32 = arith.constant 0 : i32
    %c0_i32_0 = arith.constant 0 : i32
    return %arg0, %c0_i32 : i32, i32
  }
  func.func @transform_1(%arg0: i32) -> (i32, i32) {
    %c0_i32 = arith.constant 0 : i32
    %c0_i32_0 = arith.constant 0 : i32
    %c0_i32_1 = arith.constant 0 : i32
    return %c0_i32, %c0_i32_0 : i32, i32
  }
  func.func @transform_2(%arg0: i32) -> (i32, i32) {
    %c0_i32 = arith.constant 0 : i32
    %c0_i32_0 = arith.constant 0 : i32
    %c0_i32_1 = arith.constant 0 : i32
    return %c0_i32, %c0_i32_0 : i32, i32
  }
  func.func @transform_3(%arg0: i32) -> (i32, i32) {
    %c0_i32 = arith.constant 0 : i32
    %c0_i32_0 = arith.constant 0 : i32
    %c0_i32_1 = arith.constant 0 : i32
    return %c0_i32, %c0_i32_0 : i32, i32
  }
  func.func @transform_4(%arg0: i32) -> (i32, i32) {
    %c0_i32 = arith.constant 0 : i32
    %c0_i32_0 = arith.constant 0 : i32
    %c0_i32_1 = arith.constant 0 : i32
    return %c0_i32, %c0_i32_0 : i32, i32
  }
  func.func @transform_5(%arg0: i32) -> (i32, i32) {
    %c0_i32 = arith.constant 0 : i32
    %c0_i32_0 = arith.constant 0 : i32
    %c0_i32_1 = arith.constant 0 : i32
    return %c0_i32, %c0_i32_0 : i32, i32
  }
  func.func @transform_6(%arg0: i32) -> (i32, i32) {
    %c0_i32 = arith.constant 0 : i32
    %c0_i32_0 = arith.constant 0 : i32
    %c0_i32_1 = arith.constant 0 : i32
    return %c0_i32, %c0_i32_0 : i32, i32
  }
  func.func @transform_7(%arg0: i32) -> (i32, i32) {
    %c0_i32 = arith.constant 0 : i32
    %c0_i32_0 = arith.constant 0 : i32
    %c0_i32_1 = arith.constant 0 : i32
    return %c0_i32, %c0_i32_0 : i32, i32
  }
  func.func @transform_8(%arg0: i32) -> (i32, i32) {
    %c0_i32 = arith.constant 0 : i32
    %c0_i32_0 = arith.constant 0 : i32
    %c0_i32_1 = arith.constant 0 : i32
    return %c0_i32, %c0_i32_0 : i32, i32
  }
  func.func @transform_9(%arg0: i32) -> (i32, i32) {
    %c0_i32 = arith.constant 0 : i32
    %c0_i32_0 = arith.constant 0 : i32
    return %arg0, %c0_i32 : i32, i32
  }
}

</mosaic_0001>

<bundles_post_ra>
// kernel: tpu_custom_call.1
= control target key start
LH: loop header
LB: loop body
LE: loop exit
PB: predicated region body
PF: predicated region fallthrough
CT: control target
= control target key end

     0   :  { %s6945_s0 = inlined_call_operand.vmem [shape: f32[512,96], index: 0, kind: input, shape index: {}]   ;;  %s6946_s1 = inlined_call_operand.vmem [shape: bf16[96,256], index: 1, kind: input, shape index: {}]   ;;  %s6947_s2 = inlined_call_operand.vmem [shape: f32[1,256], index: 2, kind: input, shape index: {}]   ;;  %s6948_s3 = inlined_call_operand.vmem [shape: bf16[256,256], index: 3, kind: input, shape index: {}]   ;;  %s6949_s4 = inlined_call_operand.vmem [shape: f32[1,256], index: 4, kind: input, shape index: {}]   ;;  %s6950_s5 = inlined_call_operand.vmem [shape: bf16[256,256], index: 5, kind: input, shape index: {}]   ;;  %s6951_s6 = inlined_call_operand.vmem [shape: f32[1,256], index: 6, kind: input, shape index: {}]   ;;  %s6952_s7 = inlined_call_operand.vmem [shape: bf16[256,128], index: 7, kind: input, shape index: {}]   ;;  %s6953_s8 = inlined_call_operand.vmem [shape: f32[1,128], index: 8, kind: input, shape index: {}]   ;;  %s6954_s9 = inlined_call_operand.hbm [shape: f32[512,128], index: 9, kind: output, shape index: {}]  }
   0x1   :  { %v3561_v0 = vld [vmem:[%s6946_s1 + $0x50] sm:$0xf]  ;;  %v3962_v1 = vld [vmem:[%s6946_s1 + $0x54] sm:$0xf0]  ;;  %v3961_v2 = vld [vmem:[%s6946_s1 + $0x54] sm:$0xf] }
   0x2   :  { %v3562_v3 = vor.u32 %v3962_v1, %v3561_v0  ;;  %v3563_v4 = vld [vmem:[%s6946_s1 + $0x58] sm:$0xf0]  ;;  %v3553_v5 = vld [vmem:[%s6946_s1 + $0x40] sm:$0xf]  ;;  %v3960_v6 = vld [vmem:[%s6946_s1 + $0x44] sm:$0xf0] }
   0x3   :  { %v3566_v7 = vor.u32 %v3961_v2, %v3563_v4  ;;  %v3959_v8 = vld [vmem:[%s6946_s1 + $0x44] sm:$0xf]  ;;  %v3555_v9 = vld [vmem:[%s6946_s1 + $0x48] sm:$0xf0]  ;;  %v3554_v10 = vor.u32 %v3960_v6, %v3553_v5  ;;  %v3545_v12 = vld [vmem:[%s6946_s1 + $0x30] sm:$0xf] }
   0x4   :  { %307 = vmatpush.bf16.msra.mxu0 %v3562_v3  ;;  %v3558_v11 = vor.u32 %v3959_v8, %v3555_v9  ;;  %v3958_v13 = vld [vmem:[%s6946_s1 + $0x34] sm:$0xf0]  ;;  %v3957_v14 = vld [vmem:[%s6946_s1 + $0x34] sm:$0xf]  ;;  %v3547_v15 = vld [vmem:[%s6946_s1 + $0x38] sm:$0xf0] }
   0x5   :  { %476 = vmatpush.bf16.msra.mxu1 %v3566_v7  ;;  %v3546_v16 = vor.u32 %v3958_v13, %v3545_v12  ;;  %v3550_v17 = vor.u32 %v3957_v14, %v3547_v15  ;;  %v3537_v18 = vld [vmem:[%s6946_s1 + $0x20] sm:$0xf]  ;;  %v3956_v19 = vld [vmem:[%s6946_s1 + $0x24] sm:$0xf0]  ;;  %v3955_v20 = vld [vmem:[%s6946_s1 + $0x24] sm:$0xf] }
   0x6   :  { %v3539_v21 = vld [vmem:[%s6946_s1 + $0x28] sm:$0xf0]  ;;  %v3538_v22 = vor.u32 %v3956_v19, %v3537_v18 }
   0x8   :  { %308 = vmatpush.bf16.msra.mxu0 %v3554_v10 }
   0x9   :  { %477 = vmatpush.bf16.msra.mxu1 %v3558_v11 }
   0xc   :  { %309 = vmatpush.bf16.msra.mxu0 %v3546_v16 }
   0xd   :  { %14 = vsyncpa [#allocation3], 0  ;;  %478 = vmatpush.bf16.msra.mxu1 %v3550_v17  ;;  %v3542_v23 = vor.u32 %v3955_v20, %v3539_v21  ;;  %v3529_v24 = vld [vmem:[%s6946_s1 + $0x10] sm:$0xf]  ;;  %v3954_v25 = vld [vmem:[%s6946_s1 + $0x14] sm:$0xf0] }
   0xe   :  { %v3953_v26 = vld [vmem:[%s6946_s1 + $0x14] sm:$0xf]  ;;  %v3531_v27 = vld [vmem:[%s6946_s1 + $0x18] sm:$0xf0]  ;;  %v3530_v28 = vor.u32 %v3954_v25, %v3529_v24  ;;  %v3521_v30 = vld [vmem:[%s6946_s1] sm:$0xf] }
   0xf   :  { %v3534_v29 = vor.u32 %v3953_v26, %v3531_v27  ;;  %v3952_v31 = vld [vmem:[%s6946_s1 + $0x4] sm:$0xf0]  ;;  %v3951_v32 = vld [vmem:[%s6946_s1 + $0x4] sm:$0xf]  ;;  %v3523_v33 = vld [vmem:[%s6946_s1 + $0x8] sm:$0xf0] }
  0x10   :  { %310 = vmatpush.bf16.msra.mxu0 %v3538_v22  ;;  %v3977_v34 = vld [vmem:[%s6948_s3 + $0x74] sm:$0xf]  ;;  %v3691_v35 = vld [vmem:[%s6948_s3 + $0x78] sm:$0xf0]  ;;  %v3522_v38 = vor.u32 %v3952_v31, %v3521_v30  ;;  %v34_v39 = vld [vmem:[%s6945_s0] sm:$0xff]  ;;  %v3526_v41 = vor.u32 %v3951_v32, %v3523_v33  ;;  %vm208_vm0 = vcmask 785408  }
  0x11   :  { %479 = vmatpush.bf16.msra.mxu1 %v3542_v23  ;;  %v3993_v36 = vld [vmem:[%s6948_s3 + $0xf4] sm:$0xf]  ;;  %v3755_v37 = vld [vmem:[%s6948_s3 + $0xf8] sm:$0xf0]  ;;  %v35_v40 = vld [vmem:[%s6945_s0 + $0x8] sm:$0xff]  ;;  %v3694_v42 = vor.u32 %v3977_v34, %v3691_v35  ;;  %s3507_s22 = sshll.u32 %s6954_s9, 4  ;;  %s3508_s22 = int_to_ptr.hbm [resolvable:$true] %s3507_s22 }
  0x12   :  { %v3758_v43 = vor.u32 %v3993_v36, %v3755_v37  ;;  %v98_v44 = vpack.c.bf16 %v35_v40, %v34_v39  ;;  %v36_v45 = vld [vmem:[%s6945_s0 + $0x10] sm:$0xff]  ;;  %v37_v46 = vld [vmem:[%s6945_s0 + $0x18] sm:$0xff]  ;;  %v38_v48 = vld [vmem:[%s6945_s0 + $0x20] sm:$0xff]  ;;  %s4845_s23 = smov 128  }
  0x13   :  { %v99_v47 = vpack.c.bf16 %v37_v46, %v36_v45  ;;  %v39_v49 = vld [vmem:[%s6945_s0 + $0x28] sm:$0xff]  ;;  %v3975_v51 = vld [vmem:[%s6948_s3 + $0x64] sm:$0xf]  ;;  %v40_v57 = vld [vmem:[%s6945_s0 + $0x30] sm:$0xff] }
  0x14   :  { %311 = vmatpush.bf16.msra.mxu0 %v3530_v28  ;;  %v100_v50 = vpack.c.bf16 %v39_v49, %v38_v48  ;;  %v3683_v52 = vld [vmem:[%s6948_s3 + $0x68] sm:$0xf0]  ;;  %v3991_v53 = vld [vmem:[%s6948_s3 + $0xe4] sm:$0xf]  ;;  %v41_v58 = vld [vmem:[%s6945_s0 + $0x38] sm:$0xff] }
  0x15   :  { %480 = vmatpush.bf16.msra.mxu1 %v3534_v29  ;;  %v3686_v54 = vor.u32 %v3975_v51, %v3683_v52  ;;  %v3747_v55 = vld [vmem:[%s6948_s3 + $0xe8] sm:$0xf0]  ;;  %v101_v59 = vpack.c.bf16 %v41_v58, %v40_v57  ;;  %v42_v60 = vld [vmem:[%s6945_s0 + $0x40] sm:$0xff]  ;;  %v44_v63 = vld [vmem:[%s6945_s0 + $0x50] sm:$0xff] }
  0x16   :  { %v3750_v56 = vor.u32 %v3991_v53, %v3747_v55  ;;  %v43_v61 = vld [vmem:[%s6945_s0 + $0x48] sm:$0xff]  ;;  %v45_v0 = vld [vmem:[%s6945_s0 + $0x58] sm:$0xff]  ;;  %v3689_v2 = vld [vmem:[%s6948_s3 + $0x70] sm:$0xf] }
  0x17   :  { %v102_v62 = vpack.c.bf16 %v43_v61, %v42_v60  ;;  %v103_v1 = vpack.c.bf16 %v45_v0, %v44_v63  ;;  %v3978_v3 = vld [vmem:[%s6948_s3 + $0x74] sm:$0xf0]  ;;  %v3753_v4 = vld [vmem:[%s6948_s3 + $0xf0] sm:$0xf]  ;;  %v3681_v7 = vld [vmem:[%s6948_s3 + $0x60] sm:$0xf] }
  0x18   :  { %312 = vmatpush.bf16.msra.mxu0 %v3522_v38  ;;  %v3690_v5 = vor.u32 %v3978_v3, %v3689_v2  ;;  %v3994_v6 = vld [vmem:[%s6948_s3 + $0xf4] sm:$0xf0]  ;;  %v3976_v8 = vld [vmem:[%s6948_s3 + $0x64] sm:$0xf0]  ;;  %v3745_v10 = vld [vmem:[%s6948_s3 + $0xe0] sm:$0xf] }
  0x19   :  { %481 = vmatpush.bf16.msra.mxu1 %v3526_v41  ;;  %v3754_v9 = vor.u32 %v3994_v6, %v3753_v4  ;;  %v3992_v11 = vld [vmem:[%s6948_s3 + $0xe4] sm:$0xf0]  ;;  %v3682_v12 = vor.u32 %v3976_v8, %v3681_v7  ;;  %v3673_v14 = vld [vmem:[%s6948_s3 + $0x50] sm:$0xf]  ;;  %v3974_v15 = vld [vmem:[%s6948_s3 + $0x54] sm:$0xf0] }
  0x1a   :  { %1033 = vmatpush.bf16.msra.mxu2 %v3690_v5  ;;  %v3746_v13 = vor.u32 %v3992_v11, %v3745_v10  ;;  %v3737_v16 = vld [vmem:[%s6948_s3 + $0xd0] sm:$0xf]  ;;  %v3990_v17 = vld [vmem:[%s6948_s3 + $0xd4] sm:$0xf0]  ;;  %v3674_v18 = vor.u32 %v3974_v15, %v3673_v14  ;;  %v46_v20 = vld [vmem:[%s6945_s0 + $0x60] sm:$0xff] }
  0x1b   :  { %3567 = vmatmul.msk.bf16.vlgmr.msra.gmra.mxu0 %vm208_vm0, %v98_v44  ;;  %1202 = vmatpush.bf16.msra.mxu3 %v3754_v9  ;;  %v3738_v19 = vor.u32 %v3990_v17, %v3737_v16  ;;  %v47_v21 = vld [vmem:[%s6945_s0 + $0x68] sm:$0xff]  ;;  %v3665_v23 = vld [vmem:[%s6948_s3 + $0x40] sm:$0xf]  ;;  %v3657_v29 = vld [vmem:[%s6948_s3 + $0x30] sm:$0xf] }
  0x1c   :  { %1371 = vmatpush.bf16.msrb.mxu0 %v3694_v42  ;;  %3599 = vmatmul.msk.bf16.vlgmr.msra.gmra.mxu1 %vm208_vm0, %v98_v44  ;;  %v104_v22 = vpack.c.bf16 %v47_v21, %v46_v20  ;;  %v3972_v24 = vld [vmem:[%s6948_s3 + $0x44] sm:$0xf0]  ;;  %v3729_v25 = vld [vmem:[%s6948_s3 + $0xc0] sm:$0xf]  ;;  %v3970_v30 = vld [vmem:[%s6948_s3 + $0x34] sm:$0xf0] }
  0x1d   :  { %1540 = vmatpush.bf16.msrb.mxu1 %v3758_v43  ;;  %v3666_v26 = vor.u32 %v3972_v24, %v3665_v23  ;;  %v3988_v27 = vld [vmem:[%s6948_s3 + $0xc4] sm:$0xf0]  ;;  %v3721_v31 = vld [vmem:[%s6948_s3 + $0xb0] sm:$0xf]  ;;  %v3973_v32 = vld [vmem:[%s6948_s3 + $0x54] sm:$0xf]  ;;  %v3658_v34 = vor.u32 %v3970_v30, %v3657_v29 }
  0x1e   :  { %1034 = vmatpush.bf16.msra.mxu2 %v3682_v12  ;;  %v3730_v28 = vor.u32 %v3988_v27, %v3729_v25  ;;  %v3675_v33 = vld [vmem:[%s6948_s3 + $0x58] sm:$0xf0]  ;;  %v3986_v35 = vld [vmem:[%s6948_s3 + $0xb4] sm:$0xf0]  ;;  %v3989_v38 = vld [vmem:[%s6948_s3 + $0xd4] sm:$0xf] }
  0x1f   :  { %1203 = vmatpush.bf16.msra.mxu3 %v3746_v13  ;;  %v3678_v36 = vor.u32 %v3973_v32, %v3675_v33  ;;  %v3722_v37 = vor.u32 %v3986_v35, %v3721_v31  ;;  %v3739_v39 = vld [vmem:[%s6948_s3 + $0xd8] sm:$0xf0]  ;;  %v3649_v41 = vld [vmem:[%s6948_s3 + $0x20] sm:$0xf]  ;;  %v3968_v42 = vld [vmem:[%s6948_s3 + $0x24] sm:$0xf0] }
  0x20   :  { %1372 = vmatpush.bf16.msrb.mxu0 %v3686_v54  ;;  %v3742_v40 = vor.u32 %v3989_v38, %v3739_v39  ;;  %v3713_v43 = vld [vmem:[%s6948_s3 + $0xa0] sm:$0xf]  ;;  %v3650_v44 = vor.u32 %v3968_v42, %v3649_v41  ;;  %v3984_v45 = vld [vmem:[%s6948_s3 + $0xa4] sm:$0xf0]  ;;  %v3966_v48 = vld [vmem:[%s6948_s3 + $0x14] sm:$0xf0] }
  0x21   :  { %1541 = vmatpush.bf16.msrb.mxu1 %v3750_v56  ;;  %v3714_v46 = vor.u32 %v3984_v45, %v3713_v43  ;;  %v3705_v49 = vld [vmem:[%s6948_s3 + $0x90] sm:$0xf]  ;;  %v49_v51 = vld [vmem:[%s6945_s0 + $0x78] sm:$0xff]  ;;  %v3633_v56 = vld [vmem:[%s6948_s3] sm:$0xf] }
  0x22   :  { %1035 = vmatpush.bf16.msra.mxu2 %v3674_v18  ;;  %v3982_v53 = vld [vmem:[%s6948_s3 + $0x94] sm:$0xf0]  ;;  %v3964_v57 = vld [vmem:[%s6948_s3 + $0x4] sm:$0xf0]  ;;  %v3697_v58 = vld [vmem:[%s6948_s3 + $0x80] sm:$0xf] }
  0x23   :  { %1204 = vmatpush.bf16.msra.mxu3 %v3738_v19  ;;  %v3706_v54 = vor.u32 %v3982_v53, %v3705_v49  ;;  %v3980_v60 = vld [vmem:[%s6948_s3 + $0x84] sm:$0xf0]  ;;  %v4010_v63 = vld [vmem:[%s6950_s5 + $0x74] sm:$0xf0]  ;;  %v3881_v0 = vld [vmem:[%s6950_s5 + $0xf0] sm:$0xf] }
  0x24   :  { %1373 = vmatpush.bf16.msrb.mxu0 %v3678_v36  ;;  %v3698_v61 = vor.u32 %v3980_v60, %v3697_v58  ;;  %v4026_v2 = vld [vmem:[%s6950_s5 + $0xf4] sm:$0xf0]  ;;  %v50_v4 = vld [vmem:[%s6945_s0 + $0x80] sm:$0xff]  ;;  %v51_v5 = vld [vmem:[%s6945_s0 + $0x88] sm:$0xff] }
  0x25   :  { %1542 = vmatpush.bf16.msrb.mxu1 %v3742_v40  ;;  %v3882_v3 = vor.u32 %v4026_v2, %v3881_v0  ;;  %v142_v6 = vld [vmem:[%s6947_s2] sm:$0x3]  ;;  %v106_v7 = vpack.c.bf16 %v51_v5, %v50_v4  ;;  %v52_v18 = vld [vmem:[%s6945_s0 + $0x90] sm:$0xff]  ;;  %v53_v19 = vld [vmem:[%s6945_s0 + $0x98] sm:$0xff] }
  0x26   :  { %1036 = vmatpush.bf16.msra.mxu2 %v3666_v26  ;;  %v5186_v9 = vperm.slane %v142_v6, 0  ;;  %v5188_v11 = vperm.slane %v142_v6, 1  ;;  %v107_v21 = vpack.c.bf16 %v53_v19, %v52_v18  ;;  %v54_v35 = vld [vmem:[%s6945_s0 + $0xa0] sm:$0xff]  ;;  %v55_v36 = vld [vmem:[%s6945_s0 + $0xa8] sm:$0xff]  ;;  %v56_v58 = vld [vmem:[%s6945_s0 + $0xb0] sm:$0xff] }
  0x27   :  { %1205 = vmatpush.bf16.msra.mxu3 %v3730_v28  ;;  %v108_v38 = vpack.c.bf16 %v55_v36, %v54_v35  ;;  %v3809_v6 = vld [vmem:[%s6950_s5 + $0x60] sm:$0xf] }
  0x28   :  { %v58_v19 = vld [vmem:[%s6945_s0 + $0xc0] sm:$0xff] }
  0x2a   :  { %1037 = vmatpush.bf16.msra.mxu2 %v3658_v34 }
  0x2b   :  { %3568 = vmatmul.msk.bf16.gmra.mxu0 %vm208_vm0, %v99_v47  ;;  %1206 = vmatpush.bf16.msra.mxu3 %v3722_v37 }
  0x2c   :  { %3600 = vmatmul.msk.bf16.gmra.mxu1 %vm208_vm0, %v99_v47  ;;  %v3641_v47 = vld [vmem:[%s6948_s3 + $0x10] sm:$0xf] }
  0x2d   :  { %v3642_v52 = vor.u32 %v3966_v48, %v3641_v47  ;;  %v3667_v47 = vld [vmem:[%s6948_s3 + $0x48] sm:$0xf0] }
  0x2e   :  { %1038 = vmatpush.bf16.msra.mxu2 %v3650_v44 }
  0x2f   :  { %1207 = vmatpush.bf16.msra.mxu3 %v3714_v46  ;;  %v3971_v46 = vld [vmem:[%s6948_s3 + $0x44] sm:$0xf] }
  0x30   :  { %v3670_v49 = vor.u32 %v3971_v46, %v3667_v47 }
  0x32   :  { %1039 = vmatpush.bf16.msra.mxu2 %v3642_v52  ;;  %1374 = vmatpush.bf16.msrb.mxu0 %v3670_v49 }
  0x33   :  { %1208 = vmatpush.bf16.msra.mxu3 %v3706_v54 }
  0x37   :  { %1209 = vmatpush.bf16.msra.mxu3 %v3698_v61 }
  0x3b   :  { %3569 = vmatmul.msk.bf16.gmra.mxu0 %vm208_vm0, %v100_v50  ;;  %2268 = vmatpush.bf16.msrb.mxu3 %v3882_v3 }
  0x3c   :  { %3601 = vmatmul.msk.bf16.gmra.mxu1 %vm208_vm0, %v100_v50  ;;  %v48_v50 = vld [vmem:[%s6945_s0 + $0x70] sm:$0xff] }
  0x3d   :  { %v105_v55 = vpack.c.bf16 %v49_v51, %v48_v50  ;;  %v3987_v50 = vld [vmem:[%s6948_s3 + $0xc4] sm:$0xf]  ;;  %v3731_v51 = vld [vmem:[%s6948_s3 + $0xc8] sm:$0xf0] }
  0x3e   :  { %v3734_v53 = vor.u32 %v3987_v50, %v3731_v51 }
  0x40   :  { %1543 = vmatpush.bf16.msrb.mxu1 %v3734_v53 }
  0x4b   :  { %3570 = vmatmul.msk.bf16.gmra.mxu0 %vm208_vm0, %v101_v59 }
  0x4c   :  { %3602 = vmatmul.msk.bf16.gmra.mxu1 %vm208_vm0, %v101_v59  ;;  %v3634_v59 = vor.u32 %v3964_v57, %v3633_v56 }
  0x4e   :  { %1040 = vmatpush.bf16.msra.mxu2 %v3634_v59  ;;  %v57_v59 = vld [vmem:[%s6945_s0 + $0xb8] sm:$0xff] }
  0x4f   :  { %v109_v61 = vpack.c.bf16 %v57_v59, %v56_v58  ;;  %v63_v58 = vld [vmem:[%s6945_s0 + $0xe8] sm:$0xff] }
  0x5b   :  { %3571 = vmatmul.msk.bf16.gmra.mxu0 %vm208_vm0, %v102_v62 }
  0x5c   :  { %3603 = vmatmul.msk.bf16.gmra.mxu1 %vm208_vm0, %v102_v62  ;;  %v3817_v62 = vld [vmem:[%s6950_s5 + $0x70] sm:$0xf] }
  0x6b   :  { %3572 = vmatmul.msk.bf16.gmra.mxu0 %vm208_vm0, %v103_v1 }
  0x6c   :  { %3604 = vmatmul.msk.bf16.gmra.mxu1 %vm208_vm0, %v103_v1  ;;  %v3818_v1 = vor.u32 %v4010_v63, %v3817_v62 }
  0x6e   :  { %2099 = vmatpush.bf16.msrb.mxu2 %v3818_v1 }
  0x7b   :  { %3573 = vmatmul.msk.bf16.gmra.mxu0 %vm208_vm0, %v104_v22 }
  0x7c   :  { %3605 = vmatmul.msk.bf16.gmra.mxu1 %vm208_vm0, %v104_v22 }
  0x8b   :  { %3574 = vmatmul.msk.bf16.gmra.mxu0 %vm208_vm0, %v105_v55 }
  0x8c   :  { %3606 = vmatmul.msk.bf16.gmra.mxu1 %vm208_vm0, %v105_v55 }
  0x98   :  { %v314_v8 = vpop.f32.mrf.mxu0 }
  0x99   :  { %v483_v10 = vpop.f32.mrf.mxu1  ;;  %v315_v12 = vadd.f32 %v314_v8, %v5186_v9  ;;  %v3873_v8 = vld [vmem:[%s6950_s5 + $0xe0] sm:$0xf] }
  0x9a   :  { %v484_v13 = vadd.f32 %v483_v10, %v5188_v11 }
  0x9b   :  { %3575 = vmatmul.msk.bf16.gmra.mxu0 %vm208_vm0, %v106_v7  ;;  %4047 = vtanh.f32 %v315_v12 }
  0x9c   :  { %3607 = vmatmul.msk.bf16.gmra.mxu1 %vm208_vm0, %v106_v7  ;;  %4049 = vtanh.f32 %v484_v13  ;;  %v4008_v7 = vld [vmem:[%s6950_s5 + $0x64] sm:$0xf0] }
  0x9d   :  { %v3810_v12 = vor.u32 %v4008_v7, %v3809_v6  ;;  %v4024_v13 = vld [vmem:[%s6950_s5 + $0xe4] sm:$0xf0]  ;;  %v3969_v6 = vld [vmem:[%s6948_s3 + $0x34] sm:$0xf]  ;;  %v3659_v7 = vld [vmem:[%s6948_s3 + $0x38] sm:$0xf0] }
  0x9f   :  { %2100 = vmatpush.bf16.msrb.mxu2 %v3810_v12  ;;  %v3985_v12 = vld [vmem:[%s6948_s3 + $0xb4] sm:$0xf] }
  0xa0   :  { %v316_v14 = vpop.f32.mrf.mxu0 }
  0xa1   :  { %v317_v15 = vadd.f32 %v316_v14, %v5186_v9  ;;  %v485_v16 = vpop.f32.mrf.mxu1  ;;  %v4048_v20 = vpop.eup %4047  ;;  %v3874_v14 = vor.u32 %v4024_v13, %v3873_v8  ;;  %v3723_v13 = vld [vmem:[%s6948_s3 + $0xb8] sm:$0xf0] }
  0xa2   :  { %v486_v17 = vadd.f32 %v485_v16, %v5188_v11  ;;  %v4050_v22 = vpop.eup %4049 }
  0xa3   :  { %4051 = vtanh.f32 %v317_v15  ;;  %2269 = vmatpush.bf16.msrb.mxu3 %v3874_v14 }
  0xa4   :  { %4053 = vtanh.f32 %v486_v17 }
  0xa8   :  { %v319_v23 = vpop.f32.mrf.mxu0 }
  0xa9   :  { %v4052_v24 = vpop.eup %4051  ;;  %v488_v25 = vpop.f32.mrf.mxu1  ;;  %v320_v29 = vadd.f32 %v319_v23, %v5186_v9 }
  0xaa   :  { %v4054_v26 = vpop.eup %4053  ;;  %v5202_v27 = vpack.c.bf16 %v4052_v24, %v4048_v20  ;;  %v489_v30 = vadd.f32 %v488_v25, %v5188_v11  ;;  %v59_v20 = vld [vmem:[%s6945_s0 + $0xc8] sm:$0xff] }
  0xab   :  { %3576 = vmatmul.msk.bf16.gmra.mxu0 %vm208_vm0, %v107_v21  ;;  %v5205_v28 = vpack.c.bf16 %v4054_v26, %v4050_v22  ;;  %4055 = vtanh.f32 %v320_v29  ;;  %v110_v22 = vpack.c.bf16 %v59_v20, %v58_v19  ;;  %v64_v20 = vld [vmem:[%s6945_s0 + $0xf0] sm:$0xff] }
  0xac   :  { %3608 = vmatmul.msk.bf16.gmra.mxu1 %vm208_vm0, %v107_v21  ;;  %1041 = vmatmul.bf16.vlgmr.msra.gmra.mxu2 %v5202_v27  ;;  %4057 = vtanh.f32 %v489_v30 }
  0xad   :  { %1210 = vmatmul.bf16.vlgmr.msra.gmra.mxu3 %v5205_v28 }
  0xb0   :  { %v321_v31 = vpop.f32.mrf.mxu0 }
  0xb1   :  { %v322_v32 = vadd.f32 %v321_v31, %v5186_v9  ;;  %v490_v33 = vpop.f32.mrf.mxu1  ;;  %v4056_v37 = vpop.eup %4055 }
  0xb2   :  { %v491_v34 = vadd.f32 %v490_v33, %v5188_v11  ;;  %v4058_v39 = vpop.eup %4057 }
  0xb3   :  { %4059 = vtanh.f32 %v322_v32 }
  0xb4   :  { %4061 = vtanh.f32 %v491_v34 }
  0xb8   :  { %v324_v40 = vpop.f32.mrf.mxu0 }
  0xb9   :  { %v4060_v41 = vpop.eup %4059  ;;  %v493_v42 = vpop.f32.mrf.mxu1  ;;  %v325_v48 = vadd.f32 %v324_v40, %v5186_v9 }
  0xba   :  { %v4062_v43 = vpop.eup %4061  ;;  %v5220_v44 = vpack.c.bf16 %v4060_v41, %v4056_v37  ;;  %v494_v52 = vadd.f32 %v493_v42, %v5188_v11 }
  0xbb   :  { %3577 = vmatmul.msk.bf16.gmra.mxu0 %vm208_vm0, %v108_v38  ;;  %v5223_v45 = vpack.c.bf16 %v4062_v43, %v4058_v39  ;;  %4063 = vtanh.f32 %v325_v48  ;;  %v61_v39 = vld [vmem:[%s6945_s0 + $0xd8] sm:$0xff] }
  0xbc   :  { %3609 = vmatmul.msk.bf16.gmra.mxu1 %vm208_vm0, %v108_v38  ;;  %1046 = vmatmul.bf16.gmra.mxu2 %v5220_v44  ;;  %4065 = vtanh.f32 %v494_v52  ;;  %v60_v38 = vld [vmem:[%s6945_s0 + $0xd0] sm:$0xff] }
  0xbd   :  { %1215 = vmatmul.bf16.gmra.mxu3 %v5223_v45  ;;  %v111_v41 = vpack.c.bf16 %v61_v39, %v60_v38  ;;  %v3865_v38 = vld [vmem:[%s6950_s5 + $0xd0] sm:$0xf] }
  0xc0   :  { %v326_v54 = vpop.f32.mrf.mxu0 }
  0xc1   :  { %v327_v55 = vadd.f32 %v326_v54, %v5186_v9  ;;  %v495_v56 = vpop.f32.mrf.mxu1  ;;  %v4064_v60 = vpop.eup %4063 }
  0xc2   :  { %v496_v57 = vadd.f32 %v495_v56, %v5188_v11  ;;  %v4066_v62 = vpop.eup %4065 }
  0xc3   :  { %4067 = vtanh.f32 %v327_v55 }
  0xc4   :  { %4069 = vtanh.f32 %v496_v57  ;;  %v62_v57 = vld [vmem:[%s6945_s0 + $0xe0] sm:$0xff] }
  0xc8   :  { %v329_v63 = vpop.f32.mrf.mxu0 }
  0xc9   :  { %v4068_v0 = vpop.eup %4067  ;;  %v498_v1 = vpop.f32.mrf.mxu1  ;;  %v330_v5 = vadd.f32 %v329_v63, %v5186_v9 }
  0xca   :  { %v4070_v2 = vpop.eup %4069  ;;  %v5250_v3 = vpack.c.bf16 %v4068_v0, %v4064_v60  ;;  %v499_v10 = vadd.f32 %v498_v1, %v5188_v11  ;;  %v112_v60 = vpack.c.bf16 %v63_v58, %v62_v57 }
  0xcb   :  { %3578 = vmatmul.msk.bf16.gmra.mxu0 %vm208_vm0, %v109_v61  ;;  %v5253_v4 = vpack.c.bf16 %v4070_v2, %v4066_v62  ;;  %4071 = vtanh.f32 %v330_v5 }
  0xcc   :  { %3610 = vmatmul.msk.bf16.gmra.mxu1 %vm208_vm0, %v109_v61  ;;  %1051 = vmatmul.bf16.gmra.mxu2 %v5250_v3  ;;  %4073 = vtanh.f32 %v499_v10  ;;  %v3662_v10 = vor.u32 %v3969_v6, %v3659_v7 }
  0xcd   :  { %1220 = vmatmul.bf16.gmra.mxu3 %v5253_v4 }
  0xce   :  { %1375 = vmatpush.bf16.msrb.mxu0 %v3662_v10  ;;  %v69_v10 = vld [vmem:[%s6945_s0 + $0x118] sm:$0xff] }
  0xd0   :  { %v331_v15 = vpop.f32.mrf.mxu0 }
  0xd1   :  { %v332_v16 = vadd.f32 %v331_v15, %v5186_v9  ;;  %v500_v17 = vpop.f32.mrf.mxu1  ;;  %v4072_v21 = vpop.eup %4071  ;;  %v3726_v15 = vor.u32 %v3985_v12, %v3723_v13 }
  0xd2   :  { %v501_v18 = vadd.f32 %v500_v17, %v5188_v11  ;;  %v4074_v23 = vpop.eup %4073 }
  0xd3   :  { %4075 = vtanh.f32 %v332_v16  ;;  %1544 = vmatpush.bf16.msrb.mxu1 %v3726_v15 }
  0xd4   :  { %4077 = vtanh.f32 %v501_v18 }
  0xd8   :  { %v334_v24 = vpop.f32.mrf.mxu0 }
  0xd9   :  { %v4076_v25 = vpop.eup %4075  ;;  %v503_v26 = vpop.f32.mrf.mxu1  ;;  %v335_v32 = vadd.f32 %v334_v24, %v5186_v9 }
  0xda   :  { %v4078_v29 = vpop.eup %4077  ;;  %v5280_v30 = vpack.c.bf16 %v4076_v25, %v4072_v21  ;;  %v504_v33 = vadd.f32 %v503_v26, %v5188_v11  ;;  %v65_v21 = vld [vmem:[%s6945_s0 + $0xf8] sm:$0xff] }
  0xdb   :  { %3579 = vmatmul.msk.bf16.gmra.mxu0 %vm208_vm0, %v110_v22  ;;  %v5283_v31 = vpack.c.bf16 %v4078_v29, %v4074_v23  ;;  %4079 = vtanh.f32 %v335_v32  ;;  %v113_v23 = vpack.c.bf16 %v65_v21, %v64_v20 }
  0xdc   :  { %3611 = vmatmul.msk.bf16.gmra.mxu1 %vm208_vm0, %v110_v22  ;;  %1056 = vmatmul.bf16.gmra.mxu2 %v5280_v30  ;;  %4081 = vtanh.f32 %v504_v33 }
  0xdd   :  { %1225 = vmatmul.bf16.gmra.mxu3 %v5283_v31 }
  0xe0   :  { %v336_v34 = vpop.f32.mrf.mxu0 }
  0xe1   :  { %v337_v35 = vadd.f32 %v336_v34, %v5186_v9  ;;  %v505_v36 = vpop.f32.mrf.mxu1  ;;  %v4080_v40 = vpop.eup %4079 }
  0xe2   :  { %v506_v37 = vadd.f32 %v505_v36, %v5188_v11  ;;  %v4082_v42 = vpop.eup %4081  ;;  %v3801_v36 = vld [vmem:[%s6950_s5 + $0x50] sm:$0xf] }
  0xe3   :  { %4083 = vtanh.f32 %v337_v35 }
  0xe4   :  { %4085 = vtanh.f32 %v506_v37  ;;  %v4006_v37 = vld [vmem:[%s6950_s5 + $0x54] sm:$0xf0] }
  0xe8   :  { %v339_v43 = vpop.f32.mrf.mxu0 }
  0xe9   :  { %v4084_v46 = vpop.eup %4083  ;;  %v508_v47 = vpop.f32.mrf.mxu1  ;;  %v340_v51 = vadd.f32 %v339_v43, %v5186_v9 }
  0xea   :  { %v4086_v48 = vpop.eup %4085  ;;  %v5298_v49 = vpack.c.bf16 %v4084_v46, %v4080_v40  ;;  %v509_v52 = vadd.f32 %v508_v47, %v5188_v11  ;;  %v3802_v40 = vor.u32 %v4006_v37, %v3801_v36 }
  0xeb   :  { %3580 = vmatmul.msk.bf16.gmra.mxu0 %vm208_vm0, %v111_v41  ;;  %v5301_v50 = vpack.c.bf16 %v4086_v48, %v4082_v42  ;;  %4087 = vtanh.f32 %v340_v51  ;;  %v66_v51 = vld [vmem:[%s6945_s0 + $0x100] sm:$0xff] }
  0xec   :  { %3612 = vmatmul.msk.bf16.gmra.mxu1 %vm208_vm0, %v111_v41  ;;  %1061 = vmatmul.bf16.gmra.mxu2 %v5298_v49  ;;  %4089 = vtanh.f32 %v509_v52  ;;  %v4022_v41 = vld [vmem:[%s6950_s5 + $0xd4] sm:$0xf0]  ;;  %v67_v52 = vld [vmem:[%s6945_s0 + $0x108] sm:$0xff] }
  0xed   :  { %1230 = vmatmul.bf16.gmra.mxu3 %v5301_v50  ;;  %v3866_v42 = vor.u32 %v4022_v41, %v3865_v38  ;;  %2101 = vmatpush.bf16.msrb.mxu2 %v3802_v40  ;;  %v71_v40 = vld [vmem:[%s6945_s0 + $0x128] sm:$0xff] }
  0xef   :  { %2270 = vmatpush.bf16.msrb.mxu3 %v3866_v42 }
  0xf0   :  { %v341_v53 = vpop.f32.mrf.mxu0 }
  0xf1   :  { %v342_v54 = vadd.f32 %v341_v53, %v5186_v9  ;;  %v510_v55 = vpop.f32.mrf.mxu1  ;;  %v4088_v59 = vpop.eup %4087 }
  0xf2   :  { %v511_v56 = vadd.f32 %v510_v55, %v5188_v11  ;;  %v4090_v61 = vpop.eup %4089 }
  0xf3   :  { %4091 = vtanh.f32 %v342_v54  ;;  %v114_v54 = vpack.c.bf16 %v67_v52, %v66_v51 }
  0xf4   :  { %4093 = vtanh.f32 %v511_v56 }
  0xf8   :  { %v344_v62 = vpop.f32.mrf.mxu0 }
  0xf9   :  { %v4092_v63 = vpop.eup %4091  ;;  %v513_v0 = vpop.f32.mrf.mxu1  ;;  %v345_v8 = vadd.f32 %v344_v62, %v5186_v9 }
  0xfa   :  { %v4094_v1 = vpop.eup %4093  ;;  %v5316_v2 = vpack.c.bf16 %v4092_v63, %v4088_v59  ;;  %v514_v14 = vadd.f32 %v513_v0, %v5188_v11 }
  0xfb   :  { %3581 = vmatmul.msk.bf16.gmra.mxu0 %vm208_vm0, %v112_v60  ;;  %v5319_v5 = vpack.c.bf16 %v4094_v1, %v4090_v61  ;;  %4095 = vtanh.f32 %v345_v8  ;;  %v68_v8 = vld [vmem:[%s6945_s0 + $0x110] sm:$0xff] }
  0xfc   :  { %3613 = vmatmul.msk.bf16.gmra.mxu1 %vm208_vm0, %v112_v60  ;;  %1066 = vmatmul.bf16.gmra.mxu2 %v5316_v2  ;;  %4097 = vtanh.f32 %v514_v14  ;;  %v115_v13 = vpack.c.bf16 %v69_v10, %v68_v8 }
  0xfd   :  { %1235 = vmatmul.bf16.gmra.mxu3 %v5319_v5 }
 0x100   :  { %v346_v16 = vpop.f32.mrf.mxu0 }
 0x101   :  { %v347_v17 = vadd.f32 %v346_v16, %v5186_v9  ;;  %v515_v18 = vpop.f32.mrf.mxu1  ;;  %v4096_v22 = vpop.eup %4095 }
 0x102   :  { %v516_v19 = vadd.f32 %v515_v18, %v5188_v11  ;;  %v4098_v24 = vpop.eup %4097  ;;  %v867_v18 = vld [vmem:[%s6949_s4] sm:$0x3] }
 0x103   :  { %4099 = vtanh.f32 %v347_v17 }
 0x104   :  { %4101 = vtanh.f32 %v516_v19 }
 0x108   :  { %v349_v25 = vpop.f32.mrf.mxu0 }
 0x109   :  { %v4100_v26 = vpop.eup %4099  ;;  %v518_v29 = vpop.f32.mrf.mxu1  ;;  %v350_v35 = vadd.f32 %v349_v25, %v5186_v9 }
 0x10a   :  { %v4102_v32 = vpop.eup %4101  ;;  %v5346_v33 = vpack.c.bf16 %v4100_v26, %v4096_v22  ;;  %v519_v39 = vadd.f32 %v518_v29, %v5188_v11  ;;  %v5404_v22 = vperm.slane %v867_v18, 0 }
 0x10b   :  { %3582 = vmatmul.msk.bf16.gmra.mxu0 %vm208_vm0, %v113_v23  ;;  %v5349_v34 = vpack.c.bf16 %v4102_v32, %v4098_v24  ;;  %4103 = vtanh.f32 %v350_v35 }
 0x10c   :  { %3614 = vmatmul.msk.bf16.gmra.mxu1 %vm208_vm0, %v113_v23  ;;  %1071 = vmatmul.bf16.gmra.mxu2 %v5346_v33  ;;  %4105 = vtanh.f32 %v519_v39  ;;  %v70_v39 = vld [vmem:[%s6945_s0 + $0x120] sm:$0xff] }
 0x10d   :  { %1240 = vmatmul.bf16.gmra.mxu3 %v5349_v34  ;;  %v116_v42 = vpack.c.bf16 %v71_v40, %v70_v39 }
 0x110   :  { %v351_v43 = vpop.f32.mrf.mxu0 }
 0x111   :  { %v352_v46 = vadd.f32 %v351_v43, %v5186_v9  ;;  %v520_v47 = vpop.f32.mrf.mxu1  ;;  %v4104_v53 = vpop.eup %4103 }
 0x112   :  { %v521_v48 = vadd.f32 %v520_v47, %v5188_v11  ;;  %v4106_v55 = vpop.eup %4105 }
 0x113   :  { %4107 = vtanh.f32 %v352_v46 }
 0x114   :  { %4109 = vtanh.f32 %v521_v48 }
 0x118   :  { %v354_v56 = vpop.f32.mrf.mxu0 }
 0x119   :  { %v4108_v57 = vpop.eup %4107  ;;  %v523_v58 = vpop.f32.mrf.mxu1  ;;  %v355_v62 = vadd.f32 %v354_v56, %v5186_v9 }
 0x11a   :  { %v4110_v59 = vpop.eup %4109  ;;  %v5376_v60 = vpack.c.bf16 %v4108_v57, %v4104_v53  ;;  %v524_v63 = vadd.f32 %v523_v58, %v5188_v11  ;;  %v3967_v58 = vld [vmem:[%s6948_s3 + $0x24] sm:$0xf] }
 0x11b   :  { %3583 = vmatmul.msk.bf16.gmra.mxu0 %vm208_vm0, %v114_v54  ;;  %v5379_v61 = vpack.c.bf16 %v4110_v59, %v4106_v55  ;;  %4111 = vtanh.f32 %v355_v62  ;;  %v3651_v59 = vld [vmem:[%s6948_s3 + $0x28] sm:$0xf0] }
 0x11c   :  { %3615 = vmatmul.msk.bf16.gmra.mxu1 %vm208_vm0, %v114_v54  ;;  %1076 = vmatmul.bf16.gmra.mxu2 %v5376_v60  ;;  %4113 = vtanh.f32 %v524_v63  ;;  %v3654_v63 = vor.u32 %v3967_v58, %v3651_v59 }
 0x11d   :  { %1245 = vmatmul.bf16.gmra.mxu3 %v5379_v61 }
 0x11e   :  { %1376 = vmatpush.bf16.msrb.mxu0 %v3654_v63 }
 0x120   :  { %v356_v0 = vpop.f32.mrf.mxu0 }
 0x121   :  { %v357_v1 = vadd.f32 %v356_v0, %v5186_v9  ;;  %v525_v6 = vpop.f32.mrf.mxu1  ;;  %v4112_v12 = vpop.eup %4111  ;;  %v3983_v0 = vld [vmem:[%s6948_s3 + $0xa4] sm:$0xf] }
 0x122   :  { %v526_v7 = vadd.f32 %v525_v6, %v5188_v11  ;;  %v4114_v14 = vpop.eup %4113 }
 0x123   :  { %4115 = vtanh.f32 %v357_v1  ;;  %v3715_v1 = vld [vmem:[%s6948_s3 + $0xa8] sm:$0xf0] }
 0x124   :  { %4117 = vtanh.f32 %v526_v7  ;;  %v3718_v7 = vor.u32 %v3983_v0, %v3715_v1 }
 0x126   :  { %1545 = vmatpush.bf16.msrb.mxu1 %v3718_v7 }
 0x128   :  { %v359_v15 = vpop.f32.mrf.mxu0 }
 0x129   :  { %v4116_v16 = vpop.eup %4115  ;;  %v528_v17 = vpop.f32.mrf.mxu1  ;;  %v360_v23 = vadd.f32 %v359_v15, %v5186_v9 }
 0x12a   :  { %v4118_v19 = vpop.eup %4117  ;;  %v5397_v20 = vpack.c.bf16 %v4116_v16, %v4112_v12  ;;  %v529_v25 = vadd.f32 %v528_v17, %v5188_v11 }
 0x12b   :  { %3584 = vmatmul.msk.bf16.gmra.mxu0 %vm208_vm0, %v115_v13  ;;  %v5400_v21 = vpack.c.bf16 %v4118_v19, %v4114_v14  ;;  %4119 = vtanh.f32 %v360_v23 }
 0x12c   :  { %3616 = vmatmul.msk.bf16.gmra.mxu1 %vm208_vm0, %v115_v13  ;;  %1081 = vmatmul.bf16.gmra.mxu2 %v5397_v20 }
 0x12d   :  { %1250 = vmatmul.bf16.gmra.mxu3 %v5400_v21 }
 0x12f   :  { %v1042_v24 = vpop.f32.mrf.mxu2 }
 0x130   :  { %v1043_v26 = vadd.f32 %v1042_v24, %v5404_v22  ;;  %v1211_v29 = vpop.f32.mrf.mxu3  ;;  %v361_v32 = vpop.f32.mrf.mxu0  ;;  %v72_v24 = vld [vmem:[%s6945_s0 + $0x130] sm:$0xff] }
 0x131   :  { %v362_v35 = vadd.f32 %v361_v32, %v5186_v9  ;;  %v530_v36 = vpop.f32.mrf.mxu1  ;;  %v4120_v43 = vpop.eup %4119 }
 0x132   :  { %v1212_v37 = vadd.f32 %v1211_v29, %v1043_v26  ;;  %v531_v38 = vadd.f32 %v530_v36, %v5188_v11 }
 0x133   :  { %4121 = vtanh.f32 %v362_v35 }
 0x134   :  { %4123 = vtanh.f32 %v529_v25  ;;  %v73_v25 = vld [vmem:[%s6945_s0 + $0x138] sm:$0xff] }
 0x135   :  { %4125 = vtanh.f32 %v531_v38  ;;  %v117_v29 = vpack.c.bf16 %v73_v25, %v72_v24 }
 0x136   :  { %4127 = vtanh.f32 %v1212_v37 }
 0x137   :  { %v1044_v41 = vpop.f32.mrf.mxu2 }
 0x138   :  { %v1045_v46 = vadd.f32 %v1044_v41, %v5404_v22  ;;  %v1213_v47 = vpop.f32.mrf.mxu3  ;;  %v364_v48 = vpop.f32.mrf.mxu0 }
 0x139   :  { %v4122_v51 = vpop.eup %4121  ;;  %v533_v52 = vpop.f32.mrf.mxu1  ;;  %v365_v62 = vadd.f32 %v364_v48, %v5186_v9  ;;  %v3793_v48 = vld [vmem:[%s6950_s5 + $0x40] sm:$0xf] }
 0x13a   :  { %v4124_v53 = vpop.eup %4123  ;;  %v1214_v54 = vadd.f32 %v1213_v47, %v1045_v46  ;;  %v5419_v55 = vpack.c.bf16 %v4122_v51, %v4120_v43  ;;  %v534_v8 = vadd.f32 %v533_v52, %v5188_v11  ;;  %v4004_v51 = vld [vmem:[%s6950_s5 + $0x44] sm:$0xf0]  ;;  %v3857_v52 = vld [vmem:[%s6950_s5 + $0xc0] sm:$0xf] }
 0x13b   :  { %v4126_v56 = vpop.eup %4125  ;;  %3585 = vmatmul.msk.bf16.gmra.mxu0 %vm208_vm0, %v116_v42 }
 0x13c   :  { %4129 = vtanh.f32 %v1214_v54  ;;  %3617 = vmatmul.msk.bf16.gmra.mxu1 %vm208_vm0, %v116_v42  ;;  %1086 = vmatmul.bf16.gmra.mxu2 %v5419_v55  ;;  %v5424_v57 = vpack.c.bf16 %v4126_v56, %v4124_v53  ;;  %v4128_v14 = vpop.eup %4127  ;;  %v3794_v54 = vor.u32 %v4004_v51, %v3793_v48  ;;  %v4020_v56 = vld [vmem:[%s6950_s5 + $0xc4] sm:$0xf0] }
 0x13d   :  { %4131 = vtanh.f32 %v365_v62  ;;  %v3858_v0 = vor.u32 %v4020_v56, %v3857_v52 }
 0x13e   :  { %1255 = vmatmul.bf16.gmra.mxu3 %v5424_v57  ;;  %2102 = vmatpush.bf16.msrb.mxu2 %v3794_v54 }
 0x13f   :  { %v1047_v6 = vpop.f32.mrf.mxu2  ;;  %2271 = vmatpush.bf16.msrb.mxu3 %v3858_v0 }
 0x140   :  { %v1048_v10 = vadd.f32 %v1047_v6, %v5404_v22  ;;  %v1216_v12 = vpop.f32.mrf.mxu3  ;;  %v366_v13 = vpop.f32.mrf.mxu0 }
 0x141   :  { %v367_v15 = vadd.f32 %v366_v13, %v5186_v9  ;;  %v535_v16 = vpop.f32.mrf.mxu1 }
 0x142   :  { %v4130_v17 = vpop.eup %4129  ;;  %v1217_v18 = vadd.f32 %v1216_v12, %v1048_v10  ;;  %v536_v19 = vadd.f32 %v535_v16, %v5188_v11 }
 0x143   :  { %4133 = vtanh.f32 %v367_v15  ;;  %v5444_v23 = vpack.c.bf16 %v4130_v17, %v4128_v14  ;;  %v4132_v32 = vpop.eup %4131  ;;  %v74_v14 = vld [vmem:[%s6945_s0 + $0x140] sm:$0xff]  ;;  %v75_v15 = vld [vmem:[%s6945_s0 + $0x148] sm:$0xff] }
 0x144   :  { %4135 = vtanh.f32 %v534_v8  ;;  %v118_v17 = vpack.c.bf16 %v75_v15, %v74_v14 }
 0x145   :  { %4137 = vtanh.f32 %v536_v19 }
 0x146   :  { %4139 = vtanh.f32 %v1217_v18 }
 0x147   :  { %v1049_v26 = vpop.f32.mrf.mxu2 }
 0x148   :  { %v1050_v35 = vadd.f32 %v1049_v26, %v5404_v22  ;;  %v1218_v36 = vpop.f32.mrf.mxu3  ;;  %v369_v37 = vpop.f32.mrf.mxu0 }
 0x149   :  { %v4134_v38 = vpop.eup %4133  ;;  %v538_v39 = vpop.f32.mrf.mxu1  ;;  %v370_v47 = vadd.f32 %v369_v37, %v5186_v9 }
 0x14a   :  { %v4136_v40 = vpop.eup %4135  ;;  %v1219_v41 = vadd.f32 %v1218_v36, %v1050_v35  ;;  %v5453_v42 = vpack.c.bf16 %v4134_v38, %v4132_v32  ;;  %v539_v58 = vadd.f32 %v538_v39, %v5188_v11 }
 0x14b   :  { %v4138_v43 = vpop.eup %4137  ;;  %3586 = vmatmul.msk.bf16.gmra.mxu0 %vm208_vm0, %v117_v29 }
 0x14c   :  { %4141 = vtanh.f32 %v1219_v41  ;;  %3618 = vmatmul.msk.bf16.gmra.mxu1 %vm208_vm0, %v117_v29  ;;  %1091 = vmatmul.bf16.gmra.mxu2 %v5453_v42  ;;  %v5458_v46 = vpack.c.bf16 %v4138_v43, %v4136_v40  ;;  %v4140_v1 = vpop.eup %4139 }
 0x14d   :  { %4143 = vtanh.f32 %v370_v47 }
 0x14e   :  { %1260 = vmatmul.bf16.gmra.mxu3 %v5458_v46 }
 0x14f   :  { %v1052_v53 = vpop.f32.mrf.mxu2 }
 0x150   :  { %v1053_v59 = vadd.f32 %v1052_v53, %v5404_v22  ;;  %v1221_v62 = vpop.f32.mrf.mxu3  ;;  %v371_v63 = vpop.f32.mrf.mxu0 }
 0x151   :  { %v372_v6 = vadd.f32 %v371_v63, %v5186_v9  ;;  %v540_v7 = vpop.f32.mrf.mxu1  ;;  %v77_v63 = vld [vmem:[%s6945_s0 + $0x158] sm:$0xff] }
 0x152   :  { %v4142_v8 = vpop.eup %4141  ;;  %v1222_v10 = vadd.f32 %v1221_v62, %v1053_v59  ;;  %v541_v12 = vadd.f32 %v540_v7, %v5188_v11  ;;  %v76_v62 = vld [vmem:[%s6945_s0 + $0x150] sm:$0xff] }
 0x153   :  { %4145 = vtanh.f32 %v372_v6  ;;  %v5478_v13 = vpack.c.bf16 %v4142_v8, %v4140_v1  ;;  %v4144_v18 = vpop.eup %4143  ;;  %v119_v1 = vpack.c.bf16 %v77_v63, %v76_v62 }
 0x154   :  { %4147 = vtanh.f32 %v539_v58 }
 0x155   :  { %4149 = vtanh.f32 %v541_v12 }
 0x156   :  { %4151 = vtanh.f32 %v1222_v10 }
 0x157   :  { %v1054_v16 = vpop.f32.mrf.mxu2 }
 0x158   :  { %v1055_v19 = vadd.f32 %v1054_v16, %v5404_v22  ;;  %v1223_v24 = vpop.f32.mrf.mxu3  ;;  %v374_v25 = vpop.f32.mrf.mxu0 }
 0x159   :  { %v4146_v26 = vpop.eup %4145  ;;  %v543_v29 = vpop.f32.mrf.mxu1  ;;  %v375_v39 = vadd.f32 %v374_v25, %v5186_v9 }
 0x15a   :  { %v4148_v32 = vpop.eup %4147  ;;  %v1224_v35 = vadd.f32 %v1223_v24, %v1055_v19  ;;  %v5487_v36 = vpack.c.bf16 %v4146_v26, %v4144_v18  ;;  %v544_v41 = vadd.f32 %v543_v29, %v5188_v11 }
 0x15b   :  { %v4150_v37 = vpop.eup %4149  ;;  %3587 = vmatmul.msk.bf16.gmra.mxu0 %vm208_vm0, %v118_v17 }
 0x15c   :  { %4153 = vtanh.f32 %v1224_v35  ;;  %3619 = vmatmul.msk.bf16.gmra.mxu1 %vm208_vm0, %v118_v17  ;;  %1096 = vmatmul.bf16.gmra.mxu2 %v5487_v36  ;;  %v5492_v38 = vpack.c.bf16 %v4150_v37, %v4148_v32  ;;  %v4152_v51 = vpop.eup %4151 }
 0x15d   :  { %4155 = vtanh.f32 %v375_v39 }
 0x15e   :  { %1265 = vmatmul.bf16.gmra.mxu3 %v5492_v38 }
 0x15f   :  { %v1057_v40 = vpop.f32.mrf.mxu2 }
 0x160   :  { %v1058_v43 = vadd.f32 %v1057_v40, %v5404_v22  ;;  %v1226_v47 = vpop.f32.mrf.mxu3  ;;  %v376_v48 = vpop.f32.mrf.mxu0 }
 0x161   :  { %v377_v52 = vadd.f32 %v376_v48, %v5186_v9  ;;  %v545_v53 = vpop.f32.mrf.mxu1 }
 0x162   :  { %v4154_v54 = vpop.eup %4153  ;;  %v1227_v56 = vadd.f32 %v1226_v47, %v1058_v43  ;;  %v546_v58 = vadd.f32 %v545_v53, %v5188_v11 }
 0x163   :  { %4157 = vtanh.f32 %v377_v52  ;;  %v5500_v59 = vpack.c.bf16 %v4154_v54, %v4152_v51  ;;  %v4156_v6 = vpop.eup %4155  ;;  %v78_v51 = vld [vmem:[%s6945_s0 + $0x160] sm:$0xff]  ;;  %v79_v52 = vld [vmem:[%s6945_s0 + $0x168] sm:$0xff] }
 0x164   :  { %4159 = vtanh.f32 %v544_v41  ;;  %v120_v54 = vpack.c.bf16 %v79_v52, %v78_v51 }
 0x165   :  { %4161 = vtanh.f32 %v546_v58 }
 0x166   :  { %4163 = vtanh.f32 %v1227_v56 }
 0x167   :  { %v1059_v0 = vpop.f32.mrf.mxu2 }
 0x168   :  { %v1060_v7 = vadd.f32 %v1059_v0, %v5404_v22  ;;  %v1228_v8 = vpop.f32.mrf.mxu3  ;;  %v379_v10 = vpop.f32.mrf.mxu0 }
 0x169   :  { %v4158_v12 = vpop.eup %4157  ;;  %v548_v14 = vpop.f32.mrf.mxu1  ;;  %v380_v24 = vadd.f32 %v379_v10, %v5186_v9 }
 0x16a   :  { %v4160_v15 = vpop.eup %4159  ;;  %v1229_v16 = vadd.f32 %v1228_v8, %v1060_v7  ;;  %v5509_v17 = vpack.c.bf16 %v4158_v12, %v4156_v6  ;;  %v549_v26 = vadd.f32 %v548_v14, %v5188_v11  ;;  %v3965_v14 = vld [vmem:[%s6948_s3 + $0x14] sm:$0xf] }
 0x16b   :  { %v4162_v18 = vpop.eup %4161  ;;  %3588 = vmatmul.msk.bf16.gmra.mxu0 %vm208_vm0, %v119_v1 }
 0x16c   :  { %4165 = vtanh.f32 %v1229_v16  ;;  %3620 = vmatmul.msk.bf16.gmra.mxu1 %vm208_vm0, %v119_v1  ;;  %1101 = vmatmul.bf16.gmra.mxu2 %v5509_v17  ;;  %v5514_v19 = vpack.c.bf16 %v4162_v18, %v4160_v15  ;;  %v4164_v37 = vpop.eup %4163  ;;  %v3643_v15 = vld [vmem:[%s6948_s3 + $0x18] sm:$0xf0] }
 0x16d   :  { %4167 = vtanh.f32 %v380_v24  ;;  %v3646_v18 = vor.u32 %v3965_v14, %v3643_v15  ;;  %v3981_v24 = vld [vmem:[%s6948_s3 + $0x94] sm:$0xf] }
 0x16e   :  { %1270 = vmatmul.bf16.gmra.mxu3 %v5514_v19 }
 0x16f   :  { %v1062_v25 = vpop.f32.mrf.mxu2  ;;  %1377 = vmatpush.bf16.msrb.mxu0 %v3646_v18 }
 0x170   :  { %v1063_v29 = vadd.f32 %v1062_v25, %v5404_v22  ;;  %v1231_v32 = vpop.f32.mrf.mxu3  ;;  %v381_v35 = vpop.f32.mrf.mxu0  ;;  %v3707_v25 = vld [vmem:[%s6948_s3 + $0x98] sm:$0xf0] }
 0x171   :  { %v382_v39 = vadd.f32 %v381_v35, %v5186_v9  ;;  %v550_v40 = vpop.f32.mrf.mxu1 }
 0x172   :  { %v4166_v41 = vpop.eup %4165  ;;  %v1232_v43 = vadd.f32 %v1231_v32, %v1063_v29  ;;  %v551_v47 = vadd.f32 %v550_v40, %v5188_v11  ;;  %v3710_v29 = vor.u32 %v3981_v24, %v3707_v25 }
 0x173   :  { %4169 = vtanh.f32 %v382_v39  ;;  %v5522_v48 = vpack.c.bf16 %v4166_v41, %v4164_v37  ;;  %v4168_v56 = vpop.eup %4167 }
 0x174   :  { %4171 = vtanh.f32 %v549_v26  ;;  %1546 = vmatpush.bf16.msrb.mxu1 %v3710_v29  ;;  %v4002_v29 = vld [vmem:[%s6950_s5 + $0x34] sm:$0xf0] }
 0x175   :  { %4173 = vtanh.f32 %v551_v47 }
 0x176   :  { %4175 = vtanh.f32 %v1232_v43 }
 0x177   :  { %v1064_v53 = vpop.f32.mrf.mxu2 }
 0x178   :  { %v1065_v58 = vadd.f32 %v1064_v53, %v5404_v22  ;;  %v1233_v62 = vpop.f32.mrf.mxu3  ;;  %v384_v63 = vpop.f32.mrf.mxu0 }
 0x179   :  { %v4170_v0 = vpop.eup %4169  ;;  %v553_v1 = vpop.f32.mrf.mxu1  ;;  %v385_v16 = vadd.f32 %v384_v63, %v5186_v9 }
 0x17a   :  { %v4172_v6 = vpop.eup %4171  ;;  %v1234_v7 = vadd.f32 %v1233_v62, %v1065_v58  ;;  %v5531_v8 = vpack.c.bf16 %v4170_v0, %v4168_v56  ;;  %v554_v32 = vadd.f32 %v553_v1, %v5188_v11  ;;  %v81_v56 = vld [vmem:[%s6945_s0 + $0x178] sm:$0xff] }
 0x17b   :  { %v4174_v10 = vpop.eup %4173  ;;  %3589 = vmatmul.msk.bf16.gmra.mxu0 %vm208_vm0, %v120_v54 }
 0x17c   :  { %4177 = vtanh.f32 %v1234_v7  ;;  %3621 = vmatmul.msk.bf16.gmra.mxu1 %vm208_vm0, %v120_v54  ;;  %1106 = vmatmul.bf16.gmra.mxu2 %v5531_v8  ;;  %v5536_v12 = vpack.c.bf16 %v4174_v10, %v4172_v6  ;;  %v4176_v40 = vpop.eup %4175  ;;  %v80_v54 = vld [vmem:[%s6945_s0 + $0x170] sm:$0xff] }
 0x17d   :  { %4179 = vtanh.f32 %v385_v16  ;;  %v121_v62 = vpack.c.bf16 %v81_v56, %v80_v54 }
 0x17e   :  { %1275 = vmatmul.bf16.gmra.mxu3 %v5536_v12 }
 0x17f   :  { %v1067_v26 = vpop.f32.mrf.mxu2 }
 0x180   :  { %v1068_v35 = vadd.f32 %v1067_v26, %v5404_v22  ;;  %v1236_v37 = vpop.f32.mrf.mxu3  ;;  %v386_v39 = vpop.f32.mrf.mxu0  ;;  %v3785_v26 = vld [vmem:[%s6950_s5 + $0x30] sm:$0xf] }
 0x181   :  { %v387_v41 = vadd.f32 %v386_v39, %v5186_v9  ;;  %v555_v43 = vpop.f32.mrf.mxu1  ;;  %v4018_v39 = vld [vmem:[%s6950_s5 + $0xb4] sm:$0xf0] }
 0x182   :  { %v4178_v47 = vpop.eup %4177  ;;  %v1237_v51 = vadd.f32 %v1236_v37, %v1068_v35  ;;  %v556_v52 = vadd.f32 %v555_v43, %v5188_v11  ;;  %v3786_v37 = vor.u32 %v4002_v29, %v3785_v26 }
 0x183   :  { %4181 = vtanh.f32 %v387_v41  ;;  %v5556_v53 = vpack.c.bf16 %v4178_v47, %v4176_v40  ;;  %v4180_v63 = vpop.eup %4179 }
 0x184   :  { %4183 = vtanh.f32 %v554_v32  ;;  %v3849_v32 = vld [vmem:[%s6950_s5 + $0xb0] sm:$0xf]  ;;  %2103 = vmatpush.bf16.msrb.mxu2 %v3786_v37 }
 0x185   :  { %4185 = vtanh.f32 %v556_v52 }
 0x186   :  { %4187 = vtanh.f32 %v1237_v51  ;;  %v3850_v51 = vor.u32 %v4018_v39, %v3849_v32 }
 0x187   :  { %v1069_v58 = vpop.f32.mrf.mxu2 }
 0x188   :  { %v1070_v0 = vadd.f32 %v1069_v58, %v5404_v22  ;;  %v1238_v1 = vpop.f32.mrf.mxu3  ;;  %v389_v6 = vpop.f32.mrf.mxu0  ;;  %2272 = vmatpush.bf16.msrb.mxu3 %v3850_v51 }
 0x189   :  { %v4182_v7 = vpop.eup %4181  ;;  %v558_v10 = vpop.f32.mrf.mxu1  ;;  %v390_v25 = vadd.f32 %v389_v6, %v5186_v9  ;;  %v83_v6 = vld [vmem:[%s6945_s0 + $0x188] sm:$0xff] }
 0x18a   :  { %v4184_v14 = vpop.eup %4183  ;;  %v1239_v15 = vadd.f32 %v1238_v1, %v1070_v0  ;;  %v5565_v16 = vpack.c.bf16 %v4182_v7, %v4180_v63  ;;  %v559_v40 = vadd.f32 %v558_v10, %v5188_v11  ;;  %v82_v1 = vld [vmem:[%s6945_s0 + $0x180] sm:$0xff] }
 0x18b   :  { %v4186_v18 = vpop.eup %4185  ;;  %3590 = vmatmul.msk.bf16.gmra.mxu0 %vm208_vm0, %v121_v62  ;;  %v122_v10 = vpack.c.bf16 %v83_v6, %v82_v1 }
 0x18c   :  { %4189 = vtanh.f32 %v1239_v15  ;;  %3622 = vmatmul.msk.bf16.gmra.mxu1 %vm208_vm0, %v121_v62  ;;  %1111 = vmatmul.bf16.gmra.mxu2 %v5565_v16  ;;  %v5570_v24 = vpack.c.bf16 %v4186_v18, %v4184_v14  ;;  %v4188_v52 = vpop.eup %4187 }
 0x18d   :  { %4191 = vtanh.f32 %v390_v25 }
 0x18e   :  { %1280 = vmatmul.bf16.gmra.mxu3 %v5570_v24 }
 0x18f   :  { %v1072_v35 = vpop.f32.mrf.mxu2 }
 0x190   :  { %v1073_v41 = vadd.f32 %v1072_v35, %v5404_v22  ;;  %v1241_v43 = vpop.f32.mrf.mxu3  ;;  %v391_v47 = vpop.f32.mrf.mxu0 }
 0x191   :  { %v392_v54 = vadd.f32 %v391_v47, %v5186_v9  ;;  %v560_v56 = vpop.f32.mrf.mxu1 }
 0x192   :  { %v4190_v58 = vpop.eup %4189  ;;  %v1242_v62 = vadd.f32 %v1241_v43, %v1073_v41  ;;  %v561_v63 = vadd.f32 %v560_v56, %v5188_v11 }
 0x193   :  { %4193 = vtanh.f32 %v392_v54  ;;  %v5590_v0 = vpack.c.bf16 %v4190_v58, %v4188_v52  ;;  %v4192_v14 = vpop.eup %4191 }
 0x194   :  { %4195 = vtanh.f32 %v559_v40 }
 0x195   :  { %4197 = vtanh.f32 %v561_v63 }
 0x196   :  { %4199 = vtanh.f32 %v1242_v62 }
 0x197   :  { %v1074_v7 = vpop.f32.mrf.mxu2 }
 0x198   :  { %v1075_v15 = vadd.f32 %v1074_v7, %v5404_v22  ;;  %v1243_v18 = vpop.f32.mrf.mxu3  ;;  %v394_v25 = vpop.f32.mrf.mxu0 }
 0x199   :  { %v4194_v26 = vpop.eup %4193  ;;  %v563_v29 = vpop.f32.mrf.mxu1  ;;  %v395_v41 = vadd.f32 %v394_v25, %v5186_v9 }
 0x19a   :  { %v4196_v32 = vpop.eup %4195  ;;  %v1244_v35 = vadd.f32 %v1243_v18, %v1075_v15  ;;  %v5599_v37 = vpack.c.bf16 %v4194_v26, %v4192_v14  ;;  %v564_v47 = vadd.f32 %v563_v29, %v5188_v11  ;;  %v85_v14 = vld [vmem:[%s6945_s0 + $0x198] sm:$0xff] }
 0x19b   :  { %v4198_v39 = vpop.eup %4197  ;;  %3591 = vmatmul.msk.bf16.gmra.mxu0 %vm208_vm0, %v122_v10 }
 0x19c   :  { %4201 = vtanh.f32 %v1244_v35  ;;  %3623 = vmatmul.msk.bf16.gmra.mxu1 %vm208_vm0, %v122_v10  ;;  %1116 = vmatmul.bf16.gmra.mxu2 %v5599_v37  ;;  %v5604_v40 = vpack.c.bf16 %v4198_v39, %v4196_v32  ;;  %v4200_v56 = vpop.eup %4199  ;;  %v84_v10 = vld [vmem:[%s6945_s0 + $0x190] sm:$0xff] }
 0x19d   :  { %4203 = vtanh.f32 %v395_v41  ;;  %v123_v18 = vpack.c.bf16 %v85_v14, %v84_v10 }
 0x19e   :  { %1285 = vmatmul.bf16.gmra.mxu3 %v5604_v40 }
 0x19f   :  { %v1077_v43 = vpop.f32.mrf.mxu2 }
 0x1a0   :  { %v1078_v51 = vadd.f32 %v1077_v43, %v5404_v22  ;;  %v1246_v52 = vpop.f32.mrf.mxu3  ;;  %v396_v54 = vpop.f32.mrf.mxu0 }
 0x1a1   :  { %v397_v58 = vadd.f32 %v396_v54, %v5186_v9  ;;  %v565_v62 = vpop.f32.mrf.mxu1 }
 0x1a2   :  { %v4202_v63 = vpop.eup %4201  ;;  %v1247_v1 = vadd.f32 %v1246_v52, %v1078_v51  ;;  %v566_v6 = vadd.f32 %v565_v62, %v5188_v11 }
 0x1a3   :  { %4205 = vtanh.f32 %v397_v58  ;;  %v5612_v7 = vpack.c.bf16 %v4202_v63, %v4200_v56  ;;  %v4204_v25 = vpop.eup %4203 }
 0x1a4   :  { %4207 = vtanh.f32 %v564_v47 }
 0x1a5   :  { %4209 = vtanh.f32 %v566_v6 }
 0x1a6   :  { %4211 = vtanh.f32 %v1247_v1 }
 0x1a7   :  { %v1079_v15 = vpop.f32.mrf.mxu2 }
 0x1a8   :  { %v1080_v26 = vadd.f32 %v1079_v15, %v5404_v22  ;;  %v1248_v29 = vpop.f32.mrf.mxu3  ;;  %v399_v32 = vpop.f32.mrf.mxu0 }
 0x1a9   :  { %v4206_v35 = vpop.eup %4205  ;;  %v568_v39 = vpop.f32.mrf.mxu1  ;;  %v400_v54 = vadd.f32 %v399_v32, %v5186_v9  ;;  %v87_v32 = vld [vmem:[%s6945_s0 + $0x1a8] sm:$0xff] }
 0x1aa   :  { %v4208_v41 = vpop.eup %4207  ;;  %v1249_v43 = vadd.f32 %v1248_v29, %v1080_v26  ;;  %v5621_v47 = vpack.c.bf16 %v4206_v35, %v4204_v25  ;;  %v569_v58 = vadd.f32 %v568_v39, %v5188_v11  ;;  %v86_v29 = vld [vmem:[%s6945_s0 + $0x1a0] sm:$0xff] }
 0x1ab   :  { %v4210_v51 = vpop.eup %4209  ;;  %3592 = vmatmul.msk.bf16.gmra.mxu0 %vm208_vm0, %v123_v18  ;;  %v124_v39 = vpack.c.bf16 %v87_v32, %v86_v29  ;;  %v3979_v29 = vld [vmem:[%s6948_s3 + $0x84] sm:$0xf]  ;;  %v3699_v32 = vld [vmem:[%s6948_s3 + $0x88] sm:$0xf0] }
 0x1ac   :  { %4213 = vtanh.f32 %v1249_v43  ;;  %3624 = vmatmul.msk.bf16.gmra.mxu1 %vm208_vm0, %v123_v18  ;;  %1121 = vmatmul.bf16.gmra.mxu2 %v5621_v47  ;;  %v5626_v52 = vpack.c.bf16 %v4210_v51, %v4208_v41  ;;  %v4212_v6 = vpop.eup %4211 }
 0x1ad   :  { %4215 = vtanh.f32 %v400_v54 }
 0x1ae   :  { %7033 = vst [vmem:[#allocation5_spill] sm:$0xff] %v5626_v52  ;;  %1290 = vmatmul.bf16.gmra.mxu3 %v5626_v52 }
 0x1af   :  { %v1082_v56 = vpop.f32.mrf.mxu2 }
 0x1b0   :  { %v1083_v62 = vadd.f32 %v1082_v56, %v5404_v22  ;;  %v1251_v63 = vpop.f32.mrf.mxu3  ;;  %v401_v1 = vpop.f32.mrf.mxu0 }
 0x1b1   :  { %v402_v10 = vadd.f32 %v401_v1, %v5186_v9  ;;  %v570_v14 = vpop.f32.mrf.mxu1 }
 0x1b2   :  { %v4214_v15 = vpop.eup %4213  ;;  %v1252_v18 = vadd.f32 %v1251_v63, %v1083_v62  ;;  %v571_v25 = vadd.f32 %v570_v14, %v5188_v11  ;;  %v3963_v14 = vld [vmem:[%s6948_s3 + $0x4] sm:$0xf] }
 0x1b3   :  { %4217 = vtanh.f32 %v402_v10  ;;  %v5634_v26 = vpack.c.bf16 %v4214_v15, %v4212_v6  ;;  %v4216_v41 = vpop.eup %4215  ;;  %v3635_v15 = vld [vmem:[%s6948_s3 + $0x8] sm:$0xf0] }
 0x1b4   :  { %4219 = vtanh.f32 %v569_v58 }
 0x1b5   :  { %7034 = vst [vmem:[#allocation6_spill] sm:$0xff] %v5634_v26  ;;  %4221 = vtanh.f32 %v571_v25 }
 0x1b6   :  { %4223 = vtanh.f32 %v1252_v18  ;;  %v3638_v18 = vor.u32 %v3963_v14, %v3635_v15 }
 0x1b7   :  { %v1084_v35 = vpop.f32.mrf.mxu2 }
 0x1b8   :  { %v1085_v43 = vadd.f32 %v1084_v35, %v5404_v22  ;;  %v1253_v51 = vpop.f32.mrf.mxu3  ;;  %v404_v54 = vpop.f32.mrf.mxu0  ;;  %1378 = vmatpush.bf16.msrb.mxu0 %v3638_v18  ;;  %v89_v18 = vld [vmem:[%s6945_s0 + $0x1b8] sm:$0xff] }
 0x1b9   :  { %v4218_v56 = vpop.eup %4217  ;;  %v573_v62 = vpop.f32.mrf.mxu1  ;;  %v405_v25 = vadd.f32 %v404_v54, %v5186_v9 }
 0x1ba   :  { %v4220_v63 = vpop.eup %4219  ;;  %v1254_v58 = vadd.f32 %v1253_v51, %v1085_v43  ;;  %v5643_v1 = vpack.c.bf16 %v4218_v56, %v4216_v41  ;;  %v574_v41 = vadd.f32 %v573_v62, %v5188_v11  ;;  %v88_v62 = vld [vmem:[%s6945_s0 + $0x1b0] sm:$0xff] }
 0x1bb   :  { %v4222_v6 = vpop.eup %4221  ;;  %3593 = vmatmul.msk.bf16.gmra.mxu0 %vm208_vm0, %v124_v39 }
 0x1bc   :  { %7035 = vst [vmem:[#allocation7_spill] sm:$0xff] %v5643_v1  ;;  %4225 = vtanh.f32 %v1254_v58  ;;  %3625 = vmatmul.msk.bf16.gmra.mxu1 %vm208_vm0, %v124_v39  ;;  %1126 = vmatmul.bf16.gmra.mxu2 %v5643_v1  ;;  %v5648_v10 = vpack.c.bf16 %v4222_v6, %v4220_v63  ;;  %v3702_v39 = vor.u32 %v3979_v29, %v3699_v32  ;;  %v4224_v54 = vpop.eup %4223 }
 0x1bd   :  { %4227 = vtanh.f32 %v405_v25  ;;  %v125_v32 = vpack.c.bf16 %v89_v18, %v88_v62  ;;  %v3777_v62 = vld [vmem:[%s6950_s5 + $0x20] sm:$0xf] }
 0x1be   :  { %7036 = vst [vmem:[#allocation8_spill] sm:$0xff] %v5648_v10  ;;  %1295 = vmatmul.bf16.gmra.mxu3 %v5648_v10  ;;  %1547 = vmatpush.bf16.msrb.mxu1 %v3702_v39  ;;  %v3841_v18 = vld [vmem:[%s6950_s5 + $0xa0] sm:$0xf] }
 0x1bf   :  { %v1087_v35 = vpop.f32.mrf.mxu2 }
 0x1c0   :  { %v1088_v43 = vadd.f32 %v1087_v35, %v5404_v22  ;;  %v406_v51 = vpop.f32.mrf.mxu0 }
 0x1c1   :  { %v1256_v56 = vpop.f32.mrf.mxu3  ;;  %v407_v63 = vadd.f32 %v406_v51, %v5186_v9  ;;  %v575_v58 = vpop.f32.mrf.mxu1 }
 0x1c2   :  { %v4226_v6 = vpop.eup %4225  ;;  %v1257_v14 = vadd.f32 %v1256_v56, %v1088_v43  ;;  %v576_v15 = vadd.f32 %v575_v58, %v5188_v11 }
 0x1c3   :  { %4229 = vtanh.f32 %v407_v63  ;;  %v5668_v10 = vpack.c.bf16 %v4226_v6, %v4224_v54  ;;  %v4228_v35 = vpop.eup %4227 }
 0x1c4   :  { %4231 = vtanh.f32 %v574_v41 }
 0x1c5   :  { %7037 = vst [vmem:[#allocation9_spill] sm:$0xff] %v5668_v10  ;;  %4233 = vtanh.f32 %v576_v15 }
 0x1c6   :  { %4235 = vtanh.f32 %v1257_v14  ;;  %v4000_v14 = vld [vmem:[%s6950_s5 + $0x24] sm:$0xf0] }
 0x1c7   :  { %v1089_v29 = vpop.f32.mrf.mxu2 }
 0x1c8   :  { %v1090_v25 = vadd.f32 %v1089_v29, %v5404_v22  ;;  %v409_v39 = vpop.f32.mrf.mxu0 }
 0x1c9   :  { %v4230_v43 = vpop.eup %4229  ;;  %v1258_v51 = vpop.f32.mrf.mxu3  ;;  %v410_v15 = vadd.f32 %v409_v39, %v5186_v9 }
 0x1ca   :  { %v578_v54 = vpop.f32.mrf.mxu1  ;;  %v4232_v56 = vpop.eup %4231  ;;  %v1259_v41 = vadd.f32 %v1258_v51, %v1090_v25  ;;  %v5677_v63 = vpack.c.bf16 %v4230_v43, %v4228_v35  ;;  %v4016_v35 = vld [vmem:[%s6950_s5 + $0xa4] sm:$0xf0] }
 0x1cb   :  { %v4234_v58 = vpop.eup %4233  ;;  %3594 = vmatmul.msk.bf16.gmra.mxu0 %vm208_vm0, %v125_v32  ;;  %v579_v25 = vadd.f32 %v578_v54, %v5188_v11  ;;  %v3842_v51 = vor.u32 %v4016_v35, %v3841_v18  ;;  %v90_v54 = vld [vmem:[%s6945_s0 + $0x1c0] sm:$0xff]  ;;  %v91_v18 = vld [vmem:[%s6945_s0 + $0x1c8] sm:$0xff] }
 0x1cc   :  { %7038 = vst [vmem:[#allocation10_spill] sm:$0xff] %v5677_v63  ;;  %4237 = vtanh.f32 %v1259_v41  ;;  %3626 = vmatmul.msk.bf16.gmra.mxu1 %vm208_vm0, %v125_v32  ;;  %1131 = vmatmul.bf16.gmra.mxu2 %v5677_v63  ;;  %v5682_v6 = vpack.c.bf16 %v4234_v58, %v4232_v56  ;;  %v3778_v32 = vor.u32 %v4000_v14, %v3777_v62  ;;  %v4236_v56 = vpop.eup %4235 }
 0x1cd   :  { %4239 = vtanh.f32 %v410_v15  ;;  %2273 = vmatpush.bf16.msrb.mxu3 %v3842_v51 }
 0x1ce   :  { %7039 = vst [vmem:[#allocation11_spill] sm:$0xff] %v5682_v6  ;;  %1300 = vmatmul.bf16.gmra.mxu3 %v5682_v6  ;;  %2104 = vmatpush.bf16.msrb.mxu2 %v3778_v32  ;;  %v126_v32 = vpack.c.bf16 %v91_v18, %v90_v54 }
 0x1cf   :  { %v1092_v29 = vpop.f32.mrf.mxu2 }
 0x1d0   :  { %v1093_v39 = vadd.f32 %v1092_v29, %v5404_v22  ;;  %v411_v43 = vpop.f32.mrf.mxu0 }
 0x1d1   :  { %v1261_v41 = vpop.f32.mrf.mxu3  ;;  %v412_v58 = vadd.f32 %v411_v43, %v5186_v9 }
 0x1d2   :  { %v580_v6 = vpop.f32.mrf.mxu1  ;;  %v4238_v63 = vpop.eup %4237  ;;  %v1262_v10 = vadd.f32 %v1261_v41, %v1093_v39 }
 0x1d3   :  { %v581_v62 = vadd.f32 %v580_v6, %v5188_v11  ;;  %4241 = vtanh.f32 %v412_v58  ;;  %v5702_v14 = vpack.c.bf16 %v4238_v63, %v4236_v56  ;;  %v4240_v15 = vpop.eup %4239 }
 0x1d4   :  { %4243 = vtanh.f32 %v579_v25 }
 0x1d5   :  { %7040 = vst [vmem:[#allocation12_spill] sm:$0xff] %v5702_v14  ;;  %4245 = vtanh.f32 %v581_v62 }
 0x1d6   :  { %4247 = vtanh.f32 %v1262_v10 }
 0x1d7   :  { %v1094_v29 = vpop.f32.mrf.mxu2 }
 0x1d8   :  { %v1095_v35 = vadd.f32 %v1094_v29, %v5404_v22  ;;  %v414_v6 = vpop.f32.mrf.mxu0 }
 0x1d9   :  { %v4242_v39 = vpop.eup %4241  ;;  %v1263_v43 = vpop.f32.mrf.mxu3  ;;  %v415_v62 = vadd.f32 %v414_v6, %v5186_v9 }
 0x1da   :  { %v583_v63 = vpop.f32.mrf.mxu1  ;;  %v4244_v51 = vpop.eup %4243  ;;  %v1264_v25 = vadd.f32 %v1263_v43, %v1095_v35  ;;  %v5711_v56 = vpack.c.bf16 %v4242_v39, %v4240_v15 }
 0x1db   :  { %v4246_v41 = vpop.eup %4245  ;;  %3595 = vmatmul.msk.bf16.gmra.mxu0 %vm208_vm0, %v126_v32  ;;  %v584_v18 = vadd.f32 %v583_v63, %v5188_v11  ;;  %v92_v63 = vld [vmem:[%s6945_s0 + $0x1d0] sm:$0xff] }
 0x1dc   :  { %7041 = vst [vmem:[#allocation13_spill] sm:$0xff] %v5711_v56  ;;  %4249 = vtanh.f32 %v1264_v25  ;;  %3627 = vmatmul.msk.bf16.gmra.mxu1 %vm208_vm0, %v126_v32  ;;  %1136 = vmatmul.bf16.gmra.mxu2 %v5711_v56  ;;  %v5716_v58 = vpack.c.bf16 %v4246_v41, %v4244_v51  ;;  %v4248_v10 = vpop.eup %4247  ;;  %v93_v41 = vld [vmem:[%s6945_s0 + $0x1d8] sm:$0xff] }
 0x1dd   :  { %4251 = vtanh.f32 %v415_v62 }
 0x1de   :  { %7042 = vst [vmem:[#allocation14_spill] sm:$0xff] %v5716_v58  ;;  %1305 = vmatmul.bf16.gmra.mxu3 %v5716_v58 }
 0x1df   :  { %v1097_v54 = vpop.f32.mrf.mxu2 }
 0x1e0   :  { %v1098_v29 = vadd.f32 %v1097_v54, %v5404_v22  ;;  %v416_v15 = vpop.f32.mrf.mxu0 }
 0x1e1   :  { %v1266_v35 = vpop.f32.mrf.mxu3  ;;  %v417_v39 = vadd.f32 %v416_v15, %v5186_v9  ;;  %v127_v15 = vpack.c.bf16 %v93_v41, %v92_v63 }
 0x1e2   :  { %v585_v43 = vpop.f32.mrf.mxu1  ;;  %v4250_v32 = vpop.eup %4249  ;;  %v1267_v25 = vadd.f32 %v1266_v35, %v1098_v29 }
 0x1e3   :  { %v586_v51 = vadd.f32 %v585_v43, %v5188_v11  ;;  %4253 = vtanh.f32 %v417_v39  ;;  %v5724_v6 = vpack.c.bf16 %v4250_v32, %v4248_v10  ;;  %v4252_v58 = vpop.eup %4251 }
 0x1e4   :  { %4255 = vtanh.f32 %v584_v18 }
 0x1e5   :  { %7043 = vst [vmem:[#allocation15_spill] sm:$0xff] %v5724_v6  ;;  %4257 = vtanh.f32 %v586_v51 }
 0x1e6   :  { %4259 = vtanh.f32 %v1267_v25 }
 0x1e7   :  { %v1099_v54 = vpop.f32.mrf.mxu2 }
 0x1e8   :  { %v1100_v62 = vadd.f32 %v1099_v54, %v5404_v22  ;;  %v419_v29 = vpop.f32.mrf.mxu0 }
 0x1e9   :  { %v4254_v35 = vpop.eup %4253  ;;  %v1268_v39 = vpop.f32.mrf.mxu3  ;;  %v420_v63 = vadd.f32 %v419_v29, %v5186_v9 }
 0x1ea   :  { %v588_v10 = vpop.f32.mrf.mxu1  ;;  %v4256_v43 = vpop.eup %4255  ;;  %v1269_v18 = vadd.f32 %v1268_v39, %v1100_v62  ;;  %v5733_v32 = vpack.c.bf16 %v4254_v35, %v4252_v58 }
 0x1eb   :  { %v4258_v6 = vpop.eup %4257  ;;  %3596 = vmatmul.msk.bf16.gmra.mxu0 %vm208_vm0, %v127_v15  ;;  %v589_v54 = vadd.f32 %v588_v10, %v5188_v11  ;;  %v94_v10 = vld [vmem:[%s6945_s0 + $0x1e0] sm:$0xff] }
 0x1ec   :  { %7044 = vst [vmem:[#allocation16_spill] sm:$0xff] %v5733_v32  ;;  %4261 = vtanh.f32 %v1269_v18  ;;  %3628 = vmatmul.msk.bf16.gmra.mxu1 %vm208_vm0, %v127_v15  ;;  %1141 = vmatmul.bf16.gmra.mxu2 %v5733_v32  ;;  %v5738_v51 = vpack.c.bf16 %v4258_v6, %v4256_v43  ;;  %v4260_v25 = vpop.eup %4259  ;;  %v95_v43 = vld [vmem:[%s6945_s0 + $0x1e8] sm:$0xff] }
 0x1ed   :  { %4263 = vtanh.f32 %v420_v63 }
 0x1ee   :  { %7045 = vst [vmem:[#allocation17_spill] sm:$0xff] %v5738_v51  ;;  %1310 = vmatmul.bf16.gmra.mxu3 %v5738_v51 }
 0x1ef   :  { %v1102_v41 = vpop.f32.mrf.mxu2 }
 0x1f0   :  { %v1103_v58 = vadd.f32 %v1102_v41, %v5404_v22  ;;  %v421_v62 = vpop.f32.mrf.mxu0 }
 0x1f1   :  { %v1271_v35 = vpop.f32.mrf.mxu3  ;;  %v422_v39 = vadd.f32 %v421_v62, %v5186_v9  ;;  %v128_v62 = vpack.c.bf16 %v95_v43, %v94_v10  ;;  %v4009_v10 = vld [vmem:[%s6950_s5 + $0x74] sm:$0xf] }
 0x1f2   :  { %v590_v18 = vpop.f32.mrf.mxu1  ;;  %v4262_v15 = vpop.eup %4261  ;;  %v1272_v32 = vadd.f32 %v1271_v35, %v1103_v58 }
 0x1f3   :  { %v591_v6 = vadd.f32 %v590_v18, %v5188_v11  ;;  %4265 = vtanh.f32 %v422_v39  ;;  %v5746_v29 = vpack.c.bf16 %v4262_v15, %v4260_v25  ;;  %v4264_v51 = vpop.eup %4263 }
 0x1f4   :  { %4267 = vtanh.f32 %v589_v54 }
 0x1f5   :  { %7046 = vst [vmem:[#allocation18_spill] sm:$0xff] %v5746_v29  ;;  %4269 = vtanh.f32 %v591_v6 }
 0x1f6   :  { %4271 = vtanh.f32 %v1272_v32 }
 0x1f7   :  { %v1104_v41 = vpop.f32.mrf.mxu2 }
 0x1f8   :  { %v1105_v63 = vadd.f32 %v1104_v41, %v5404_v22  ;;  %v424_v58 = vpop.f32.mrf.mxu0  ;;  %v4025_v41 = vld [vmem:[%s6950_s5 + $0xf4] sm:$0xf] }
 0x1f9   :  { %v4266_v35 = vpop.eup %4265  ;;  %v1273_v39 = vpop.f32.mrf.mxu3  ;;  %v425_v43 = vadd.f32 %v424_v58, %v5186_v9 }
 0x1fa   :  { %v593_v25 = vpop.f32.mrf.mxu1  ;;  %v4268_v18 = vpop.eup %4267  ;;  %v1274_v54 = vadd.f32 %v1273_v39, %v1105_v63  ;;  %v5755_v15 = vpack.c.bf16 %v4266_v35, %v4264_v51  ;;  %v3819_v51 = vld [vmem:[%s6950_s5 + $0x78] sm:$0xf0] }
 0x1fb   :  { %v4270_v29 = vpop.eup %4269  ;;  %3597 = vmatmul.msk.bf16.gmra.mxu0 %vm208_vm0, %v128_v62  ;;  %v3822_v32 = vor.u32 %v4009_v10, %v3819_v51  ;;  %v594_v35 = vadd.f32 %v593_v25, %v5188_v11  ;;  %v96_v25 = vld [vmem:[%s6945_s0 + $0x1f0] sm:$0xff] }
 0x1fc   :  { %7047 = vst [vmem:[#allocation19_spill] sm:$0xff] %v5755_v15  ;;  %4273 = vtanh.f32 %v1274_v54  ;;  %3629 = vmatmul.msk.bf16.gmra.mxu1 %vm208_vm0, %v128_v62  ;;  %1146 = vmatmul.bf16.gmra.mxu2 %v5755_v15  ;;  %v5760_v6 = vpack.c.bf16 %v4270_v29, %v4268_v18  ;;  %v3883_v29 = vld [vmem:[%s6950_s5 + $0xf8] sm:$0xf0]  ;;  %v4272_v58 = vpop.eup %4271 }
 0x1fd   :  { %v3886_v63 = vor.u32 %v4025_v41, %v3883_v29  ;;  %2437 = vmatpush.bf16.msra.mxu0 %v3822_v32  ;;  %4275 = vtanh.f32 %v425_v43  ;;  %v97_v32 = vld [vmem:[%s6945_s0 + $0x1f8] sm:$0xff] }
 0x1fe   :  { %7048 = vst [vmem:[#allocation20_spill] sm:$0xff] %v5760_v6  ;;  %1315 = vmatmul.bf16.gmra.mxu3 %v5760_v6  ;;  %v129_v29 = vpack.c.bf16 %v97_v32, %v96_v25  ;;  %v3769_v25 = vld [vmem:[%s6950_s5 + $0x10] sm:$0xf] }
 0x1ff   :  { %v1107_v62 = vpop.f32.mrf.mxu2  ;;  %2606 = vmatpush.bf16.msra.mxu1 %v3886_v63  ;;  %v3833_v32 = vld [vmem:[%s6950_s5 + $0x90] sm:$0xf] }
 0x200   :  { %v1108_v39 = vadd.f32 %v1107_v62, %v5404_v22  ;;  %v426_v18 = vpop.f32.mrf.mxu0 }
 0x201   :  { %v1276_v54 = vpop.f32.mrf.mxu3  ;;  %v427_v10 = vadd.f32 %v426_v18, %v5186_v9 }
 0x202   :  { %v595_v51 = vpop.f32.mrf.mxu1  ;;  %v4274_v6 = vpop.eup %4273  ;;  %v1277_v15 = vadd.f32 %v1276_v54, %v1108_v39 }
 0x203   :  { %v596_v56 = vadd.f32 %v595_v51, %v5188_v11  ;;  %4277 = vtanh.f32 %v427_v10  ;;  %v5780_v14 = vpack.c.bf16 %v4274_v6, %v4272_v58  ;;  %v4276_v62 = vpop.eup %4275 }
 0x204   :  { %4279 = vtanh.f32 %v594_v35 }
 0x205   :  { %7049 = vst [vmem:[#allocation21_spill] sm:$0xff] %v5780_v14  ;;  %4281 = vtanh.f32 %v596_v56 }
 0x206   :  { %4283 = vtanh.f32 %v1277_v15  ;;  %v3998_v15 = vld [vmem:[%s6950_s5 + $0x14] sm:$0xf0] }
 0x207   :  { %v1109_v41 = vpop.f32.mrf.mxu2 }
 0x208   :  { %v1110_v43 = vadd.f32 %v1109_v41, %v5404_v22  ;;  %v429_v63 = vpop.f32.mrf.mxu0 }
 0x209   :  { %v4278_v39 = vpop.eup %4277  ;;  %v1278_v18 = vpop.f32.mrf.mxu3  ;;  %v430_v51 = vadd.f32 %v429_v63, %v5186_v9 }
 0x20a   :  { %v598_v6 = vpop.f32.mrf.mxu1  ;;  %v4280_v58 = vpop.eup %4279  ;;  %v1279_v35 = vadd.f32 %v1278_v18, %v1110_v43  ;;  %v5789_v54 = vpack.c.bf16 %v4278_v39, %v4276_v62  ;;  %v4014_v62 = vld [vmem:[%s6950_s5 + $0x94] sm:$0xf0] }
 0x20b   :  { %v4282_v10 = vpop.eup %4281  ;;  %3598 = vmatmul.msk.bf16.gmra.mxu0 %vm208_vm0, %v129_v29  ;;  %v599_v43 = vadd.f32 %v598_v6, %v5188_v11  ;;  %v3834_v18 = vor.u32 %v4014_v62, %v3833_v32 }
 0x20c   :  { %7050 = vst [vmem:[#allocation22_spill] sm:$0xff] %v5789_v54  ;;  %4285 = vtanh.f32 %v1279_v35  ;;  %3630 = vmatmul.msk.bf16.gmra.mxu1 %vm208_vm0, %v129_v29  ;;  %1151 = vmatmul.bf16.gmra.mxu2 %v5789_v54  ;;  %v5794_v56 = vpack.c.bf16 %v4282_v10, %v4280_v58  ;;  %v3770_v29 = vor.u32 %v3998_v15, %v3769_v25  ;;  %v4284_v58 = vpop.eup %4283 }
 0x20d   :  { %4287 = vtanh.f32 %v430_v51  ;;  %2274 = vmatpush.bf16.msrb.mxu3 %v3834_v18 }
 0x20e   :  { %7051 = vst [vmem:[#allocation23_spill] sm:$0xff] %v5794_v56  ;;  %1320 = vmatmul.bf16.gmra.mxu3 %v5794_v56  ;;  %2105 = vmatpush.bf16.msrb.mxu2 %v3770_v29 }
 0x20f   :  { %v1112_v41 = vpop.f32.mrf.mxu2 }
 0x210   :  { %v1113_v63 = vadd.f32 %v1112_v41, %v5404_v22  ;;  %v431_v39 = vpop.f32.mrf.mxu0 }
 0x211   :  { %v1281_v35 = vpop.f32.mrf.mxu3  ;;  %v432_v10 = vadd.f32 %v431_v39, %v5186_v9 }
 0x212   :  { %v600_v56 = vpop.f32.mrf.mxu1  ;;  %v4286_v54 = vpop.eup %4285  ;;  %v1282_v14 = vadd.f32 %v1281_v35, %v1113_v63 }
 0x213   :  { %v601_v25 = vadd.f32 %v600_v56, %v5188_v11  ;;  %4289 = vtanh.f32 %v432_v10  ;;  %v5814_v15 = vpack.c.bf16 %v4286_v54, %v4284_v58  ;;  %v4288_v41 = vpop.eup %4287 }
 0x214   :  { %4291 = vtanh.f32 %v599_v43 }
 0x215   :  { %7052 = vst [vmem:[#allocation24_spill] sm:$0xff] %v5814_v15  ;;  %4293 = vtanh.f32 %v601_v25 }
 0x216   :  { %4295 = vtanh.f32 %v1282_v14 }
 0x217   :  { %v1114_v6 = vpop.f32.mrf.mxu2 }
 0x218   :  { %v1115_v32 = vadd.f32 %v1114_v6, %v5404_v22  ;;  %v434_v62 = vpop.f32.mrf.mxu0 }
 0x219   :  { %v4290_v1 = vpop.eup %4289  ;;  %v1283_v39 = vpop.f32.mrf.mxu3  ;;  %v435_v56 = vadd.f32 %v434_v62, %v5186_v9 }
 0x21a   :  { %v603_v26 = vpop.f32.mrf.mxu1  ;;  %v4292_v29 = vpop.eup %4291  ;;  %v1284_v52 = vadd.f32 %v1283_v39, %v1115_v32  ;;  %v5817_v51 = vpack.c.bf16 %v4290_v1, %v4288_v41 }
 0x21b   :  { %v4294_v63 = vpop.eup %4293  ;;  %1379 = vmatmul.bf16.vlgmr.msrb.gmra.mxu0 %v5202_v27  ;;  %v604_v18 = vadd.f32 %v603_v26, %v5188_v11 }
 0x21c   :  { %4297 = vtanh.f32 %v1284_v52  ;;  %1548 = vmatmul.bf16.vlgmr.msrb.gmra.mxu1 %v5205_v28  ;;  %1156 = vmatmul.bf16.gmra.mxu2 %v5817_v51  ;;  %v5822_v54 = vpack.c.bf16 %v4294_v63, %v4292_v29  ;;  %v4296_v14 = vpop.eup %4295 }
 0x21d   :  { %4299 = vtanh.f32 %v435_v56 }
 0x21e   :  { %7053 = vst [vmem:[#allocation25_spill] sm:$0xff] %v5822_v54  ;;  %1325 = vmatmul.bf16.gmra.mxu3 %v5822_v54 }
 0x21f   :  { %v1117_v43 = vpop.f32.mrf.mxu2 }
 0x220   :  { %v1118_v1 = vadd.f32 %v1117_v43, %v5404_v22  ;;  %v436_v58 = vpop.f32.mrf.mxu0 }
 0x221   :  { %v1286_v35 = vpop.f32.mrf.mxu3  ;;  %v437_v27 = vadd.f32 %v436_v58, %v5186_v9 }
 0x222   :  { %v605_v52 = vpop.f32.mrf.mxu1  ;;  %v4298_v28 = vpop.eup %4297  ;;  %v1287_v10 = vadd.f32 %v1286_v35, %v1118_v1 }
 0x223   :  { %v606_v25 = vadd.f32 %v605_v52, %v5188_v11  ;;  %4301 = vtanh.f32 %v437_v27  ;;  %v5830_v6 = vpack.c.bf16 %v4298_v28, %v4296_v14  ;;  %v4300_v26 = vpop.eup %4299 }
 0x224   :  { %4303 = vtanh.f32 %v604_v18 }
 0x225   :  { %4305 = vtanh.f32 %v606_v25 }
 0x226   :  { %4307 = vtanh.f32 %v1287_v10 }
 0x227   :  { %v1119_v41 = vpop.f32.mrf.mxu2 }
 0x228   :  { %v1120_v32 = vadd.f32 %v1119_v41, %v5404_v22  ;;  %v439_v62 = vpop.f32.mrf.mxu0 }
 0x229   :  { %v4302_v39 = vpop.eup %4301  ;;  %v1288_v29 = vpop.f32.mrf.mxu3  ;;  %v440_v1 = vadd.f32 %v439_v62, %v5186_v9 }
 0x22a   :  { %v608_v63 = vpop.f32.mrf.mxu1  ;;  %v4304_v43 = vpop.eup %4303  ;;  %v1289_v58 = vadd.f32 %v1288_v29, %v1120_v32  ;;  %v5833_v54 = vpack.c.bf16 %v4302_v39, %v4300_v26 }
 0x22b   :  { %v4306_v56 = vpop.eup %4305  ;;  %1384 = vmatmul.bf16.gmra.mxu0 %v5220_v44  ;;  %v609_v35 = vadd.f32 %v608_v63, %v5188_v11 }
 0x22c   :  { %4309 = vtanh.f32 %v1289_v58  ;;  %1553 = vmatmul.bf16.gmra.mxu1 %v5223_v45  ;;  %1161 = vmatmul.bf16.gmra.mxu2 %v5833_v54  ;;  %v5838_v18 = vpack.c.bf16 %v4306_v56, %v4304_v43  ;;  %v4308_v28 = vpop.eup %4307 }
 0x22d   :  { %4311 = vtanh.f32 %v440_v1 }
 0x22e   :  { %7054 = vst [vmem:[#allocation26_spill] sm:$0xff] %v5838_v18  ;;  %1330 = vmatmul.bf16.gmra.mxu3 %v5838_v18 }
 0x22f   :  { %v1122_v14 = vpop.f32.mrf.mxu2 }
 0x230   :  { %v1123_v27 = vadd.f32 %v1122_v14, %v5404_v22  ;;  %v441_v52 = vpop.f32.mrf.mxu0 }
 0x231   :  { %v1291_v10 = vpop.f32.mrf.mxu3  ;;  %v442_v44 = vadd.f32 %v441_v52, %v5186_v9 }
 0x232   :  { %v610_v25 = vpop.f32.mrf.mxu1  ;;  %v4310_v45 = vpop.eup %4309  ;;  %v1292_v41 = vadd.f32 %v1291_v10, %v1123_v27  ;;  %v4007_v27 = vld [vmem:[%s6950_s5 + $0x64] sm:$0xf] }
 0x233   :  { %v611_v26 = vadd.f32 %v610_v25, %v5188_v11  ;;  %4313 = vtanh.f32 %v442_v44  ;;  %v5846_v32 = vpack.c.bf16 %v4310_v45, %v4308_v28  ;;  %v4312_v39 = vpop.eup %4311  ;;  %v3811_v28 = vld [vmem:[%s6950_s5 + $0x68] sm:$0xf0] }
 0x234   :  { %4315 = vtanh.f32 %v609_v35  ;;  %v3875_v44 = vld [vmem:[%s6950_s5 + $0xe8] sm:$0xf0] }
 0x235   :  { %7055 = vst [vmem:[#allocation27_spill] sm:$0xff] %v5846_v32  ;;  %4317 = vtanh.f32 %v611_v26 }
 0x236   :  { %4319 = vtanh.f32 %v1292_v41 }
 0x237   :  { %v1124_v62 = vpop.f32.mrf.mxu2 }
 0x238   :  { %v1125_v29 = vadd.f32 %v1124_v62, %v5404_v22  ;;  %v444_v63 = vpop.f32.mrf.mxu0 }
 0x239   :  { %v4314_v43 = vpop.eup %4313  ;;  %v1293_v58 = vpop.f32.mrf.mxu3  ;;  %v445_v10 = vadd.f32 %v444_v63, %v5186_v9 }
 0x23a   :  { %v613_v56 = vpop.f32.mrf.mxu1  ;;  %v4316_v14 = vpop.eup %4315  ;;  %v1294_v52 = vadd.f32 %v1293_v58, %v1125_v29  ;;  %v5849_v18 = vpack.c.bf16 %v4314_v43, %v4312_v39 }
 0x23b   :  { %v4318_v1 = vpop.eup %4317  ;;  %1389 = vmatmul.bf16.gmra.mxu0 %v5250_v3  ;;  %v3814_v3 = vor.u32 %v4007_v27, %v3811_v28  ;;  %v614_v41 = vadd.f32 %v613_v56, %v5188_v11 }
 0x23c   :  { %4321 = vtanh.f32 %v1294_v52  ;;  %1558 = vmatmul.bf16.gmra.mxu1 %v5253_v4  ;;  %1166 = vmatmul.bf16.gmra.mxu2 %v5849_v18  ;;  %v5854_v35 = vpack.c.bf16 %v4318_v1, %v4316_v14  ;;  %v4023_v4 = vld [vmem:[%s6950_s5 + $0xe4] sm:$0xf]  ;;  %v4320_v39 = vpop.eup %4319 }
 0x23d   :  { %v3878_v45 = vor.u32 %v4023_v4, %v3875_v44  ;;  %2438 = vmatpush.bf16.msra.mxu0 %v3814_v3  ;;  %4323 = vtanh.f32 %v445_v10 }
 0x23e   :  { %7056 = vst [vmem:[#allocation28_spill] sm:$0xff] %v5854_v35  ;;  %1335 = vmatmul.bf16.gmra.mxu3 %v5854_v35 }
 0x23f   :  { %v1127_v25 = vpop.f32.mrf.mxu2  ;;  %2607 = vmatpush.bf16.msra.mxu1 %v3878_v45 }
 0x240   :  { %v1128_v26 = vadd.f32 %v1127_v25, %v5404_v22  ;;  %v446_v62 = vpop.f32.mrf.mxu0 }
 0x241   :  { %v1296_v29 = vpop.f32.mrf.mxu3  ;;  %v447_v63 = vadd.f32 %v446_v62, %v5186_v9 }
 0x242   :  { %v615_v43 = vpop.f32.mrf.mxu1  ;;  %v4322_v58 = vpop.eup %4321  ;;  %v1297_v14 = vadd.f32 %v1296_v29, %v1128_v26  ;;  %v3996_v29 = vld [vmem:[%s6950_s5 + $0x4] sm:$0xf0] }
 0x243   :  { %v616_v52 = vadd.f32 %v615_v43, %v5188_v11  ;;  %4325 = vtanh.f32 %v447_v63  ;;  %v5874_v1 = vpack.c.bf16 %v4322_v58, %v4320_v39  ;;  %v4324_v27 = vpop.eup %4323  ;;  %v3761_v39 = vld [vmem:[%s6950_s5] sm:$0xf]  ;;  %v4012_v43 = vld [vmem:[%s6950_s5 + $0x84] sm:$0xf0] }
 0x244   :  { %4327 = vtanh.f32 %v614_v41  ;;  %v3762_v63 = vor.u32 %v3996_v29, %v3761_v39 }
 0x245   :  { %7057 = vst [vmem:[#allocation29_spill] sm:$0xff] %v5874_v1  ;;  %4329 = vtanh.f32 %v616_v52 }
 0x246   :  { %4331 = vtanh.f32 %v1297_v14  ;;  %2106 = vmatpush.bf16.msrb.mxu2 %v3762_v63 }
 0x247   :  { %v1129_v56 = vpop.f32.mrf.mxu2 }
 0x248   :  { %v1130_v28 = vadd.f32 %v1129_v56, %v5404_v22  ;;  %v449_v3 = vpop.f32.mrf.mxu0 }
 0x249   :  { %v4326_v4 = vpop.eup %4325  ;;  %v1298_v44 = vpop.f32.mrf.mxu3  ;;  %v450_v26 = vadd.f32 %v449_v3, %v5186_v9 }
 0x24a   :  { %v618_v25 = vpop.f32.mrf.mxu1  ;;  %v4328_v62 = vpop.eup %4327  ;;  %v1299_v45 = vadd.f32 %v1298_v44, %v1130_v28  ;;  %v5877_v35 = vpack.c.bf16 %v4326_v4, %v4324_v27 }
 0x24b   :  { %v4330_v10 = vpop.eup %4329  ;;  %1394 = vmatmul.bf16.gmra.mxu0 %v5280_v30  ;;  %v3825_v30 = vld [vmem:[%s6950_s5 + $0x80] sm:$0xf]  ;;  %v619_v58 = vadd.f32 %v618_v25, %v5188_v11 }
 0x24c   :  { %4333 = vtanh.f32 %v1299_v45  ;;  %1563 = vmatmul.bf16.gmra.mxu1 %v5283_v31  ;;  %1171 = vmatmul.bf16.gmra.mxu2 %v5877_v35  ;;  %v5882_v41 = vpack.c.bf16 %v4330_v10, %v4328_v62  ;;  %v3826_v56 = vor.u32 %v4012_v43, %v3825_v30  ;;  %v4332_v27 = vpop.eup %4331 }
 0x24d   :  { %4335 = vtanh.f32 %v450_v26 }
 0x24e   :  { %7058 = vst [vmem:[#allocation30_spill] sm:$0xff] %v5882_v41  ;;  %1340 = vmatmul.bf16.gmra.mxu3 %v5882_v41 }
 0x24f   :  { %v1132_v31 = vpop.f32.mrf.mxu2  ;;  %2275 = vmatpush.bf16.msrb.mxu3 %v3826_v56 }
 0x250   :  { %v1133_v14 = vadd.f32 %v1132_v31, %v5404_v22  ;;  %v451_v52 = vpop.f32.mrf.mxu0 }
 0x251   :  { %v1301_v28 = vpop.f32.mrf.mxu3  ;;  %v452_v3 = vadd.f32 %v451_v52, %v5186_v9 }
 0x252   :  { %v620_v4 = vpop.f32.mrf.mxu1  ;;  %v4334_v44 = vpop.eup %4333  ;;  %v1302_v62 = vadd.f32 %v1301_v28, %v1133_v14 }
 0x253   :  { %v621_v45 = vadd.f32 %v620_v4, %v5188_v11  ;;  %4337 = vtanh.f32 %v452_v3  ;;  %v5902_v10 = vpack.c.bf16 %v4334_v44, %v4332_v27  ;;  %v4336_v39 = vpop.eup %4335 }
 0x254   :  { %4339 = vtanh.f32 %v619_v58 }
 0x255   :  { %7059 = vst [vmem:[#allocation31_spill] sm:$0xff] %v5902_v10  ;;  %4341 = vtanh.f32 %v621_v45 }
 0x256   :  { %4343 = vtanh.f32 %v1302_v62 }
 0x257   :  { %v1134_v25 = vpop.f32.mrf.mxu2 }
 0x258   :  { %v1135_v29 = vadd.f32 %v1134_v25, %v5404_v22  ;;  %v454_v30 = vpop.f32.mrf.mxu0 }
 0x259   :  { %v4338_v31 = vpop.eup %4337  ;;  %v1303_v43 = vpop.f32.mrf.mxu3  ;;  %v455_v56 = vadd.f32 %v454_v30, %v5186_v9 }
 0x25a   :  { %v623_v52 = vpop.f32.mrf.mxu1  ;;  %v4340_v63 = vpop.eup %4339  ;;  %v1304_v41 = vadd.f32 %v1303_v43, %v1135_v29  ;;  %v5905_v26 = vpack.c.bf16 %v4338_v31, %v4336_v39 }
 0x25b   :  { %v4342_v14 = vpop.eup %4341  ;;  %1399 = vmatmul.bf16.gmra.mxu0 %v5298_v49  ;;  %v624_v28 = vadd.f32 %v623_v52, %v5188_v11 }
 0x25c   :  { %4345 = vtanh.f32 %v1304_v41  ;;  %1568 = vmatmul.bf16.gmra.mxu1 %v5301_v50  ;;  %1176 = vmatmul.bf16.gmra.mxu2 %v5905_v26  ;;  %v5910_v58 = vpack.c.bf16 %v4342_v14, %v4340_v63  ;;  %v4344_v44 = vpop.eup %4343 }
 0x25d   :  { %4347 = vtanh.f32 %v455_v56 }
 0x25e   :  { %7060 = vst [vmem:[#allocation32_spill] sm:$0xff] %v5910_v58  ;;  %1345 = vmatmul.bf16.gmra.mxu3 %v5910_v58 }
 0x25f   :  { %v1137_v27 = vpop.f32.mrf.mxu2 }
 0x260   :  { %v1138_v3 = vadd.f32 %v1137_v27, %v5404_v22  ;;  %v456_v4 = vpop.f32.mrf.mxu0 }
 0x261   :  { %v1306_v62 = vpop.f32.mrf.mxu3  ;;  %v457_v49 = vadd.f32 %v456_v4, %v5186_v9 }
 0x262   :  { %v625_v41 = vpop.f32.mrf.mxu1  ;;  %v4346_v50 = vpop.eup %4345  ;;  %v1307_v45 = vadd.f32 %v1306_v62, %v1138_v3 }
 0x263   :  { %v626_v25 = vadd.f32 %v625_v41, %v5188_v11  ;;  %4349 = vtanh.f32 %v457_v49  ;;  %v5918_v39 = vpack.c.bf16 %v4346_v50, %v4344_v44  ;;  %v4348_v30 = vpop.eup %4347 }
 0x264   :  { %4351 = vtanh.f32 %v624_v28 }
 0x265   :  { %4353 = vtanh.f32 %v626_v25 }
 0x266   :  { %4355 = vtanh.f32 %v1307_v45 }
 0x267   :  { %v1139_v29 = vpop.f32.mrf.mxu2 }
 0x268   :  { %v1140_v31 = vadd.f32 %v1139_v29, %v5404_v22  ;;  %v459_v43 = vpop.f32.mrf.mxu0 }
 0x269   :  { %v4350_v52 = vpop.eup %4349  ;;  %v1308_v63 = vpop.f32.mrf.mxu3  ;;  %v460_v3 = vadd.f32 %v459_v43, %v5186_v9 }
 0x26a   :  { %v628_v14 = vpop.f32.mrf.mxu1  ;;  %v4352_v27 = vpop.eup %4351  ;;  %v1309_v4 = vadd.f32 %v1308_v63, %v1140_v31  ;;  %v5921_v58 = vpack.c.bf16 %v4350_v52, %v4348_v30 }
 0x26b   :  { %v4354_v56 = vpop.eup %4353  ;;  %1404 = vmatmul.bf16.gmra.mxu0 %v5316_v2  ;;  %v629_v62 = vadd.f32 %v628_v14, %v5188_v11 }
 0x26c   :  { %4357 = vtanh.f32 %v1309_v4  ;;  %1573 = vmatmul.bf16.gmra.mxu1 %v5319_v5  ;;  %1181 = vmatmul.bf16.gmra.mxu2 %v5921_v58  ;;  %v5926_v28 = vpack.c.bf16 %v4354_v56, %v4352_v27  ;;  %v4356_v50 = vpop.eup %4355 }
 0x26d   :  { %4359 = vtanh.f32 %v460_v3 }
 0x26e   :  { %7061 = vst [vmem:[#allocation33_spill] sm:$0xff] %v5926_v28  ;;  %1350 = vmatmul.bf16.gmra.mxu3 %v5926_v28 }
 0x26f   :  { %v1142_v44 = vpop.f32.mrf.mxu2 }
 0x270   :  { %v1143_v49 = vadd.f32 %v1142_v44, %v5404_v22  ;;  %v461_v41 = vpop.f32.mrf.mxu0 }
 0x271   :  { %v1311_v45 = vpop.f32.mrf.mxu3  ;;  %v462_v2 = vadd.f32 %v461_v41, %v5186_v9 }
 0x272   :  { %v630_v25 = vpop.f32.mrf.mxu1  ;;  %v4358_v5 = vpop.eup %4357  ;;  %v1312_v29 = vadd.f32 %v1311_v45, %v1143_v49  ;;  %v4005_v49 = vld [vmem:[%s6950_s5 + $0x54] sm:$0xf] }
 0x273   :  { %v631_v30 = vadd.f32 %v630_v25, %v5188_v11  ;;  %4361 = vtanh.f32 %v462_v2  ;;  %v5934_v31 = vpack.c.bf16 %v4358_v5, %v4356_v50  ;;  %v4360_v52 = vpop.eup %4359  ;;  %v3803_v50 = vld [vmem:[%s6950_s5 + $0x58] sm:$0xf0] }
 0x274   :  { %4363 = vtanh.f32 %v629_v62  ;;  %v3867_v2 = vld [vmem:[%s6950_s5 + $0xd8] sm:$0xf0] }
 0x275   :  { %7062 = vst [vmem:[#allocation34_spill] sm:$0xff] %v5934_v31  ;;  %4365 = vtanh.f32 %v631_v30 }
 0x276   :  { %4367 = vtanh.f32 %v1312_v29 }
 0x277   :  { %v1144_v43 = vpop.f32.mrf.mxu2 }
 0x278   :  { %v1145_v63 = vadd.f32 %v1144_v43, %v5404_v22  ;;  %v464_v14 = vpop.f32.mrf.mxu0 }
 0x279   :  { %v4362_v27 = vpop.eup %4361  ;;  %v1313_v4 = vpop.f32.mrf.mxu3  ;;  %v465_v45 = vadd.f32 %v464_v14, %v5186_v9 }
 0x27a   :  { %v633_v56 = vpop.f32.mrf.mxu1  ;;  %v4364_v44 = vpop.eup %4363  ;;  %v1314_v41 = vadd.f32 %v1313_v4, %v1145_v63  ;;  %v5937_v28 = vpack.c.bf16 %v4362_v27, %v4360_v52 }
 0x27b   :  { %v4366_v3 = vpop.eup %4365  ;;  %1409 = vmatmul.bf16.gmra.mxu0 %v5346_v33  ;;  %v3806_v33 = vor.u32 %v4005_v49, %v3803_v50  ;;  %v634_v29 = vadd.f32 %v633_v56, %v5188_v11 }
 0x27c   :  { %4369 = vtanh.f32 %v1314_v41  ;;  %1578 = vmatmul.bf16.gmra.mxu1 %v5349_v34  ;;  %1186 = vmatmul.bf16.gmra.mxu2 %v5937_v28  ;;  %v5942_v62 = vpack.c.bf16 %v4366_v3, %v4364_v44  ;;  %v4021_v34 = vld [vmem:[%s6950_s5 + $0xd4] sm:$0xf]  ;;  %v4368_v52 = vpop.eup %4367 }
 0x27d   :  { %v3870_v5 = vor.u32 %v4021_v34, %v3867_v2  ;;  %2439 = vmatpush.bf16.msra.mxu0 %v3806_v33  ;;  %4371 = vtanh.f32 %v465_v45 }
 0x27e   :  { %7063 = vst [vmem:[#allocation35_spill] sm:$0xff] %v5942_v62  ;;  %1355 = vmatmul.bf16.gmra.mxu3 %v5942_v62 }
 0x27f   :  { %v1147_v25 = vpop.f32.mrf.mxu2  ;;  %2608 = vmatpush.bf16.msra.mxu1 %v3870_v5 }
 0x280   :  { %v1148_v30 = vadd.f32 %v1147_v25, %v5404_v22  ;;  %v466_v43 = vpop.f32.mrf.mxu0 }
 0x281   :  { %v1316_v63 = vpop.f32.mrf.mxu3  ;;  %v467_v14 = vadd.f32 %v466_v43, %v5186_v9 }
 0x282   :  { %v635_v27 = vpop.f32.mrf.mxu1  ;;  %v4370_v4 = vpop.eup %4369  ;;  %v1317_v44 = vadd.f32 %v1316_v63, %v1148_v30  ;;  %v4034_v30 = vld [vmem:[%s6952_s7 + $0x38] sm:$0xff] }
 0x283   :  { %v636_v41 = vadd.f32 %v635_v27, %v5188_v11  ;;  %4373 = vtanh.f32 %v467_v14  ;;  %v5962_v3 = vpack.c.bf16 %v4370_v4, %v4368_v52  ;;  %v4372_v49 = vpop.eup %4371  ;;  %v4042_v63 = vld [vmem:[%s6952_s7 + $0x78] sm:$0xff]  ;;  %3099 = vmatpush.bf16.msra.mxu2 %v4034_v30 }
 0x284   :  { %4375 = vtanh.f32 %v634_v29  ;;  %3268 = vmatpush.bf16.msra.mxu3 %v4042_v63 }
 0x285   :  { %7064 = vst [vmem:[#allocation36_spill] sm:$0xff] %v5962_v3  ;;  %4377 = vtanh.f32 %v636_v41 }
 0x286   :  { %4379 = vtanh.f32 %v1317_v44 }
 0x287   :  { %v1149_v56 = vpop.f32.mrf.mxu2 }
 0x288   :  { %v1150_v50 = vadd.f32 %v1149_v56, %v5404_v22  ;;  %v469_v33 = vpop.f32.mrf.mxu0 }
 0x289   :  { %v4374_v34 = vpop.eup %4373  ;;  %v1318_v2 = vpop.f32.mrf.mxu3  ;;  %v470_v52 = vadd.f32 %v469_v33, %v5186_v9 }
 0x28a   :  { %v638_v25 = vpop.f32.mrf.mxu1  ;;  %v4376_v43 = vpop.eup %4375  ;;  %v1319_v5 = vadd.f32 %v1318_v2, %v1150_v50  ;;  %v5965_v62 = vpack.c.bf16 %v4374_v34, %v4372_v49 }
 0x28b   :  { %v4378_v45 = vpop.eup %4377  ;;  %1414 = vmatmul.bf16.gmra.mxu0 %v5376_v60 }
 0x28c   :  { %4381 = vtanh.f32 %v1319_v5  ;;  %1583 = vmatmul.bf16.gmra.mxu1 %v5379_v61  ;;  %1191 = vmatmul.bf16.gmra.mxu2 %v5965_v62  ;;  %v5970_v29 = vpack.c.bf16 %v4378_v45, %v4376_v43  ;;  %v639_v61 = vadd.f32 %v638_v25, %v5188_v11  ;;  %v4380_v4 = vpop.eup %4379  ;;  %v4815_v5 = vld [vmem:[%s6949_s4] sm:$0x3]  ;;  %s4846_s4 = smov 8  }
 0x28d   :  { %4383 = vtanh.f32 %v470_v52 }
 0x28e   :  { %1360 = vmatmul.bf16.gmra.mxu3 %v5970_v29 }
 0x28f   :  { %v1152_v60 = vpop.f32.mrf.mxu2 }
 0x290   :  { %v1153_v14 = vadd.f32 %v1152_v60, %v5404_v22  ;;  %v471_v27 = vpop.f32.mrf.mxu0 }
 0x291   :  { %v1321_v44 = vpop.f32.mrf.mxu3  ;;  %v472_v41 = vadd.f32 %v471_v27, %v5186_v9  ;;  %v5990_v9 = vperm.slane %v4815_v5, 1 }
 0x292   :  { %v640_v56 = vpop.f32.mrf.mxu1  ;;  %v4382_v49 = vpop.eup %4381  ;;  %v1322_v50 = vadd.f32 %v1321_v44, %v1153_v14 }
 0x293   :  { %v641_v33 = vadd.f32 %v640_v56, %v5188_v11  ;;  %4385 = vtanh.f32 %v472_v41  ;;  %v5984_v34 = vpack.c.bf16 %v4382_v49, %v4380_v4  ;;  %v4384_v25 = vpop.eup %4383 }
 0x294   :  { %4387 = vtanh.f32 %v639_v61 }
 0x295   :  { %4389 = vtanh.f32 %v641_v33 }
 0x296   :  { %4391 = vtanh.f32 %v1322_v50 }
 0x297   :  { %v1154_v2 = vpop.f32.mrf.mxu2 }
 0x298   :  { %v1155_v43 = vadd.f32 %v1154_v2, %v5404_v22  ;;  %v1380_v45 = vpop.f32.mrf.mxu0 }
 0x299   :  { %v4386_v30 = vpop.eup %4385  ;;  %v1323_v52 = vpop.f32.mrf.mxu3  ;;  %v1381_v27 = vadd.f32 %v1380_v45, %v5990_v9 }
 0x29a   :  { %v1549_v63 = vpop.f32.mrf.mxu1  ;;  %v4388_v11 = vpop.eup %4387  ;;  %v1324_v60 = vadd.f32 %v1323_v52, %v1155_v43  ;;  %v5992_v14 = vpack.c.bf16 %v4386_v30, %v4384_v25 }
 0x29b   :  { %v4390_v61 = vpop.eup %4389  ;;  %1419 = vmatmul.bf16.gmra.mxu0 %v5397_v20  ;;  %v1550_v41 = vadd.f32 %v1549_v63, %v1381_v27 }
 0x29c   :  { %4393 = vtanh.f32 %v1324_v60  ;;  %1588 = vmatmul.bf16.gmra.mxu1 %v5400_v21  ;;  %1196 = vmatmul.bf16.gmra.mxu2 %v5992_v14  ;;  %v5998_v4 = vpack.c.bf16 %v4390_v61, %v4388_v11  ;;  %v4392_v33 = vpop.eup %4391 }
 0x29d   :  { %4395 = vtanh.f32 %v1550_v41 }
 0x29e   :  { %1365 = vmatmul.bf16.gmra.mxu3 %v5998_v4 }
 0x29f   :  { %v1157_v44 = vpop.f32.mrf.mxu2 }
 0x2a0   :  { %v1158_v56 = vadd.f32 %v1157_v44, %v5404_v22  ;;  %v1382_v49 = vpop.f32.mrf.mxu0 }
 0x2a1   :  { %v1326_v50 = vpop.f32.mrf.mxu3  ;;  %v1383_v20 = vadd.f32 %v1382_v49, %v5990_v9 }
 0x2a2   :  { %v1551_v2 = vpop.f32.mrf.mxu1  ;;  %v4394_v25 = vpop.eup %4393  ;;  %v1327_v43 = vadd.f32 %v1326_v50, %v1158_v56 }
 0x2a3   :  { %v1552_v5 = vadd.f32 %v1551_v2, %v1383_v20  ;;  %v6003_v21 = vpack.c.bf16 %v4394_v25, %v4392_v33  ;;  %v4396_v60 = vpop.eup %4395 }
 0x2a5   :  { %4397 = vtanh.f32 %v1552_v5 }
 0x2a6   :  { %4399 = vtanh.f32 %v1327_v43 }
 0x2a7   :  { %v1159_v45 = vpop.f32.mrf.mxu2 }
 0x2a8   :  { %v1160_v30 = vadd.f32 %v1159_v45, %v5404_v22  ;;  %v1385_v52 = vpop.f32.mrf.mxu0 }
 0x2a9   :  { %v1328_v63 = vpop.f32.mrf.mxu3  ;;  %v1386_v44 = vadd.f32 %v1385_v52, %v5990_v9 }
 0x2aa   :  { %v1554_v11 = vpop.f32.mrf.mxu1  ;;  %v1329_v61 = vadd.f32 %v1328_v63, %v1160_v30 }
 0x2ab   :  { %v4398_v27 = vpop.eup %4397  ;;  %1424 = vmatmul.bf16.gmra.mxu0 %v5419_v55  ;;  %v1555_v49 = vadd.f32 %v1554_v11, %v1386_v44 }
 0x2ac   :  { %4401 = vtanh.f32 %v1329_v61  ;;  %1593 = vmatmul.bf16.gmra.mxu1 %v5424_v57  ;;  %2107 = vmatmul.bf16.vlgmr.msrb.gmra.mxu2 %v5444_v23  ;;  %v6010_v41 = vpack.c.bf16 %v4398_v27, %v4396_v60  ;;  %v4400_v20 = vpop.eup %4399 }
 0x2ad   :  { %4403 = vtanh.f32 %v1555_v49 }
 0x2ae   :  { %2276 = vmatmul.bf16.vlgmr.msrb.gmra.mxu3 %v6010_v41 }
 0x2af   :  { %v1162_v56 = vpop.f32.mrf.mxu2 }
 0x2b0   :  { %v1163_v33 = vadd.f32 %v1162_v56, %v5404_v22  ;;  %v1387_v50 = vpop.f32.mrf.mxu0 }
 0x2b1   :  { %v1331_v2 = vpop.f32.mrf.mxu3  ;;  %v1388_v55 = vadd.f32 %v1387_v50, %v5990_v9  ;;  %v3795_v50 = vld [vmem:[%s6950_s5 + $0x48] sm:$0xf0] }
 0x2b2   :  { %v1556_v25 = vpop.f32.mrf.mxu1  ;;  %v4402_v43 = vpop.eup %4401  ;;  %v1332_v5 = vadd.f32 %v1331_v2, %v1163_v33  ;;  %v4003_v33 = vld [vmem:[%s6950_s5 + $0x44] sm:$0xf] }
 0x2b3   :  { %v1557_v45 = vadd.f32 %v1556_v25, %v1388_v55  ;;  %v6015_v57 = vpack.c.bf16 %v4402_v43, %v4400_v20  ;;  %v4404_v61 = vpop.eup %4403  ;;  %v3798_v20 = vor.u32 %v4003_v33, %v3795_v50 }
 0x2b5   :  { %4405 = vtanh.f32 %v1557_v45  ;;  %2440 = vmatpush.bf16.msra.mxu0 %v3798_v20 }
 0x2b6   :  { %4407 = vtanh.f32 %v1332_v5 }
 0x2b7   :  { %v1164_v30 = vpop.f32.mrf.mxu2 }
 0x2b8   :  { %v1165_v52 = vadd.f32 %v1164_v30, %v5404_v22  ;;  %v1390_v63 = vpop.f32.mrf.mxu0 }
 0x2b9   :  { %v1333_v11 = vpop.f32.mrf.mxu3  ;;  %v1391_v56 = vadd.f32 %v1390_v63, %v5990_v9 }
 0x2ba   :  { %v1559_v60 = vpop.f32.mrf.mxu1  ;;  %v1334_v27 = vadd.f32 %v1333_v11, %v1165_v52 }
 0x2bb   :  { %v4406_v44 = vpop.eup %4405  ;;  %1429 = vmatmul.bf16.gmra.mxu0 %v5453_v42  ;;  %v4019_v42 = vld [vmem:[%s6950_s5 + $0xc4] sm:$0xf]  ;;  %v1560_v25 = vadd.f32 %v1559_v60, %v1391_v56 }
 0x2bc   :  { %4409 = vtanh.f32 %v1334_v27  ;;  %1598 = vmatmul.bf16.gmra.mxu1 %v5458_v46  ;;  %2112 = vmatmul.bf16.gmra.mxu2 %v5478_v13  ;;  %v6022_v49 = vpack.c.bf16 %v4406_v44, %v4404_v61  ;;  %v3859_v46 = vld [vmem:[%s6950_s5 + $0xc8] sm:$0xf0]  ;;  %v4408_v45 = vpop.eup %4407 }
 0x2bd   :  { %v3862_v55 = vor.u32 %v4019_v42, %v3859_v46  ;;  %4411 = vtanh.f32 %v1560_v25 }
 0x2be   :  { %2281 = vmatmul.bf16.gmra.mxu3 %v6022_v49 }
 0x2bf   :  { %v1167_v2 = vpop.f32.mrf.mxu2  ;;  %2609 = vmatpush.bf16.msra.mxu1 %v3862_v55 }
 0x2c0   :  { %v1168_v43 = vadd.f32 %v1167_v2, %v5404_v22  ;;  %v1392_v5 = vpop.f32.mrf.mxu0 }
 0x2c1   :  { %v1336_v30 = vpop.f32.mrf.mxu3  ;;  %v1393_v52 = vadd.f32 %v1392_v5, %v5990_v9  ;;  %v4041_v5 = vld [vmem:[%s6952_s7 + $0x70] sm:$0xff] }
 0x2c2   :  { %v1561_v63 = vpop.f32.mrf.mxu1  ;;  %v4410_v11 = vpop.eup %4409  ;;  %v1337_v61 = vadd.f32 %v1336_v30, %v1168_v43  ;;  %v4033_v43 = vld [vmem:[%s6952_s7 + $0x30] sm:$0xff]  ;;  %3269 = vmatpush.bf16.msra.mxu3 %v4041_v5 }
 0x2c3   :  { %v1562_v27 = vadd.f32 %v1561_v63, %v1393_v52  ;;  %v6039_v44 = vpack.c.bf16 %v4410_v11, %v4408_v45  ;;  %v4412_v20 = vpop.eup %4411  ;;  %3100 = vmatpush.bf16.msra.mxu2 %v4033_v43 }
 0x2c5   :  { %4413 = vtanh.f32 %v1562_v27 }
 0x2c6   :  { %4415 = vtanh.f32 %v1337_v61 }
 0x2c7   :  { %v1169_v33 = vpop.f32.mrf.mxu2 }
 0x2c8   :  { %v1170_v60 = vadd.f32 %v1169_v33, %v5404_v22  ;;  %v1395_v56 = vpop.f32.mrf.mxu0 }
 0x2c9   :  { %v1338_v50 = vpop.f32.mrf.mxu3  ;;  %v1396_v55 = vadd.f32 %v1395_v56, %v5990_v9 }
 0x2ca   :  { %v1564_v42 = vpop.f32.mrf.mxu1  ;;  %v1339_v46 = vadd.f32 %v1338_v50, %v1170_v60 }
 0x2cb   :  { %v4414_v2 = vpop.eup %4413  ;;  %1434 = vmatmul.bf16.gmra.mxu0 %v5487_v36  ;;  %v1565_v45 = vadd.f32 %v1564_v42, %v1396_v55 }
 0x2cc   :  { %4417 = vtanh.f32 %v1339_v46  ;;  %1603 = vmatmul.bf16.gmra.mxu1 %v5492_v38  ;;  %2117 = vmatmul.bf16.gmra.mxu2 %v5500_v59  ;;  %v6046_v25 = vpack.c.bf16 %v4414_v2, %v4412_v20  ;;  %v4416_v52 = vpop.eup %4415 }
 0x2cd   :  { %4419 = vtanh.f32 %v1565_v45 }
 0x2ce   :  { %2286 = vmatmul.bf16.gmra.mxu3 %v6046_v25 }
 0x2cf   :  { %v1172_v36 = vpop.f32.mrf.mxu2 }
 0x2d0   :  { %v1173_v30 = vadd.f32 %v1172_v36, %v5404_v22  ;;  %v1397_v38 = vpop.f32.mrf.mxu0 }
 0x2d1   :  { %v1341_v63 = vpop.f32.mrf.mxu3  ;;  %v1398_v11 = vadd.f32 %v1397_v38, %v5990_v9 }
 0x2d2   :  { %v1566_v61 = vpop.f32.mrf.mxu1  ;;  %v4418_v27 = vpop.eup %4417  ;;  %v1342_v33 = vadd.f32 %v1341_v63, %v1173_v30 }
 0x2d3   :  { %v1567_v60 = vadd.f32 %v1566_v61, %v1398_v11  ;;  %v6057_v56 = vpack.c.bf16 %v4418_v27, %v4416_v52  ;;  %v4420_v55 = vpop.eup %4419 }
 0x2d5   :  { %4421 = vtanh.f32 %v1567_v60 }
 0x2d6   :  { %4423 = vtanh.f32 %v1342_v33 }
 0x2d7   :  { %v1174_v50 = vpop.f32.mrf.mxu2 }
 0x2d8   :  { %v1175_v20 = vadd.f32 %v1174_v50, %v5404_v22  ;;  %v1400_v42 = vpop.f32.mrf.mxu0 }
 0x2d9   :  { %v1343_v46 = vpop.f32.mrf.mxu3  ;;  %v1401_v36 = vadd.f32 %v1400_v42, %v5990_v9 }
 0x2da   :  { %v1569_v2 = vpop.f32.mrf.mxu1  ;;  %v1344_v43 = vadd.f32 %v1343_v46, %v1175_v20 }
 0x2db   :  { %v4422_v5 = vpop.eup %4421  ;;  %1439 = vmatmul.bf16.gmra.mxu0 %v5509_v17  ;;  %v1570_v38 = vadd.f32 %v1569_v2, %v1401_v36 }
 0x2dc   :  { %4425 = vtanh.f32 %v1344_v43  ;;  %1608 = vmatmul.bf16.gmra.mxu1 %v5514_v19  ;;  %2122 = vmatmul.bf16.gmra.mxu2 %v5522_v48  ;;  %v6064_v45 = vpack.c.bf16 %v4422_v5, %v4420_v55  ;;  %v4424_v11 = vpop.eup %4423 }
 0x2dd   :  { %4427 = vtanh.f32 %v1570_v38 }
 0x2de   :  { %2291 = vmatmul.bf16.gmra.mxu3 %v6064_v45 }
 0x2df   :  { %v1177_v30 = vpop.f32.mrf.mxu2 }
 0x2e0   :  { %v1178_v52 = vadd.f32 %v1177_v30, %v5404_v22  ;;  %v1402_v63 = vpop.f32.mrf.mxu0 }
 0x2e1   :  { %v1346_v61 = vpop.f32.mrf.mxu3  ;;  %v1403_v17 = vadd.f32 %v1402_v63, %v5990_v9 }
 0x2e2   :  { %v1571_v27 = vpop.f32.mrf.mxu1  ;;  %v4426_v33 = vpop.eup %4425  ;;  %v1347_v60 = vadd.f32 %v1346_v61, %v1178_v52 }
 0x2e3   :  { %v1572_v50 = vadd.f32 %v1571_v27, %v1403_v17  ;;  %v6069_v19 = vpack.c.bf16 %v4426_v33, %v4424_v11  ;;  %v4428_v43 = vpop.eup %4427 }
 0x2e5   :  { %4429 = vtanh.f32 %v1572_v50 }
 0x2e6   :  { %4431 = vtanh.f32 %v1347_v60 }
 0x2e7   :  { %v1179_v20 = vpop.f32.mrf.mxu2 }
 0x2e8   :  { %v1180_v42 = vadd.f32 %v1179_v20, %v5404_v22  ;;  %v1405_v46 = vpop.f32.mrf.mxu0 }
 0x2e9   :  { %v1348_v2 = vpop.f32.mrf.mxu3  ;;  %v1406_v30 = vadd.f32 %v1405_v46, %v5990_v9 }
 0x2ea   :  { %v1574_v55 = vpop.f32.mrf.mxu1  ;;  %v1349_v5 = vadd.f32 %v1348_v2, %v1180_v42 }
 0x2eb   :  { %v4430_v36 = vpop.eup %4429  ;;  %1444 = vmatmul.bf16.gmra.mxu0 %v5531_v8  ;;  %v1575_v63 = vadd.f32 %v1574_v55, %v1406_v30 }
 0x2ec   :  { %4433 = vtanh.f32 %v1349_v5  ;;  %1613 = vmatmul.bf16.gmra.mxu1 %v5536_v12  ;;  %2127 = vmatmul.bf16.gmra.mxu2 %v5556_v53  ;;  %v6076_v38 = vpack.c.bf16 %v4430_v36, %v4428_v43  ;;  %v4432_v17 = vpop.eup %4431 }
 0x2ed   :  { %4435 = vtanh.f32 %v1575_v63 }
 0x2ee   :  { %2296 = vmatmul.bf16.gmra.mxu3 %v6076_v38 }
 0x2ef   :  { %v1182_v52 = vpop.f32.mrf.mxu2 }
 0x2f0   :  { %v1183_v11 = vadd.f32 %v1182_v52, %v5404_v22  ;;  %v1407_v61 = vpop.f32.mrf.mxu0 }
 0x2f1   :  { %v1351_v27 = vpop.f32.mrf.mxu3  ;;  %v1408_v8 = vadd.f32 %v1407_v61, %v5990_v9  ;;  %v3787_v61 = vld [vmem:[%s6950_s5 + $0x38] sm:$0xf0] }
 0x2f2   :  { %v1576_v33 = vpop.f32.mrf.mxu1  ;;  %v4434_v60 = vpop.eup %4433  ;;  %v1352_v50 = vadd.f32 %v1351_v27, %v1183_v11  ;;  %v4001_v11 = vld [vmem:[%s6950_s5 + $0x34] sm:$0xf] }
 0x2f3   :  { %v1577_v20 = vadd.f32 %v1576_v33, %v1408_v8  ;;  %v6081_v12 = vpack.c.bf16 %v4434_v60, %v4432_v17  ;;  %v4436_v5 = vpop.eup %4435  ;;  %v3790_v17 = vor.u32 %v4001_v11, %v3787_v61 }
 0x2f5   :  { %4437 = vtanh.f32 %v1577_v20  ;;  %2441 = vmatpush.bf16.msra.mxu0 %v3790_v17 }
 0x2f6   :  { %4439 = vtanh.f32 %v1352_v50 }
 0x2f7   :  { %v1184_v42 = vpop.f32.mrf.mxu2 }
 0x2f8   :  { %v1185_v46 = vadd.f32 %v1184_v42, %v5404_v22  ;;  %v1410_v2 = vpop.f32.mrf.mxu0 }
 0x2f9   :  { %v1353_v55 = vpop.f32.mrf.mxu3  ;;  %v1411_v52 = vadd.f32 %v1410_v2, %v5990_v9 }
 0x2fa   :  { %v1579_v43 = vpop.f32.mrf.mxu1  ;;  %v1354_v36 = vadd.f32 %v1353_v55, %v1185_v46 }
 0x2fb   :  { %v4438_v30 = vpop.eup %4437  ;;  %1449 = vmatmul.bf16.gmra.mxu0 %v5565_v16  ;;  %v4017_v16 = vld [vmem:[%s6950_s5 + $0xb4] sm:$0xf]  ;;  %v1580_v33 = vadd.f32 %v1579_v43, %v1411_v52 }
 0x2fc   :  { %4441 = vtanh.f32 %v1354_v36  ;;  %1618 = vmatmul.bf16.gmra.mxu1 %v5570_v24  ;;  %2132 = vmatmul.bf16.gmra.mxu2 %v5590_v0  ;;  %v6088_v63 = vpack.c.bf16 %v4438_v30, %v4436_v5  ;;  %v3851_v24 = vld [vmem:[%s6950_s5 + $0xb8] sm:$0xf0]  ;;  %v4440_v20 = vpop.eup %4439 }
 0x2fd   :  { %v3854_v8 = vor.u32 %v4017_v16, %v3851_v24  ;;  %4443 = vtanh.f32 %v1580_v33 }
 0x2fe   :  { %2301 = vmatmul.bf16.gmra.mxu3 %v6088_v63 }
 0x2ff   :  { %v1187_v27 = vpop.f32.mrf.mxu2  ;;  %2610 = vmatpush.bf16.msra.mxu1 %v3854_v8 }
 0x300   :  { %v1188_v60 = vadd.f32 %v1187_v27, %v5404_v22  ;;  %v1412_v50 = vpop.f32.mrf.mxu0 }
 0x301   :  { %v1356_v42 = vpop.f32.mrf.mxu3  ;;  %v1413_v46 = vadd.f32 %v1412_v50, %v5990_v9  ;;  %v4040_v50 = vld [vmem:[%s6952_s7 + $0x68] sm:$0xff] }
 0x302   :  { %v1581_v2 = vpop.f32.mrf.mxu1  ;;  %v4442_v55 = vpop.eup %4441  ;;  %v1357_v5 = vadd.f32 %v1356_v42, %v1188_v60  ;;  %v4032_v60 = vld [vmem:[%s6952_s7 + $0x28] sm:$0xff]  ;;  %3270 = vmatpush.bf16.msra.mxu3 %v4040_v50 }
 0x303   :  { %v1582_v36 = vadd.f32 %v1581_v2, %v1413_v46  ;;  %v6105_v30 = vpack.c.bf16 %v4442_v55, %v4440_v20  ;;  %v4444_v17 = vpop.eup %4443  ;;  %3101 = vmatpush.bf16.msra.mxu2 %v4032_v60 }
 0x305   :  { %4445 = vtanh.f32 %v1582_v36 }
 0x306   :  { %4447 = vtanh.f32 %v1357_v5 }
 0x307   :  { %v1189_v11 = vpop.f32.mrf.mxu2 }
 0x308   :  { %v1190_v43 = vadd.f32 %v1189_v11, %v5404_v22  ;;  %v1415_v52 = vpop.f32.mrf.mxu0 }
 0x309   :  { %v1358_v61 = vpop.f32.mrf.mxu3  ;;  %v1416_v8 = vadd.f32 %v1415_v52, %v5990_v9 }
 0x30a   :  { %v1584_v16 = vpop.f32.mrf.mxu1  ;;  %v1359_v24 = vadd.f32 %v1358_v61, %v1190_v43 }
 0x30b   :  { %v4446_v27 = vpop.eup %4445  ;;  %1454 = vmatmul.bf16.gmra.mxu0 %v5599_v37  ;;  %v1585_v20 = vadd.f32 %v1584_v16, %v1416_v8 }
 0x30c   :  { %4449 = vtanh.f32 %v1359_v24  ;;  %1623 = vmatmul.bf16.gmra.mxu1 %v5604_v40  ;;  %2137 = vmatmul.bf16.gmra.mxu2 %v5612_v7  ;;  %v6112_v33 = vpack.c.bf16 %v4446_v27, %v4444_v17  ;;  %v4448_v46 = vpop.eup %4447 }
 0x30d   :  { %4451 = vtanh.f32 %v1585_v20 }
 0x30e   :  { %2306 = vmatmul.bf16.gmra.mxu3 %v6112_v33 }
 0x30f   :  { %v1192_v37 = vpop.f32.mrf.mxu2 }
 0x310   :  { %v1193_v42 = vadd.f32 %v1192_v37, %v5404_v22  ;;  %v1417_v40 = vpop.f32.mrf.mxu0 }
 0x311   :  { %v1361_v2 = vpop.f32.mrf.mxu3  ;;  %v1418_v55 = vadd.f32 %v1417_v40, %v5990_v9  ;;  %v7067_v40 = vld [vmem:[#allocation6_spill] sm:$0xff] }
 0x312   :  { %v1586_v5 = vpop.f32.mrf.mxu1  ;;  %v4450_v36 = vpop.eup %4449  ;;  %v1362_v11 = vadd.f32 %v1361_v2, %v1193_v42  ;;  %v7066_v42 = vld [vmem:[#allocation5_spill] sm:$0xff] }
 0x313   :  { %v1587_v43 = vadd.f32 %v1586_v5, %v1418_v55  ;;  %v6123_v52 = vpack.c.bf16 %v4450_v36, %v4448_v46  ;;  %v4452_v8 = vpop.eup %4451 }
 0x315   :  { %7065 = vst [vmem:[#allocation37_spill] sm:$0xff] %v6123_v52  ;;  %4453 = vtanh.f32 %v1587_v43 }
 0x316   :  { %4455 = vtanh.f32 %v1362_v11 }
 0x317   :  { %v1194_v61 = vpop.f32.mrf.mxu2 }
 0x318   :  { %v1195_v17 = vadd.f32 %v1194_v61, %v5404_v22  ;;  %v1420_v16 = vpop.f32.mrf.mxu0 }
 0x319   :  { %v1363_v24 = vpop.f32.mrf.mxu3  ;;  %v1421_v37 = vadd.f32 %v1420_v16, %v5990_v9 }
 0x31a   :  { %v1589_v27 = vpop.f32.mrf.mxu1  ;;  %v1364_v60 = vadd.f32 %v1363_v24, %v1195_v17 }
 0x31b   :  { %v4454_v50 = vpop.eup %4453  ;;  %1459 = vmatmul.bf16.gmra.mxu0 %v5621_v47  ;;  %v1590_v2 = vadd.f32 %v1589_v27, %v1421_v37 }
 0x31c   :  { %4457 = vtanh.f32 %v1364_v60  ;;  %1628 = vmatmul.bf16.gmra.mxu1 %v7066_v42  ;;  %2142 = vmatmul.bf16.gmra.mxu2 %v7067_v40  ;;  %v6130_v20 = vpack.c.bf16 %v4454_v50, %v4452_v8  ;;  %v4456_v36 = vpop.eup %4455  ;;  %v1933_v42 = vld [vmem:[%s6951_s6] sm:$0x3] }
 0x31d   :  { %4459 = vtanh.f32 %v1590_v2 }
 0x31e   :  { %7068 = vst [vmem:[#allocation5_spill] sm:$0xff] %v6130_v20  ;;  %2311 = vmatmul.bf16.gmra.mxu3 %v6130_v20 }
 0x31f   :  { %v1197_v46 = vpop.f32.mrf.mxu2 }
 0x320   :  { %v1198_v55 = vadd.f32 %v1197_v46, %v5404_v22  ;;  %v1422_v5 = vpop.f32.mrf.mxu0 }
 0x321   :  { %v1366_v11 = vpop.f32.mrf.mxu3  ;;  %v1423_v47 = vadd.f32 %v1422_v5, %v5990_v9 }
 0x322   :  { %v1591_v43 = vpop.f32.mrf.mxu1  ;;  %v4458_v61 = vpop.eup %4457  ;;  %v1367_v17 = vadd.f32 %v1366_v11, %v1198_v55  ;;  %v7070_v55 = vld [vmem:[#allocation7_spill] sm:$0xff]  ;;  %v7072_v11 = vld [vmem:[#allocation9_spill] sm:$0xff] }
 0x323   :  { %v1592_v16 = vadd.f32 %v1591_v43, %v1423_v47  ;;  %v6135_v24 = vpack.c.bf16 %v4458_v61, %v4456_v36  ;;  %v4460_v46 = vpop.eup %4459  ;;  %v7071_v36 = vld [vmem:[#allocation8_spill] sm:$0xff]  ;;  %v6147_v47 = vperm.slane %v1933_v42, 0 }
 0x325   :  { %7069 = vst [vmem:[#allocation38_spill] sm:$0xff] %v6135_v24  ;;  %4461 = vtanh.f32 %v1592_v16 }
 0x326   :  { %4463 = vtanh.f32 %v1367_v17 }
 0x327   :  { %v1199_v8 = vpop.f32.mrf.mxu2 }
 0x328   :  { %v1200_v60 = vadd.f32 %v1199_v8, %v5404_v22  ;;  %v1425_v50 = vpop.f32.mrf.mxu0 }
 0x329   :  { %v1368_v27 = vpop.f32.mrf.mxu3  ;;  %v1426_v2 = vadd.f32 %v1425_v50, %v5990_v9 }
 0x32a   :  { %v1594_v37 = vpop.f32.mrf.mxu1  ;;  %v1369_v5 = vadd.f32 %v1368_v27, %v1200_v60 }
 0x32b   :  { %v4462_v20 = vpop.eup %4461  ;;  %1464 = vmatmul.bf16.gmra.mxu0 %v7070_v55  ;;  %v1595_v61 = vadd.f32 %v1594_v37, %v1426_v2 }
 0x32c   :  { %4465 = vtanh.f32 %v1369_v5  ;;  %1633 = vmatmul.bf16.gmra.mxu1 %v7071_v36  ;;  %2147 = vmatmul.bf16.gmra.mxu2 %v7072_v11  ;;  %v6145_v22 = vpack.c.bf16 %v4462_v20, %v4460_v46  ;;  %v4464_v8 = vpop.eup %4463 }
 0x32d   :  { %4467 = vtanh.f32 %v1595_v61 }
 0x32e   :  { %7073 = vst [vmem:[#allocation7_spill] sm:$0xff] %v6145_v22  ;;  %2316 = vmatmul.bf16.gmra.mxu3 %v6145_v22 }
 0x32f   :  { %v2108_v43 = vpop.f32.mrf.mxu2 }
 0x330   :  { %v2109_v16 = vadd.f32 %v2108_v43, %v6147_v47  ;;  %v1427_v17 = vpop.f32.mrf.mxu0 }
 0x331   :  { %v1428_v60 = vadd.f32 %v1427_v17, %v5990_v9  ;;  %v2277_v50 = vpop.f32.mrf.mxu3  ;;  %v7075_v17 = vld [vmem:[#allocation10_spill] sm:$0xff] }
 0x332   :  { %v1596_v27 = vpop.f32.mrf.mxu1  ;;  %v4466_v5 = vpop.eup %4465  ;;  %v2278_v55 = vadd.f32 %v2277_v50, %v2109_v16  ;;  %v7076_v16 = vld [vmem:[#allocation11_spill] sm:$0xff]  ;;  %v4015_v50 = vld [vmem:[%s6950_s5 + $0xa4] sm:$0xf] }
 0x333   :  { %v1597_v36 = vadd.f32 %v1596_v27, %v1428_v60  ;;  %v6152_v11 = vpack.c.bf16 %v4466_v5, %v4464_v8  ;;  %v4468_v43 = vpop.eup %4467  ;;  %v7077_v8 = vld [vmem:[#allocation12_spill] sm:$0xff]  ;;  %v3999_v60 = vld [vmem:[%s6950_s5 + $0x24] sm:$0xf]  ;;  %v3779_v27 = vld [vmem:[%s6950_s5 + $0x28] sm:$0xf0] }
 0x335   :  { %7074 = vst [vmem:[#allocation8_spill] sm:$0xff] %v6152_v11  ;;  %4469 = vtanh.f32 %v1597_v36 }
 0x336   :  { %4471 = vtanh.f32 %v2278_v55 }
 0x337   :  { %v2110_v20 = vpop.f32.mrf.mxu2 }
 0x338   :  { %v2111_v42 = vadd.f32 %v2110_v20, %v6147_v47  ;;  %v1430_v46 = vpop.f32.mrf.mxu0 }
 0x339   :  { %v2279_v2 = vpop.f32.mrf.mxu3  ;;  %v1431_v40 = vadd.f32 %v1430_v46, %v5990_v9 }
 0x33a   :  { %v1599_v37 = vpop.f32.mrf.mxu1  ;;  %v2280_v22 = vadd.f32 %v2279_v2, %v2111_v42 }
 0x33b   :  { %v4470_v24 = vpop.eup %4469  ;;  %1469 = vmatmul.bf16.gmra.mxu0 %v7075_v17  ;;  %v1600_v36 = vadd.f32 %v1599_v37, %v1431_v40 }
 0x33c   :  { %4473 = vtanh.f32 %v2280_v22  ;;  %1638 = vmatmul.bf16.gmra.mxu1 %v7076_v16  ;;  %2152 = vmatmul.bf16.gmra.mxu2 %v7077_v8  ;;  %v6159_v61 = vpack.c.bf16 %v4470_v24, %v4468_v43  ;;  %v3782_v22 = vor.u32 %v3999_v60, %v3779_v27  ;;  %v3843_v24 = vld [vmem:[%s6950_s5 + $0xa8] sm:$0xf0]  ;;  %v6175_v46 = vpop.eup %4471 }
 0x33d   :  { %v3846_v55 = vor.u32 %v4015_v50, %v3843_v24  ;;  %7079 = vst [vmem:[#allocation11_spill] sm:$0xff] %v6175_v46  ;;  %4475 = vtanh.f32 %v1600_v36  ;;  %v4031_v36 = vld [vmem:[%s6952_s7 + $0x20] sm:$0xff] }
 0x33e   :  { %7078 = vst [vmem:[#allocation10_spill] sm:$0xff] %v6159_v61  ;;  %2321 = vmatmul.bf16.gmra.mxu3 %v6159_v61  ;;  %2442 = vmatpush.bf16.msra.mxu0 %v3782_v22 }
 0x33f   :  { %v2113_v5 = vpop.f32.mrf.mxu2  ;;  %2611 = vmatpush.bf16.msra.mxu1 %v3846_v55  ;;  %v7081_v55 = vld [vmem:[#allocation13_spill] sm:$0xff]  ;;  %3102 = vmatpush.bf16.msra.mxu2 %v4031_v36 }
 0x340   :  { %v2114_v20 = vadd.f32 %v2113_v5, %v6147_v47  ;;  %v1432_v42 = vpop.f32.mrf.mxu0 }
 0x341   :  { %v1433_v2 = vadd.f32 %v1432_v42, %v5990_v9  ;;  %v2282_v17 = vpop.f32.mrf.mxu3 }
 0x342   :  { %v1601_v43 = vpop.f32.mrf.mxu1  ;;  %v6178_v16 = vpop.eup %4473  ;;  %v2283_v60 = vadd.f32 %v2282_v17, %v2114_v20  ;;  %v7082_v17 = vld [vmem:[#allocation14_spill] sm:$0xff] }
 0x343   :  { %7080 = vst [vmem:[#allocation39_spill] sm:$0xff] %v6178_v16  ;;  %v1602_v61 = vadd.f32 %v1601_v43, %v1433_v2  ;;  %v4476_v5 = vpop.eup %4475  ;;  %v7083_v2 = vld [vmem:[#allocation15_spill] sm:$0xff]  ;;  %v4039_v43 = vld [vmem:[%s6952_s7 + $0x60] sm:$0xff]  ;;  %v7087_v16 = vld [vmem:[#allocation16_spill] sm:$0xff] }
 0x344   :  { %3271 = vmatpush.bf16.msra.mxu3 %v4039_v43 }
 0x345   :  { %4477 = vtanh.f32 %v1602_v61 }
 0x346   :  { %4479 = vtanh.f32 %v2283_v60 }
 0x347   :  { %v2115_v40 = vpop.f32.mrf.mxu2 }
 0x348   :  { %v2116_v37 = vadd.f32 %v2115_v40, %v6147_v47  ;;  %v1435_v50 = vpop.f32.mrf.mxu0 }
 0x349   :  { %v2284_v24 = vpop.f32.mrf.mxu3  ;;  %v1436_v20 = vadd.f32 %v1435_v50, %v5990_v9 }
 0x34a   :  { %v1604_v22 = vpop.f32.mrf.mxu1  ;;  %v2285_v42 = vadd.f32 %v2284_v24, %v2116_v37 }
 0x34b   :  { %v4478_v8 = vpop.eup %4477  ;;  %1474 = vmatmul.bf16.gmra.mxu0 %v7081_v55  ;;  %v1605_v40 = vadd.f32 %v1604_v22, %v1436_v20 }
 0x34c   :  { %4481 = vtanh.f32 %v2285_v42  ;;  %1643 = vmatmul.bf16.gmra.mxu1 %v7082_v17  ;;  %2157 = vmatmul.bf16.gmra.mxu2 %v7083_v2  ;;  %v6187_v61 = vpack.c.bf16 %v4478_v8, %v4476_v5  ;;  %v6197_v24 = vpop.eup %4479 }
 0x34d   :  { %7085 = vst [vmem:[#allocation14_spill] sm:$0xff] %v6197_v24  ;;  %4483 = vtanh.f32 %v1605_v40 }
 0x34e   :  { %7084 = vst [vmem:[#allocation13_spill] sm:$0xff] %v6187_v61  ;;  %2326 = vmatmul.bf16.gmra.mxu3 %v6187_v61 }
 0x34f   :  { %v2118_v60 = vpop.f32.mrf.mxu2 }
 0x350   :  { %v2119_v37 = vadd.f32 %v2118_v60, %v6147_v47  ;;  %v1437_v50 = vpop.f32.mrf.mxu0 }
 0x351   :  { %v1438_v8 = vadd.f32 %v1437_v50, %v5990_v9  ;;  %v2287_v42 = vpop.f32.mrf.mxu3 }
 0x352   :  { %v1606_v5 = vpop.f32.mrf.mxu1  ;;  %v6200_v55 = vpop.eup %4481  ;;  %v2288_v17 = vadd.f32 %v2287_v42, %v2119_v37 }
 0x353   :  { %7086 = vst [vmem:[#allocation40_spill] sm:$0xff] %v6200_v55  ;;  %v1607_v27 = vadd.f32 %v1606_v5, %v1438_v8  ;;  %v4484_v2 = vpop.eup %4483  ;;  %v7088_v8 = vld [vmem:[#allocation17_spill] sm:$0xff]  ;;  %v7089_v5 = vld [vmem:[#allocation18_spill] sm:$0xff]  ;;  %v7093_v55 = vld [vmem:[#allocation19_spill] sm:$0xff] }
 0x355   :  { %4485 = vtanh.f32 %v1607_v27 }
 0x356   :  { %4487 = vtanh.f32 %v2288_v17 }
 0x357   :  { %v2120_v22 = vpop.f32.mrf.mxu2 }
 0x358   :  { %v2121_v20 = vadd.f32 %v2120_v22, %v6147_v47  ;;  %v1440_v36 = vpop.f32.mrf.mxu0 }
 0x359   :  { %v2289_v60 = vpop.f32.mrf.mxu3  ;;  %v1441_v37 = vadd.f32 %v1440_v36, %v5990_v9 }
 0x35a   :  { %v1609_v43 = vpop.f32.mrf.mxu1  ;;  %v2290_v46 = vadd.f32 %v2289_v60, %v2121_v20 }
 0x35b   :  { %v4486_v50 = vpop.eup %4485  ;;  %1479 = vmatmul.bf16.gmra.mxu0 %v7087_v16  ;;  %v1610_v42 = vadd.f32 %v1609_v43, %v1441_v37 }
 0x35c   :  { %4489 = vtanh.f32 %v2290_v46  ;;  %1648 = vmatmul.bf16.gmra.mxu1 %v7088_v8  ;;  %2162 = vmatmul.bf16.gmra.mxu2 %v7089_v5  ;;  %v6209_v27 = vpack.c.bf16 %v4486_v50, %v4484_v2  ;;  %v6213_v60 = vpop.eup %4487 }
 0x35d   :  { %7091 = vst [vmem:[#allocation17_spill] sm:$0xff] %v6213_v60  ;;  %4491 = vtanh.f32 %v1610_v42 }
 0x35e   :  { %7090 = vst [vmem:[#allocation16_spill] sm:$0xff] %v6209_v27  ;;  %2331 = vmatmul.bf16.gmra.mxu3 %v6209_v27 }
 0x35f   :  { %v2123_v40 = vpop.f32.mrf.mxu2 }
 0x360   :  { %v2124_v22 = vadd.f32 %v2123_v40, %v6147_v47  ;;  %v1442_v20 = vpop.f32.mrf.mxu0 }
 0x361   :  { %v1443_v16 = vadd.f32 %v1442_v20, %v5990_v9  ;;  %v2292_v36 = vpop.f32.mrf.mxu3 }
 0x362   :  { %v1611_v17 = vpop.f32.mrf.mxu1  ;;  %v6216_v46 = vpop.eup %4489  ;;  %v2293_v8 = vadd.f32 %v2292_v36, %v2124_v22 }
 0x363   :  { %7092 = vst [vmem:[#allocation41_spill] sm:$0xff] %v6216_v46  ;;  %v1612_v61 = vadd.f32 %v1611_v17, %v1443_v16  ;;  %v4492_v5 = vpop.eup %4491  ;;  %v7094_v16 = vld [vmem:[#allocation20_spill] sm:$0xff]  ;;  %v7095_v17 = vld [vmem:[#allocation21_spill] sm:$0xff]  ;;  %v7098_v46 = vld [vmem:[#allocation22_spill] sm:$0xff] }
 0x365   :  { %4493 = vtanh.f32 %v1612_v61 }
 0x366   :  { %4495 = vtanh.f32 %v2293_v8 }
 0x367   :  { %v2125_v50 = vpop.f32.mrf.mxu2 }
 0x368   :  { %v2126_v43 = vadd.f32 %v2125_v50, %v6147_v47  ;;  %v1445_v37 = vpop.f32.mrf.mxu0 }
 0x369   :  { %v2294_v27 = vpop.f32.mrf.mxu3  ;;  %v1446_v22 = vadd.f32 %v1445_v37, %v5990_v9 }
 0x36a   :  { %v1614_v40 = vpop.f32.mrf.mxu1  ;;  %v2295_v24 = vadd.f32 %v2294_v27, %v2126_v43 }
 0x36b   :  { %v4494_v20 = vpop.eup %4493  ;;  %1484 = vmatmul.bf16.gmra.mxu0 %v7093_v55  ;;  %v1615_v36 = vadd.f32 %v1614_v40, %v1446_v22 }
 0x36c   :  { %4497 = vtanh.f32 %v2295_v24  ;;  %1653 = vmatmul.bf16.gmra.mxu1 %v7094_v16  ;;  %2167 = vmatmul.bf16.gmra.mxu2 %v7095_v17  ;;  %v6225_v61 = vpack.c.bf16 %v4494_v20, %v4492_v5  ;;  %v6229_v43 = vpop.eup %4495 }
 0x36d   :  { %7097 = vst [vmem:[#allocation20_spill] sm:$0xff] %v6229_v43  ;;  %4499 = vtanh.f32 %v1615_v36  ;;  %v3997_v36 = vld [vmem:[%s6950_s5 + $0x14] sm:$0xf] }
 0x36e   :  { %7096 = vst [vmem:[#allocation19_spill] sm:$0xff] %v6225_v61  ;;  %2336 = vmatmul.bf16.gmra.mxu3 %v6225_v61 }
 0x36f   :  { %v2128_v42 = vpop.f32.mrf.mxu2 }
 0x370   :  { %v2129_v50 = vadd.f32 %v2128_v42, %v6147_v47  ;;  %v1447_v27 = vpop.f32.mrf.mxu0 }
 0x371   :  { %v1448_v55 = vadd.f32 %v1447_v27, %v5990_v9  ;;  %v2297_v37 = vpop.f32.mrf.mxu3 }
 0x372   :  { %v1616_v8 = vpop.f32.mrf.mxu1  ;;  %v6232_v24 = vpop.eup %4497  ;;  %v2298_v16 = vadd.f32 %v2297_v37, %v2129_v50 }
 0x373   :  { %v1617_v2 = vadd.f32 %v1616_v8, %v1448_v55  ;;  %v4500_v17 = vpop.eup %4499  ;;  %v7099_v55 = vld [vmem:[#allocation23_spill] sm:$0xff] }
 0x375   :  { %4501 = vtanh.f32 %v1617_v2 }
 0x376   :  { %4503 = vtanh.f32 %v2298_v16 }
 0x377   :  { %v2130_v20 = vpop.f32.mrf.mxu2 }
 0x378   :  { %v2131_v40 = vadd.f32 %v2130_v20, %v6147_v47  ;;  %v1450_v22 = vpop.f32.mrf.mxu0 }
 0x379   :  { %v2299_v61 = vpop.f32.mrf.mxu3  ;;  %v1451_v50 = vadd.f32 %v1450_v22, %v5990_v9 }
 0x37a   :  { %v1619_v42 = vpop.f32.mrf.mxu1  ;;  %v2300_v60 = vadd.f32 %v2299_v61, %v2131_v40  ;;  %v3771_v61 = vld [vmem:[%s6950_s5 + $0x18] sm:$0xf0] }
 0x37b   :  { %v4502_v27 = vpop.eup %4501  ;;  %1489 = vmatmul.bf16.gmra.mxu0 %v7098_v46  ;;  %v4013_v46 = vld [vmem:[%s6950_s5 + $0x94] sm:$0xf]  ;;  %v1620_v16 = vadd.f32 %v1619_v42, %v1451_v50 }
 0x37c   :  { %4505 = vtanh.f32 %v2300_v60  ;;  %1658 = vmatmul.bf16.gmra.mxu1 %v7099_v55  ;;  %2172 = vmatmul.bf16.gmra.mxu2 %v5814_v15  ;;  %v6241_v2 = vpack.c.bf16 %v4502_v27, %v4500_v17  ;;  %v3774_v60 = vor.u32 %v3997_v36, %v3771_v61  ;;  %v3835_v17 = vld [vmem:[%s6950_s5 + $0x98] sm:$0xf0]  ;;  %v6257_v22 = vpop.eup %4503 }
 0x37d   :  { %v3838_v37 = vor.u32 %v4013_v46, %v3835_v17  ;;  %4507 = vtanh.f32 %v1620_v16 }
 0x37e   :  { %7100 = vst [vmem:[#allocation22_spill] sm:$0xff] %v6241_v2  ;;  %2341 = vmatmul.bf16.gmra.mxu3 %v6241_v2  ;;  %2443 = vmatpush.bf16.msra.mxu0 %v3774_v60 }
 0x37f   :  { %v2133_v8 = vpop.f32.mrf.mxu2  ;;  %2612 = vmatpush.bf16.msra.mxu1 %v3838_v37  ;;  %v7101_v37 = vld [vmem:[#allocation25_spill] sm:$0xff] }
 0x380   :  { %v2134_v20 = vadd.f32 %v2133_v8, %v6147_v47  ;;  %v1452_v40 = vpop.f32.mrf.mxu0 }
 0x381   :  { %v1453_v27 = vadd.f32 %v1452_v40, %v5990_v9  ;;  %v2302_v5 = vpop.f32.mrf.mxu3 }
 0x382   :  { %v1621_v55 = vpop.f32.mrf.mxu1  ;;  %v6260_v2 = vpop.eup %4505  ;;  %v2303_v36 = vadd.f32 %v2302_v5, %v2134_v20  ;;  %v4030_v20 = vld [vmem:[%s6952_s7 + $0x18] sm:$0xff] }
 0x383   :  { %v1622_v61 = vadd.f32 %v1621_v55, %v1453_v27  ;;  %v4508_v8 = vpop.eup %4507  ;;  %v4038_v27 = vld [vmem:[%s6952_s7 + $0x58] sm:$0xff]  ;;  %3103 = vmatpush.bf16.msra.mxu2 %v4030_v20 }
 0x384   :  { %3272 = vmatpush.bf16.msra.mxu3 %v4038_v27 }
 0x385   :  { %4509 = vtanh.f32 %v1622_v61 }
 0x386   :  { %4511 = vtanh.f32 %v2303_v36 }
 0x387   :  { %v2135_v42 = vpop.f32.mrf.mxu2 }
 0x388   :  { %v2136_v50 = vadd.f32 %v2135_v42, %v6147_v47  ;;  %v1455_v46 = vpop.f32.mrf.mxu0 }
 0x389   :  { %v2304_v17 = vpop.f32.mrf.mxu3  ;;  %v1456_v5 = vadd.f32 %v1455_v46, %v5990_v9 }
 0x38a   :  { %v1624_v60 = vpop.f32.mrf.mxu1  ;;  %v2305_v40 = vadd.f32 %v2304_v17, %v2136_v50 }
 0x38b   :  { %v4510_v43 = vpop.eup %4509  ;;  %1494 = vmatmul.bf16.gmra.mxu0 %v5817_v51  ;;  %v1625_v55 = vadd.f32 %v1624_v60, %v1456_v5 }
 0x38c   :  { %4513 = vtanh.f32 %v2305_v40  ;;  %1663 = vmatmul.bf16.gmra.mxu1 %v7101_v37  ;;  %2177 = vmatmul.bf16.gmra.mxu2 %v5830_v6  ;;  %v6269_v16 = vpack.c.bf16 %v4510_v43, %v4508_v8  ;;  %v6279_v42 = vpop.eup %4511 }
 0x38d   :  { %4515 = vtanh.f32 %v1625_v55 }
 0x38e   :  { %7102 = vst [vmem:[#allocation23_spill] sm:$0xff] %v6269_v16  ;;  %2346 = vmatmul.bf16.gmra.mxu3 %v6269_v16 }
 0x38f   :  { %v2138_v51 = vpop.f32.mrf.mxu2 }
 0x390   :  { %v2139_v36 = vadd.f32 %v2138_v51, %v6147_v47  ;;  %v1457_v61 = vpop.f32.mrf.mxu0 }
 0x391   :  { %v1458_v43 = vadd.f32 %v1457_v61, %v5990_v9  ;;  %v2307_v46 = vpop.f32.mrf.mxu3 }
 0x392   :  { %v1626_v50 = vpop.f32.mrf.mxu1  ;;  %v6282_v17 = vpop.eup %4513  ;;  %v2308_v8 = vadd.f32 %v2307_v46, %v2139_v36 }
 0x393   :  { %v1627_v40 = vadd.f32 %v1626_v50, %v1458_v43  ;;  %v4516_v15 = vpop.eup %4515  ;;  %v7103_v43 = vld [vmem:[#allocation26_spill] sm:$0xff] }
 0x395   :  { %4517 = vtanh.f32 %v1627_v40 }
 0x396   :  { %4519 = vtanh.f32 %v2308_v8 }
 0x397   :  { %v2140_v60 = vpop.f32.mrf.mxu2 }
 0x398   :  { %v2141_v5 = vadd.f32 %v2140_v60, %v6147_v47  ;;  %v1460_v20 = vpop.f32.mrf.mxu0 }
 0x399   :  { %v2309_v51 = vpop.f32.mrf.mxu3  ;;  %v1461_v36 = vadd.f32 %v1460_v20, %v5990_v9 }
 0x39a   :  { %v1629_v27 = vpop.f32.mrf.mxu1  ;;  %v2310_v16 = vadd.f32 %v2309_v51, %v2141_v5 }
 0x39b   :  { %v4518_v61 = vpop.eup %4517  ;;  %1499 = vmatmul.bf16.gmra.mxu0 %v5833_v54  ;;  %v1630_v46 = vadd.f32 %v1629_v27, %v1461_v36 }
 0x39c   :  { %4521 = vtanh.f32 %v2310_v16  ;;  %1668 = vmatmul.bf16.gmra.mxu1 %v7103_v43  ;;  %2182 = vmatmul.bf16.gmra.mxu2 %v5846_v32  ;;  %v6291_v55 = vpack.c.bf16 %v4518_v61, %v4516_v15  ;;  %v6295_v5 = vpop.eup %4519 }
 0x39d   :  { %4523 = vtanh.f32 %v1630_v46 }
 0x39e   :  { %7104 = vst [vmem:[#allocation25_spill] sm:$0xff] %v6291_v55  ;;  %2351 = vmatmul.bf16.gmra.mxu3 %v6291_v55 }
 0x39f   :  { %v2143_v50 = vpop.f32.mrf.mxu2 }
 0x3a0   :  { %v2144_v40 = vadd.f32 %v2143_v50, %v6147_v47  ;;  %v1462_v60 = vpop.f32.mrf.mxu0 }
 0x3a1   :  { %v1463_v54 = vadd.f32 %v1462_v60, %v5990_v9  ;;  %v2312_v20 = vpop.f32.mrf.mxu3 }
 0x3a2   :  { %v1631_v8 = vpop.f32.mrf.mxu1  ;;  %v6298_v16 = vpop.eup %4521  ;;  %v2313_v51 = vadd.f32 %v2312_v20, %v2144_v40 }
 0x3a3   :  { %v1632_v43 = vadd.f32 %v1631_v8, %v1463_v54  ;;  %v4524_v55 = vpop.eup %4523  ;;  %v7105_v54 = vld [vmem:[#allocation28_spill] sm:$0xff] }
 0x3a5   :  { %4525 = vtanh.f32 %v1632_v43 }
 0x3a6   :  { %4527 = vtanh.f32 %v2313_v51 }
 0x3a7   :  { %v2145_v61 = vpop.f32.mrf.mxu2 }
 0x3a8   :  { %v2146_v27 = vadd.f32 %v2145_v61, %v6147_v47  ;;  %v1465_v36 = vpop.f32.mrf.mxu0 }
 0x3a9   :  { %v2314_v37 = vpop.f32.mrf.mxu3  ;;  %v1466_v40 = vadd.f32 %v1465_v36, %v5990_v9 }
 0x3aa   :  { %v1634_v50 = vpop.f32.mrf.mxu1  ;;  %v2315_v32 = vadd.f32 %v2314_v37, %v2146_v27 }
 0x3ab   :  { %v4526_v60 = vpop.eup %4525  ;;  %1504 = vmatmul.bf16.gmra.mxu0 %v5849_v18  ;;  %v1635_v20 = vadd.f32 %v1634_v50, %v1466_v40 }
 0x3ac   :  { %4529 = vtanh.f32 %v2315_v32  ;;  %1673 = vmatmul.bf16.gmra.mxu1 %v7105_v54  ;;  %2187 = vmatmul.bf16.gmra.mxu2 %v5874_v1  ;;  %v6307_v46 = vpack.c.bf16 %v4526_v60, %v4524_v55  ;;  %v6311_v61 = vpop.eup %4527 }
 0x3ad   :  { %7107 = vst [vmem:[#allocation28_spill] sm:$0xff] %v6311_v61  ;;  %4531 = vtanh.f32 %v1635_v20 }
 0x3ae   :  { %7106 = vst [vmem:[#allocation26_spill] sm:$0xff] %v6307_v46  ;;  %2356 = vmatmul.bf16.gmra.mxu3 %v6307_v46 }
 0x3af   :  { %v2148_v8 = vpop.f32.mrf.mxu2 }
 0x3b0   :  { %v2149_v43 = vadd.f32 %v2148_v8, %v6147_v47  ;;  %v1467_v37 = vpop.f32.mrf.mxu0 }
 0x3b1   :  { %v1468_v18 = vadd.f32 %v1467_v37, %v5990_v9  ;;  %v2317_v27 = vpop.f32.mrf.mxu3 }
 0x3b2   :  { %v1636_v51 = vpop.f32.mrf.mxu1  ;;  %v6314_v32 = vpop.eup %4529  ;;  %v2318_v36 = vadd.f32 %v2317_v27, %v2149_v43 }
 0x3b3   :  { %v1637_v54 = vadd.f32 %v1636_v51, %v1468_v18  ;;  %v4532_v46 = vpop.eup %4531  ;;  %v7108_v18 = vld [vmem:[#allocation30_spill] sm:$0xff]  ;;  %v3995_v51 = vld [vmem:[%s6950_s5 + $0x4] sm:$0xf] }
 0x3b5   :  { %4533 = vtanh.f32 %v1637_v54 }
 0x3b6   :  { %4535 = vtanh.f32 %v2318_v36 }
 0x3b7   :  { %v2150_v60 = vpop.f32.mrf.mxu2 }
 0x3b8   :  { %v2151_v50 = vadd.f32 %v2150_v60, %v6147_v47  ;;  %v1470_v40 = vpop.f32.mrf.mxu0 }
 0x3b9   :  { %v2319_v15 = vpop.f32.mrf.mxu3  ;;  %v1471_v43 = vadd.f32 %v1470_v40, %v5990_v9 }
 0x3ba   :  { %v1639_v8 = vpop.f32.mrf.mxu1  ;;  %v2320_v1 = vadd.f32 %v2319_v15, %v2151_v50  ;;  %v3763_v15 = vld [vmem:[%s6950_s5 + $0x8] sm:$0xf0] }
 0x3bb   :  { %v4534_v37 = vpop.eup %4533  ;;  %1509 = vmatmul.bf16.gmra.mxu0 %v5877_v35  ;;  %v4011_v35 = vld [vmem:[%s6950_s5 + $0x84] sm:$0xf]  ;;  %v1640_v54 = vadd.f32 %v1639_v8, %v1471_v43 }
 0x3bc   :  { %4537 = vtanh.f32 %v2320_v1  ;;  %1678 = vmatmul.bf16.gmra.mxu1 %v7108_v18  ;;  %2192 = vmatmul.bf16.gmra.mxu2 %v5902_v10  ;;  %v6323_v20 = vpack.c.bf16 %v4534_v37, %v4532_v46  ;;  %v3766_v1 = vor.u32 %v3995_v51, %v3763_v15  ;;  %v3827_v46 = vld [vmem:[%s6950_s5 + $0x88] sm:$0xf0]  ;;  %v6339_v40 = vpop.eup %4535 }
 0x3bd   :  { %v3830_v36 = vor.u32 %v4011_v35, %v3827_v46  ;;  %4539 = vtanh.f32 %v1640_v54 }
 0x3be   :  { %7109 = vst [vmem:[#allocation30_spill] sm:$0xff] %v6323_v20  ;;  %2361 = vmatmul.bf16.gmra.mxu3 %v6323_v20  ;;  %2444 = vmatpush.bf16.msra.mxu0 %v3766_v1 }
 0x3bf   :  { %v2153_v27 = vpop.f32.mrf.mxu2  ;;  %2613 = vmatpush.bf16.msra.mxu1 %v3830_v36  ;;  %v7110_v36 = vld [vmem:[#allocation32_spill] sm:$0xff] }
 0x3c0   :  { %v2154_v60 = vadd.f32 %v2153_v27, %v6147_v47  ;;  %v1472_v50 = vpop.f32.mrf.mxu0 }
 0x3c1   :  { %v1473_v37 = vadd.f32 %v1472_v50, %v5990_v9  ;;  %v2322_v55 = vpop.f32.mrf.mxu3 }
 0x3c2   :  { %v1641_v18 = vpop.f32.mrf.mxu1  ;;  %v6342_v20 = vpop.eup %4537  ;;  %v2323_v51 = vadd.f32 %v2322_v55, %v2154_v60  ;;  %v4029_v60 = vld [vmem:[%s6952_s7 + $0x10] sm:$0xff] }
 0x3c3   :  { %v1642_v15 = vadd.f32 %v1641_v18, %v1473_v37  ;;  %v4540_v27 = vpop.eup %4539  ;;  %v4037_v37 = vld [vmem:[%s6952_s7 + $0x50] sm:$0xff]  ;;  %3104 = vmatpush.bf16.msra.mxu2 %v4029_v60 }
 0x3c4   :  { %3273 = vmatpush.bf16.msra.mxu3 %v4037_v37 }
 0x3c5   :  { %4541 = vtanh.f32 %v1642_v15 }
 0x3c6   :  { %4543 = vtanh.f32 %v2323_v51 }
 0x3c7   :  { %v2155_v8 = vpop.f32.mrf.mxu2 }
 0x3c8   :  { %v2156_v43 = vadd.f32 %v2155_v8, %v6147_v47  ;;  %v1475_v35 = vpop.f32.mrf.mxu0 }
 0x3c9   :  { %v2324_v46 = vpop.f32.mrf.mxu3  ;;  %v1476_v55 = vadd.f32 %v1475_v35, %v5990_v9 }
 0x3ca   :  { %v1644_v1 = vpop.f32.mrf.mxu1  ;;  %v2325_v50 = vadd.f32 %v2324_v46, %v2156_v43 }
 0x3cb   :  { %v4542_v61 = vpop.eup %4541  ;;  %1514 = vmatmul.bf16.gmra.mxu0 %v5905_v26  ;;  %v1645_v18 = vadd.f32 %v1644_v1, %v1476_v55 }
 0x3cc   :  { %4545 = vtanh.f32 %v2325_v50  ;;  %1683 = vmatmul.bf16.gmra.mxu1 %v7110_v36  ;;  %2197 = vmatmul.bf16.gmra.mxu2 %v5918_v39  ;;  %v6351_v54 = vpack.c.bf16 %v4542_v61, %v4540_v27  ;;  %v6361_v8 = vpop.eup %4543 }
 0x3cd   :  { %4547 = vtanh.f32 %v1645_v18 }
 0x3ce   :  { %7111 = vst [vmem:[#allocation32_spill] sm:$0xff] %v6351_v54  ;;  %2366 = vmatmul.bf16.gmra.mxu3 %v6351_v54 }
 0x3cf   :  { %v2158_v26 = vpop.f32.mrf.mxu2 }
 0x3d0   :  { %v2159_v51 = vadd.f32 %v2158_v26, %v6147_v47  ;;  %v1477_v15 = vpop.f32.mrf.mxu0 }
 0x3d1   :  { %v1478_v61 = vadd.f32 %v1477_v15, %v5990_v9  ;;  %v2327_v35 = vpop.f32.mrf.mxu3 }
 0x3d2   :  { %v1646_v43 = vpop.f32.mrf.mxu1  ;;  %v6364_v46 = vpop.eup %4545  ;;  %v2328_v27 = vadd.f32 %v2327_v35, %v2159_v51 }
 0x3d3   :  { %v1647_v50 = vadd.f32 %v1646_v43, %v1478_v61  ;;  %v4548_v10 = vpop.eup %4547  ;;  %v7112_v61 = vld [vmem:[#allocation33_spill] sm:$0xff] }
 0x3d5   :  { %4549 = vtanh.f32 %v1647_v50 }
 0x3d6   :  { %4551 = vtanh.f32 %v2328_v27 }
 0x3d7   :  { %v2160_v1 = vpop.f32.mrf.mxu2 }
 0x3d8   :  { %v2161_v55 = vadd.f32 %v2160_v1, %v6147_v47  ;;  %v1480_v60 = vpop.f32.mrf.mxu0 }
 0x3d9   :  { %v2329_v26 = vpop.f32.mrf.mxu3  ;;  %v1481_v51 = vadd.f32 %v1480_v60, %v5990_v9 }
 0x3da   :  { %v1649_v37 = vpop.f32.mrf.mxu1  ;;  %v2330_v54 = vadd.f32 %v2329_v26, %v2161_v55 }
 0x3db   :  { %v4550_v15 = vpop.eup %4549  ;;  %1519 = vmatmul.bf16.gmra.mxu0 %v5921_v58  ;;  %v1650_v35 = vadd.f32 %v1649_v37, %v1481_v51 }
 0x3dc   :  { %4553 = vtanh.f32 %v2330_v54  ;;  %1688 = vmatmul.bf16.gmra.mxu1 %v7112_v61  ;;  %2202 = vmatmul.bf16.gmra.mxu2 %v5934_v31  ;;  %v6373_v18 = vpack.c.bf16 %v4550_v15, %v4548_v10  ;;  %v6377_v55 = vpop.eup %4551 }
 0x3dd   :  { %4555 = vtanh.f32 %v1650_v35 }
 0x3de   :  { %7113 = vst [vmem:[#allocation33_spill] sm:$0xff] %v6373_v18  ;;  %2371 = vmatmul.bf16.gmra.mxu3 %v6373_v18 }
 0x3df   :  { %v2163_v43 = vpop.f32.mrf.mxu2 }
 0x3e0   :  { %v2164_v50 = vadd.f32 %v2163_v43, %v6147_v47  ;;  %v1482_v1 = vpop.f32.mrf.mxu0 }
 0x3e1   :  { %v1483_v58 = vadd.f32 %v1482_v1, %v5990_v9  ;;  %v2332_v60 = vpop.f32.mrf.mxu3 }
 0x3e2   :  { %v1651_v27 = vpop.f32.mrf.mxu1  ;;  %v6380_v54 = vpop.eup %4553  ;;  %v2333_v26 = vadd.f32 %v2332_v60, %v2164_v50 }
 0x3e3   :  { %v1652_v61 = vadd.f32 %v1651_v27, %v1483_v58  ;;  %v4556_v18 = vpop.eup %4555  ;;  %v7114_v58 = vld [vmem:[#allocation35_spill] sm:$0xff] }
 0x3e5   :  { %4557 = vtanh.f32 %v1652_v61 }
 0x3e6   :  { %4559 = vtanh.f32 %v2333_v26 }
 0x3e7   :  { %v2165_v15 = vpop.f32.mrf.mxu2 }
 0x3e8   :  { %v2166_v37 = vadd.f32 %v2165_v15, %v6147_v47  ;;  %v1485_v51 = vpop.f32.mrf.mxu0 }
 0x3e9   :  { %v2334_v36 = vpop.f32.mrf.mxu3  ;;  %v1486_v50 = vadd.f32 %v1485_v51, %v5990_v9 }
 0x3ea   :  { %v1654_v43 = vpop.f32.mrf.mxu1  ;;  %v2335_v31 = vadd.f32 %v2334_v36, %v2166_v37 }
 0x3eb   :  { %v4558_v1 = vpop.eup %4557  ;;  %1524 = vmatmul.bf16.gmra.mxu0 %v5937_v28  ;;  %v1655_v60 = vadd.f32 %v1654_v43, %v1486_v50 }
 0x3ec   :  { %4561 = vtanh.f32 %v2335_v31  ;;  %1693 = vmatmul.bf16.gmra.mxu1 %v7114_v58  ;;  %2207 = vmatmul.bf16.gmra.mxu2 %v5962_v3  ;;  %v6389_v35 = vpack.c.bf16 %v4558_v1, %v4556_v18  ;;  %v6393_v15 = vpop.eup %4559 }
 0x3ed   :  { %4563 = vtanh.f32 %v1655_v60 }
 0x3ee   :  { %7115 = vst [vmem:[#allocation35_spill] sm:$0xff] %v6389_v35  ;;  %2376 = vmatmul.bf16.gmra.mxu3 %v6389_v35 }
 0x3ef   :  { %v2168_v27 = vpop.f32.mrf.mxu2 }
 0x3f0   :  { %v2169_v61 = vadd.f32 %v2168_v27, %v6147_v47  ;;  %v1487_v36 = vpop.f32.mrf.mxu0 }
 0x3f1   :  { %v1488_v28 = vadd.f32 %v1487_v36, %v5990_v9  ;;  %v2337_v37 = vpop.f32.mrf.mxu3 }
 0x3f2   :  { %v1656_v26 = vpop.f32.mrf.mxu1  ;;  %v6396_v31 = vpop.eup %4561  ;;  %v2338_v51 = vadd.f32 %v2337_v37, %v2169_v61 }
 0x3f3   :  { %v1657_v58 = vadd.f32 %v1656_v26, %v1488_v28  ;;  %v4564_v35 = vpop.eup %4563 }
 0x3f5   :  { %4565 = vtanh.f32 %v1657_v58 }
 0x3f6   :  { %4567 = vtanh.f32 %v2338_v51 }
 0x3f7   :  { %v2170_v1 = vpop.f32.mrf.mxu2 }
 0x3f8   :  { %v2171_v43 = vadd.f32 %v2170_v1, %v6147_v47  ;;  %v1490_v50 = vpop.f32.mrf.mxu0 }
 0x3f9   :  { %v2339_v10 = vpop.f32.mrf.mxu3  ;;  %v1491_v61 = vadd.f32 %v1490_v50, %v5990_v9 }
 0x3fa   :  { %v1659_v27 = vpop.f32.mrf.mxu1  ;;  %v2340_v3 = vadd.f32 %v2339_v10, %v2171_v43 }
 0x3fb   :  { %v4566_v36 = vpop.eup %4565  ;;  %1529 = vmatmul.bf16.gmra.mxu0 %v5965_v62  ;;  %v1660_v26 = vadd.f32 %v1659_v27, %v1491_v61 }
 0x3fc   :  { %4569 = vtanh.f32 %v2340_v3  ;;  %1698 = vmatmul.bf16.gmra.mxu1 %v5970_v29  ;;  %2212 = vmatmul.bf16.gmra.mxu2 %v5984_v34  ;;  %v6405_v60 = vpack.c.bf16 %v4566_v36, %v4564_v35  ;;  %v6409_v58 = vpop.eup %4567 }
 0x3fd   :  { %4571 = vtanh.f32 %v1660_v26 }
 0x3fe   :  { %7116 = vst [vmem:[#allocation42_spill] sm:$0xff] %v6405_v60  ;;  %2381 = vmatmul.bf16.gmra.mxu3 %v6405_v60 }
 0x3ff   :  { %v2173_v28 = vpop.f32.mrf.mxu2 }
 0x400   :  { %v2174_v37 = vadd.f32 %v2173_v28, %v6147_v47  ;;  %v1492_v10 = vpop.f32.mrf.mxu0 }
 0x401   :  { %v1493_v62 = vadd.f32 %v1492_v10, %v5990_v9  ;;  %v2342_v1 = vpop.f32.mrf.mxu3 }
 0x402   :  { %v1661_v51 = vpop.f32.mrf.mxu1  ;;  %v6412_v3 = vpop.eup %4569  ;;  %v2343_v29 = vadd.f32 %v2342_v1, %v2174_v37 }
 0x403   :  { %v1662_v43 = vadd.f32 %v1661_v51, %v1493_v62  ;;  %v4572_v18 = vpop.eup %4571  ;;  %v4028_v62 = vld [vmem:[%s6952_s7 + $0x8] sm:$0xff] }
 0x404   :  { %v4036_v51 = vld [vmem:[%s6952_s7 + $0x48] sm:$0xff]  ;;  %3105 = vmatpush.bf16.msra.mxu2 %v4028_v62 }
 0x405   :  { %4573 = vtanh.f32 %v1662_v43  ;;  %3274 = vmatpush.bf16.msra.mxu3 %v4036_v51 }
 0x406   :  { %4575 = vtanh.f32 %v2343_v29 }
 0x407   :  { %v2175_v50 = vpop.f32.mrf.mxu2 }
 0x408   :  { %v2176_v27 = vadd.f32 %v2175_v50, %v6147_v47  ;;  %v1495_v36 = vpop.f32.mrf.mxu0 }
 0x409   :  { %v2344_v28 = vpop.f32.mrf.mxu3  ;;  %v1496_v37 = vadd.f32 %v1495_v36, %v5990_v9 }
 0x40a   :  { %v1664_v61 = vpop.f32.mrf.mxu1  ;;  %v2345_v60 = vadd.f32 %v2344_v28, %v2176_v27 }
 0x40b   :  { %v4574_v10 = vpop.eup %4573  ;;  %1534 = vmatmul.bf16.gmra.mxu0 %v5992_v14  ;;  %v1665_v1 = vadd.f32 %v1664_v61, %v1496_v37 }
 0x40c   :  { %4577 = vtanh.f32 %v2345_v60  ;;  %1703 = vmatmul.bf16.gmra.mxu1 %v5998_v4  ;;  %2217 = vmatmul.bf16.gmra.mxu2 %v6003_v21  ;;  %v6421_v26 = vpack.c.bf16 %v4574_v10, %v4572_v18  ;;  %v6431_v29 = vpop.eup %4575 }
 0x40d   :  { %4579 = vtanh.f32 %v1665_v1 }
 0x40e   :  { %7117 = vst [vmem:[#allocation43_spill] sm:$0xff] %v6421_v26  ;;  %2386 = vmatmul.bf16.gmra.mxu3 %v6421_v26 }
 0x40f   :  { %v2178_v14 = vpop.f32.mrf.mxu2 }
 0x410   :  { %v2179_v60 = vadd.f32 %v2178_v14, %v6147_v47  ;;  %v1497_v4 = vpop.f32.mrf.mxu0 }
 0x411   :  { %v1498_v18 = vadd.f32 %v1497_v4, %v5990_v9  ;;  %v2347_v50 = vpop.f32.mrf.mxu3 }
 0x412   :  { %v1666_v43 = vpop.f32.mrf.mxu1  ;;  %v6434_v27 = vpop.eup %4577  ;;  %v2348_v36 = vadd.f32 %v2347_v50, %v2179_v60 }
 0x413   :  { %v1667_v28 = vadd.f32 %v1666_v43, %v1498_v18  ;;  %v4580_v35 = vpop.eup %4579 }
 0x415   :  { %4581 = vtanh.f32 %v1667_v28 }
 0x416   :  { %4583 = vtanh.f32 %v2348_v36 }
 0x417   :  { %v2180_v61 = vpop.f32.mrf.mxu2 }
 0x418   :  { %v2181_v37 = vadd.f32 %v2180_v61, %v6147_v47  ;;  %v1500_v62 = vpop.f32.mrf.mxu0 }
 0x419   :  { %v2349_v14 = vpop.f32.mrf.mxu3  ;;  %v1501_v60 = vadd.f32 %v1500_v62, %v5990_v9 }
 0x41a   :  { %v1669_v51 = vpop.f32.mrf.mxu1  ;;  %v2350_v26 = vadd.f32 %v2349_v14, %v2181_v37 }
 0x41b   :  { %v4582_v4 = vpop.eup %4581  ;;  %2445 = vmatmul.bf16.vlgmr.msra.gmra.mxu0 %v5444_v23  ;;  %v1670_v43 = vadd.f32 %v1669_v51, %v1501_v60 }
 0x41c   :  { %4585 = vtanh.f32 %v2350_v26  ;;  %2614 = vmatmul.bf16.vlgmr.msra.gmra.mxu1 %v6010_v41  ;;  %2222 = vmatmul.bf16.gmra.mxu2 %v6015_v57  ;;  %v6443_v1 = vpack.c.bf16 %v4582_v4, %v4580_v35  ;;  %v6447_v61 = vpop.eup %4583 }
 0x41d   :  { %4587 = vtanh.f32 %v1670_v43 }
 0x41e   :  { %7118 = vst [vmem:[#allocation44_spill] sm:$0xff] %v6443_v1  ;;  %2391 = vmatmul.bf16.gmra.mxu3 %v6443_v1 }
 0x41f   :  { %v2183_v18 = vpop.f32.mrf.mxu2 }
 0x420   :  { %v2184_v50 = vadd.f32 %v2183_v18, %v6147_v47  ;;  %v1502_v28 = vpop.f32.mrf.mxu0 }
 0x421   :  { %v1503_v23 = vadd.f32 %v1502_v28, %v5990_v9  ;;  %v2352_v37 = vpop.f32.mrf.mxu3 }
 0x422   :  { %v1671_v36 = vpop.f32.mrf.mxu1  ;;  %v6450_v26 = vpop.eup %4585  ;;  %v2353_v41 = vadd.f32 %v2352_v37, %v2184_v50 }
 0x423   :  { %v1672_v62 = vadd.f32 %v1671_v36, %v1503_v23  ;;  %v4588_v10 = vpop.eup %4587 }
 0x425   :  { %4589 = vtanh.f32 %v1672_v62 }
 0x426   :  { %4591 = vtanh.f32 %v2353_v41 }
 0x427   :  { %v2185_v14 = vpop.f32.mrf.mxu2 }
 0x428   :  { %v2186_v51 = vadd.f32 %v2185_v14, %v6147_v47  ;;  %v1505_v4 = vpop.f32.mrf.mxu0 }
 0x429   :  { %v2354_v18 = vpop.f32.mrf.mxu3  ;;  %v1506_v50 = vadd.f32 %v1505_v4, %v5990_v9 }
 0x42a   :  { %v1674_v60 = vpop.f32.mrf.mxu1  ;;  %v2355_v1 = vadd.f32 %v2354_v18, %v2186_v51 }
 0x42b   :  { %v4590_v28 = vpop.eup %4589  ;;  %2450 = vmatmul.bf16.gmra.mxu0 %v5478_v13  ;;  %v1675_v36 = vadd.f32 %v1674_v60, %v1506_v50 }
 0x42c   :  { %4593 = vtanh.f32 %v2355_v1  ;;  %2619 = vmatmul.bf16.gmra.mxu1 %v6022_v49  ;;  %2227 = vmatmul.bf16.gmra.mxu2 %v6039_v44  ;;  %v6459_v43 = vpack.c.bf16 %v4590_v28, %v4588_v10  ;;  %v6463_v14 = vpop.eup %4591 }
 0x42d   :  { %4595 = vtanh.f32 %v1675_v36 }
 0x42e   :  { %7119 = vst [vmem:[#allocation45_spill] sm:$0xff] %v6459_v43  ;;  %2396 = vmatmul.bf16.gmra.mxu3 %v6459_v43 }
 0x42f   :  { %v2188_v23 = vpop.f32.mrf.mxu2 }
 0x430   :  { %v2189_v37 = vadd.f32 %v2188_v23, %v6147_v47  ;;  %v1507_v62 = vpop.f32.mrf.mxu0 }
 0x431   :  { %v1508_v13 = vadd.f32 %v1507_v62, %v5990_v9  ;;  %v2357_v51 = vpop.f32.mrf.mxu3 }
 0x432   :  { %v1676_v41 = vpop.f32.mrf.mxu1  ;;  %v6466_v1 = vpop.eup %4593  ;;  %v2358_v49 = vadd.f32 %v2357_v51, %v2189_v37 }
 0x433   :  { %v1677_v4 = vadd.f32 %v1676_v41, %v1508_v13  ;;  %v4596_v35 = vpop.eup %4595 }
 0x435   :  { %4597 = vtanh.f32 %v1677_v4 }
 0x436   :  { %4599 = vtanh.f32 %v2358_v49 }
 0x437   :  { %v2190_v18 = vpop.f32.mrf.mxu2 }
 0x438   :  { %v2191_v60 = vadd.f32 %v2190_v18, %v6147_v47  ;;  %v1510_v28 = vpop.f32.mrf.mxu0 }
 0x439   :  { %v2359_v23 = vpop.f32.mrf.mxu3  ;;  %v1511_v37 = vadd.f32 %v1510_v28, %v5990_v9 }
 0x43a   :  { %v1679_v50 = vpop.f32.mrf.mxu1  ;;  %v2360_v43 = vadd.f32 %v2359_v23, %v2191_v60 }
 0x43b   :  { %v4598_v62 = vpop.eup %4597  ;;  %2455 = vmatmul.bf16.gmra.mxu0 %v5500_v59  ;;  %v1680_v41 = vadd.f32 %v1679_v50, %v1511_v37 }
 0x43c   :  { %4601 = vtanh.f32 %v2360_v43  ;;  %2624 = vmatmul.bf16.gmra.mxu1 %v6046_v25  ;;  %2232 = vmatmul.bf16.gmra.mxu2 %v6057_v56  ;;  %v6475_v36 = vpack.c.bf16 %v4598_v62, %v4596_v35  ;;  %v6479_v18 = vpop.eup %4599 }
 0x43d   :  { %4603 = vtanh.f32 %v1680_v41 }
 0x43e   :  { %7120 = vst [vmem:[#allocation46_spill] sm:$0xff] %v6475_v36  ;;  %2401 = vmatmul.bf16.gmra.mxu3 %v6475_v36 }
 0x43f   :  { %v2193_v13 = vpop.f32.mrf.mxu2 }
 0x440   :  { %v2194_v51 = vadd.f32 %v2193_v13, %v6147_v47  ;;  %v1512_v4 = vpop.f32.mrf.mxu0 }
 0x441   :  { %v1513_v59 = vadd.f32 %v1512_v4, %v5990_v9  ;;  %v2362_v60 = vpop.f32.mrf.mxu3 }
 0x442   :  { %v1681_v49 = vpop.f32.mrf.mxu1  ;;  %v6482_v43 = vpop.eup %4601  ;;  %v2363_v25 = vadd.f32 %v2362_v60, %v2194_v51 }
 0x443   :  { %v1682_v28 = vadd.f32 %v1681_v49, %v1513_v59  ;;  %v4604_v10 = vpop.eup %4603  ;;  %v4027_v59 = vld [vmem:[%s6952_s7] sm:$0xff] }
 0x444   :  { %v4035_v49 = vld [vmem:[%s6952_s7 + $0x40] sm:$0xff]  ;;  %3106 = vmatpush.bf16.msra.mxu2 %v4027_v59 }
 0x445   :  { %4605 = vtanh.f32 %v1682_v28  ;;  %3275 = vmatpush.bf16.msra.mxu3 %v4035_v49 }
 0x446   :  { %4607 = vtanh.f32 %v2363_v25 }
 0x447   :  { %v2195_v23 = vpop.f32.mrf.mxu2 }
 0x448   :  { %v2196_v50 = vadd.f32 %v2195_v23, %v6147_v47  ;;  %v1515_v62 = vpop.f32.mrf.mxu0 }
 0x449   :  { %v2364_v13 = vpop.f32.mrf.mxu3  ;;  %v1516_v51 = vadd.f32 %v1515_v62, %v5990_v9 }
 0x44a   :  { %v1684_v37 = vpop.f32.mrf.mxu1  ;;  %v2365_v36 = vadd.f32 %v2364_v13, %v2196_v50 }
 0x44b   :  { %v4606_v4 = vpop.eup %4605  ;;  %2460 = vmatmul.bf16.gmra.mxu0 %v5522_v48  ;;  %v1685_v60 = vadd.f32 %v1684_v37, %v1516_v51 }
 0x44c   :  { %4609 = vtanh.f32 %v2365_v36  ;;  %2629 = vmatmul.bf16.gmra.mxu1 %v6064_v45  ;;  %2237 = vmatmul.bf16.gmra.mxu2 %v6069_v19  ;;  %v6491_v41 = vpack.c.bf16 %v4606_v4, %v4604_v10  ;;  %v6501_v25 = vpop.eup %4607 }
 0x44d   :  { %4611 = vtanh.f32 %v1685_v60 }
 0x44e   :  { %7121 = vst [vmem:[#allocation47_spill] sm:$0xff] %v6491_v41  ;;  %2406 = vmatmul.bf16.gmra.mxu3 %v6491_v41 }
 0x44f   :  { %v2198_v48 = vpop.f32.mrf.mxu2 }
 0x450   :  { %v2199_v36 = vadd.f32 %v2198_v48, %v6147_v47  ;;  %v1517_v45 = vpop.f32.mrf.mxu0 }
 0x451   :  { %v1518_v10 = vadd.f32 %v1517_v45, %v5990_v9  ;;  %v2367_v23 = vpop.f32.mrf.mxu3 }
 0x452   :  { %v1686_v28 = vpop.f32.mrf.mxu1  ;;  %v6504_v50 = vpop.eup %4609  ;;  %v2368_v62 = vadd.f32 %v2367_v23, %v2199_v36 }
 0x453   :  { %v1687_v13 = vadd.f32 %v1686_v28, %v1518_v10  ;;  %v4612_v35 = vpop.eup %4611 }
 0x455   :  { %4613 = vtanh.f32 %v1687_v13 }
 0x456   :  { %4615 = vtanh.f32 %v2368_v62 }
 0x457   :  { %v2200_v37 = vpop.f32.mrf.mxu2 }
 0x458   :  { %v2201_v51 = vadd.f32 %v2200_v37, %v6147_v47  ;;  %v1520_v59 = vpop.f32.mrf.mxu0 }
 0x459   :  { %v2369_v48 = vpop.f32.mrf.mxu3  ;;  %v1521_v36 = vadd.f32 %v1520_v59, %v5990_v9 }
 0x45a   :  { %v1689_v49 = vpop.f32.mrf.mxu1  ;;  %v2370_v41 = vadd.f32 %v2369_v48, %v2201_v51 }
 0x45b   :  { %v4614_v45 = vpop.eup %4613  ;;  %2465 = vmatmul.bf16.gmra.mxu0 %v5556_v53  ;;  %v1690_v28 = vadd.f32 %v1689_v49, %v1521_v36 }
 0x45c   :  { %4617 = vtanh.f32 %v2370_v41  ;;  %2634 = vmatmul.bf16.gmra.mxu1 %v6076_v38  ;;  %2242 = vmatmul.bf16.gmra.mxu2 %v6081_v12  ;;  %v6513_v60 = vpack.c.bf16 %v4614_v45, %v4612_v35  ;;  %v6517_v37 = vpop.eup %4615 }
 0x45d   :  { %4619 = vtanh.f32 %v1690_v28 }
 0x45e   :  { %7122 = vst [vmem:[#allocation48_spill] sm:$0xff] %v6513_v60  ;;  %2411 = vmatmul.bf16.gmra.mxu3 %v6513_v60 }
 0x45f   :  { %v2203_v10 = vpop.f32.mrf.mxu2 }
 0x460   :  { %v2204_v23 = vadd.f32 %v2203_v10, %v6147_v47  ;;  %v1522_v13 = vpop.f32.mrf.mxu0 }
 0x461   :  { %v1523_v53 = vadd.f32 %v1522_v13, %v5990_v9  ;;  %v2372_v51 = vpop.f32.mrf.mxu3 }
 0x462   :  { %v1691_v62 = vpop.f32.mrf.mxu1  ;;  %v6520_v41 = vpop.eup %4617  ;;  %v2373_v38 = vadd.f32 %v2372_v51, %v2204_v23 }
 0x463   :  { %v1692_v59 = vadd.f32 %v1691_v62, %v1523_v53  ;;  %v4620_v4 = vpop.eup %4619 }
 0x465   :  { %4621 = vtanh.f32 %v1692_v59 }
 0x466   :  { %4623 = vtanh.f32 %v2373_v38 }
 0x467   :  { %v2205_v48 = vpop.f32.mrf.mxu2 }
 0x468   :  { %v2206_v49 = vadd.f32 %v2205_v48, %v6147_v47  ;;  %v1525_v45 = vpop.f32.mrf.mxu0 }
 0x469   :  { %v2374_v10 = vpop.f32.mrf.mxu3  ;;  %v1526_v23 = vadd.f32 %v1525_v45, %v5990_v9 }
 0x46a   :  { %v1694_v36 = vpop.f32.mrf.mxu1  ;;  %v2375_v60 = vadd.f32 %v2374_v10, %v2206_v49 }
 0x46b   :  { %v4622_v13 = vpop.eup %4621  ;;  %2470 = vmatmul.bf16.gmra.mxu0 %v5590_v0  ;;  %v1695_v62 = vadd.f32 %v1694_v36, %v1526_v23 }
 0x46c   :  { %4625 = vtanh.f32 %v2375_v60  ;;  %2639 = vmatmul.bf16.gmra.mxu1 %v6088_v63  ;;  %2247 = vmatmul.bf16.gmra.mxu2 %v6105_v30  ;;  %v6529_v28 = vpack.c.bf16 %v4622_v13, %v4620_v4  ;;  %v6533_v48 = vpop.eup %4623 }
 0x46d   :  { %4627 = vtanh.f32 %v1695_v62 }
 0x46e   :  { %7123 = vst [vmem:[#allocation49_spill] sm:$0xff] %v6529_v28  ;;  %2416 = vmatmul.bf16.gmra.mxu3 %v6529_v28 }
 0x46f   :  { %v2208_v53 = vpop.f32.mrf.mxu2 }
 0x470   :  { %v2209_v51 = vadd.f32 %v2208_v53, %v6147_v47  ;;  %v1527_v59 = vpop.f32.mrf.mxu0 }
 0x471   :  { %v1528_v0 = vadd.f32 %v1527_v59, %v5990_v9  ;;  %v2377_v49 = vpop.f32.mrf.mxu3 }
 0x472   :  { %v1696_v38 = vpop.f32.mrf.mxu1  ;;  %v6536_v60 = vpop.eup %4625  ;;  %v2378_v63 = vadd.f32 %v2377_v49, %v2209_v51 }
 0x473   :  { %v1697_v45 = vadd.f32 %v1696_v38, %v1528_v0  ;;  %v4628_v35 = vpop.eup %4627 }
 0x475   :  { %4629 = vtanh.f32 %v1697_v45 }
 0x476   :  { %4631 = vtanh.f32 %v2378_v63 }
 0x477   :  { %v2210_v10 = vpop.f32.mrf.mxu2 }
 0x478   :  { %v2211_v36 = vadd.f32 %v2210_v10, %v6147_v47  ;;  %v1530_v13 = vpop.f32.mrf.mxu0 }
 0x479   :  { %v2379_v53 = vpop.f32.mrf.mxu3  ;;  %v1531_v51 = vadd.f32 %v1530_v13, %v5990_v9 }
 0x47a   :  { %v1699_v23 = vpop.f32.mrf.mxu1  ;;  %v2380_v28 = vadd.f32 %v2379_v53, %v2211_v36 }
 0x47b   :  { %v4630_v59 = vpop.eup %4629  ;;  %2475 = vmatmul.bf16.gmra.mxu0 %v5612_v7  ;;  %v1700_v38 = vadd.f32 %v1699_v23, %v1531_v51 }
 0x47c   :  { %4633 = vtanh.f32 %v2380_v28  ;;  %2644 = vmatmul.bf16.gmra.mxu1 %v6112_v33  ;;  %2252 = vmatmul.bf16.gmra.mxu2 %v6123_v52  ;;  %v6545_v62 = vpack.c.bf16 %v4630_v59, %v4628_v35  ;;  %v6549_v10 = vpop.eup %4631  ;;  %v7127_v52 = vld [vmem:[#allocation6_spill] sm:$0xff] }
 0x47d   :  { %7125 = vst [vmem:[#allocation51_spill] sm:$0xff] %v6549_v10  ;;  %4635 = vtanh.f32 %v1700_v38  ;;  %v7137_v10 = vld [vmem:[#allocation12_spill] sm:$0xff] }
 0x47e   :  { %7124 = vst [vmem:[#allocation50_spill] sm:$0xff] %v6545_v62  ;;  %2421 = vmatmul.bf16.gmra.mxu3 %v6545_v62 }
 0x47f   :  { %v2213_v0 = vpop.f32.mrf.mxu2 }
 0x480   :  { %v2214_v49 = vadd.f32 %v2213_v0, %v6147_v47  ;;  %v1532_v45 = vpop.f32.mrf.mxu0 }
 0x481   :  { %v1533_v7 = vadd.f32 %v1532_v45, %v5990_v9  ;;  %v2382_v36 = vpop.f32.mrf.mxu3 }
 0x482   :  { %v1701_v63 = vpop.f32.mrf.mxu1  ;;  %v6552_v28 = vpop.eup %4633  ;;  %v2383_v33 = vadd.f32 %v2382_v36, %v2214_v49 }
 0x483   :  { %7126 = vst [vmem:[#allocation52_spill] sm:$0xff] %v6552_v28  ;;  %v1702_v13 = vadd.f32 %v1701_v63, %v1533_v7  ;;  %v4636_v4 = vpop.eup %4635  ;;  %v7128_v7 = vld [vmem:[#allocation5_spill] sm:$0xff]  ;;  %v7129_v63 = vld [vmem:[#allocation38_spill] sm:$0xff] }
 0x485   :  { %4637 = vtanh.f32 %v1702_v13 }
 0x486   :  { %4639 = vtanh.f32 %v2383_v33 }
 0x487   :  { %v2215_v53 = vpop.f32.mrf.mxu2 }
 0x488   :  { %v2216_v23 = vadd.f32 %v2215_v53, %v6147_v47  ;;  %v1535_v59 = vpop.f32.mrf.mxu0 }
 0x489   :  { %v2384_v0 = vpop.f32.mrf.mxu3  ;;  %v1536_v49 = vadd.f32 %v1535_v59, %v5990_v9 }
 0x48a   :  { %v1704_v51 = vpop.f32.mrf.mxu1  ;;  %v2385_v62 = vadd.f32 %v2384_v0, %v2216_v23 }
 0x48b   :  { %v4638_v45 = vpop.eup %4637  ;;  %2480 = vmatmul.bf16.gmra.mxu0 %v7127_v52  ;;  %v1705_v13 = vadd.f32 %v1704_v51, %v1536_v49  ;;  %v4816_v49 = vld [vmem:[%s6951_s6] sm:$0x3] }
 0x48c   :  { %4641 = vtanh.f32 %v2385_v62  ;;  %2649 = vmatmul.bf16.gmra.mxu1 %v7128_v7  ;;  %2257 = vmatmul.bf16.gmra.mxu2 %v7129_v63  ;;  %v6561_v38 = vpack.c.bf16 %v4638_v45, %v4636_v4  ;;  %v6565_v0 = vpop.eup %4639 }
 0x48d   :  { %7131 = vst [vmem:[#allocation5_spill] sm:$0xff] %v6565_v0  ;;  %4643 = vtanh.f32 %v1705_v13  ;;  %v7134_v13 = vld [vmem:[#allocation7_spill] sm:$0xff] }
 0x48e   :  { %7130 = vst [vmem:[#allocation6_spill] sm:$0xff] %v6561_v38  ;;  %2426 = vmatmul.bf16.gmra.mxu3 %v6561_v38 }
 0x48f   :  { %v2218_v36 = vpop.f32.mrf.mxu2 }
 0x490   :  { %v2219_v53 = vadd.f32 %v2218_v36, %v6147_v47  ;;  %v1537_v23 = vpop.f32.mrf.mxu0  ;;  %v6576_v36 = vperm.slane %v4816_v49, 1 }
 0x491   :  { %v1538_v52 = vadd.f32 %v1537_v23, %v5990_v9  ;;  %v2387_v59 = vpop.f32.mrf.mxu3 }
 0x492   :  { %v1706_v33 = vpop.f32.mrf.mxu1  ;;  %v6568_v62 = vpop.eup %4641  ;;  %v2388_v7 = vadd.f32 %v2387_v59, %v2219_v53 }
 0x493   :  { %7132 = vst [vmem:[#allocation53_spill] sm:$0xff] %v6568_v62  ;;  %v1707_v35 = vadd.f32 %v1706_v33, %v1538_v52  ;;  %v4644_v63 = vpop.eup %4643  ;;  %v7133_v33 = vld [vmem:[#allocation9_spill] sm:$0xff] }
 0x495   :  { %4645 = vtanh.f32 %v1707_v35 }
 0x496   :  { %4647 = vtanh.f32 %v2388_v7 }
 0x497   :  { %v2220_v45 = vpop.f32.mrf.mxu2 }
 0x498   :  { %v2221_v51 = vadd.f32 %v2220_v45, %v6147_v47  ;;  %v2446_v9 = vpop.f32.mrf.mxu0 }
 0x499   :  { %v2389_v38 = vpop.f32.mrf.mxu3  ;;  %v2447_v35 = vadd.f32 %v2446_v9, %v6576_v36 }
 0x49a   :  { %v2615_v23 = vpop.f32.mrf.mxu1  ;;  %v2390_v53 = vadd.f32 %v2389_v38, %v2221_v51 }
 0x49b   :  { %v4646_v52 = vpop.eup %4645  ;;  %2485 = vmatmul.bf16.gmra.mxu0 %v7133_v33  ;;  %v2616_v49 = vadd.f32 %v2615_v23, %v2447_v35 }
 0x49c   :  { %4649 = vtanh.f32 %v2390_v53  ;;  %2654 = vmatmul.bf16.gmra.mxu1 %v7134_v13  ;;  %2262 = vmatmul.bf16.gmra.mxu2 %v6152_v11  ;;  %v6582_v59 = vpack.c.bf16 %v4646_v52, %v4644_v63  ;;  %v6586_v51 = vpop.eup %4647 }
 0x49d   :  { %7136 = vst [vmem:[#allocation7_spill] sm:$0xff] %v6586_v51  ;;  %4651 = vtanh.f32 %v2616_v49  ;;  %v7139_v49 = vld [vmem:[#allocation39_spill] sm:$0xff] }
 0x49e   :  { %7135 = vst [vmem:[#allocation9_spill] sm:$0xff] %v6582_v59  ;;  %2431 = vmatmul.bf16.gmra.mxu3 %v6582_v59  ;;  %v7144_v51 = vld [vmem:[#allocation15_spill] sm:$0xff] }
 0x49f   :  { %v2223_v45 = vpop.f32.mrf.mxu2 }
 0x4a0   :  { %v2224_v4 = vadd.f32 %v2223_v45, %v6147_v47  ;;  %v2448_v38 = vpop.f32.mrf.mxu0 }
 0x4a1   :  { %v2449_v7 = vadd.f32 %v2448_v38, %v6576_v36  ;;  %v2392_v9 = vpop.f32.mrf.mxu3 }
 0x4a2   :  { %v2617_v33 = vpop.f32.mrf.mxu1  ;;  %v6589_v53 = vpop.eup %4649  ;;  %v2393_v13 = vadd.f32 %v2392_v9, %v2224_v4 }
 0x4a3   :  { %v2618_v0 = vadd.f32 %v2617_v33, %v2449_v7  ;;  %v4652_v11 = vpop.eup %4651  ;;  %v7138_v7 = vld [vmem:[#allocation10_spill] sm:$0xff] }
 0x4a5   :  { %4653 = vtanh.f32 %v2618_v0  ;;  %v7140_v0 = vld [vmem:[#allocation11_spill] sm:$0xff] }
 0x4a6   :  { %4655 = vtanh.f32 %v2393_v13  ;;  %v7141_v33 = vpack.c.bf16 %v7139_v49, %v7140_v0 }
 0x4a7   :  { %v2225_v52 = vpop.f32.mrf.mxu2 }
 0x4a8   :  { %v2226_v23 = vadd.f32 %v2225_v52, %v6147_v47  ;;  %v2451_v35 = vpop.f32.mrf.mxu0 }
 0x4a9   :  { %v2394_v59 = vpop.f32.mrf.mxu3  ;;  %v2452_v4 = vadd.f32 %v2451_v35, %v6576_v36 }
 0x4aa   :  { %v2620_v45 = vpop.f32.mrf.mxu1  ;;  %v2395_v62 = vadd.f32 %v2394_v59, %v2226_v23 }
 0x4ab   :  { %v4654_v38 = vpop.eup %4653  ;;  %2490 = vmatmul.bf16.gmra.mxu0 %v7137_v10  ;;  %v2621_v52 = vadd.f32 %v2620_v45, %v2452_v4 }
 0x4ac   :  { %v2904_v28 = vpack.c.bf16 %v4654_v38, %v4652_v11  ;;  %4657 = vtanh.f32 %v2395_v62  ;;  %2659 = vmatmul.bf16.gmra.mxu1 %v7138_v7  ;;  %3107 = vmatmul.bf16.vlgmr.msra.gmra.mxu2 %v7141_v33  ;;  %v6601_v23 = vpop.eup %4655 }
 0x4ad   :  { %7142 = vst [vmem:[#allocation12_spill] sm:$0xff] %v6601_v23  ;;  %4659 = vtanh.f32 %v2621_v52  ;;  %v7147_v52 = vld [vmem:[#allocation14_spill] sm:$0xff] }
 0x4ae   :  { %3276 = vmatmul.bf16.vlgmr.msra.gmra.mxu3 %v2904_v28 }
 0x4af   :  { %v2228_v9 = vpop.f32.mrf.mxu2 }
 0x4b0   :  { %v2229_v63 = vadd.f32 %v2228_v9, %v6147_v47  ;;  %v2453_v59 = vpop.f32.mrf.mxu0 }
 0x4b1   :  { %v2454_v10 = vadd.f32 %v2453_v59, %v6576_v36  ;;  %v2397_v13 = vpop.f32.mrf.mxu3 }
 0x4b2   :  { %v2622_v11 = vpop.f32.mrf.mxu1  ;;  %v6604_v35 = vpop.eup %4657  ;;  %v2398_v62 = vadd.f32 %v2397_v13, %v2229_v63 }
 0x4b3   :  { %7143 = vst [vmem:[#allocation10_spill] sm:$0xff] %v6604_v35  ;;  %v2623_v38 = vadd.f32 %v2622_v11, %v2454_v10  ;;  %v4660_v33 = vpop.eup %4659  ;;  %v7145_v10 = vld [vmem:[#allocation13_spill] sm:$0xff]  ;;  %v7146_v11 = vld [vmem:[#allocation40_spill] sm:$0xff] }
 0x4b4   :  { %v7148_v13 = vpack.c.bf16 %v7146_v11, %v7147_v52 }
 0x4b5   :  { %4661 = vtanh.f32 %v2623_v38 }
 0x4b6   :  { %4663 = vtanh.f32 %v2398_v62 }
 0x4b7   :  { %v2230_v28 = vpop.f32.mrf.mxu2 }
 0x4b8   :  { %v2231_v45 = vadd.f32 %v2230_v28, %v6147_v47  ;;  %v2456_v4 = vpop.f32.mrf.mxu0 }
 0x4b9   :  { %v2399_v0 = vpop.f32.mrf.mxu3  ;;  %v2457_v63 = vadd.f32 %v2456_v4, %v6576_v36 }
 0x4ba   :  { %v2625_v49 = vpop.f32.mrf.mxu1  ;;  %v2400_v9 = vadd.f32 %v2399_v0, %v2231_v45 }
 0x4bb   :  { %v4662_v59 = vpop.eup %4661  ;;  %2495 = vmatmul.bf16.gmra.mxu0 %v7144_v51  ;;  %v2626_v7 = vadd.f32 %v2625_v49, %v2457_v63 }
 0x4bc   :  { %4665 = vtanh.f32 %v2400_v9  ;;  %2664 = vmatmul.bf16.gmra.mxu1 %v7145_v10  ;;  %3112 = vmatmul.bf16.gmra.mxu2 %v7148_v13  ;;  %v2906_v38 = vpack.c.bf16 %v4662_v59, %v4660_v33  ;;  %v6616_v0 = vpop.eup %4663 }
 0x4bd   :  { %7149 = vst [vmem:[#allocation39_spill] sm:$0xff] %v6616_v0  ;;  %4667 = vtanh.f32 %v2626_v7  ;;  %v7154_v7 = vld [vmem:[#allocation17_spill] sm:$0xff] }
 0x4be   :  { %3281 = vmatmul.bf16.gmra.mxu3 %v2906_v38 }
 0x4bf   :  { %v2233_v28 = vpop.f32.mrf.mxu2 }
 0x4c0   :  { %v2234_v23 = vadd.f32 %v2233_v28, %v6147_v47  ;;  %v2458_v45 = vpop.f32.mrf.mxu0 }
 0x4c1   :  { %v2459_v51 = vadd.f32 %v2458_v45, %v6576_v36  ;;  %v2402_v4 = vpop.f32.mrf.mxu3  ;;  %v7151_v45 = vld [vmem:[#allocation18_spill] sm:$0xff] }
 0x4c2   :  { %v2627_v62 = vpop.f32.mrf.mxu1  ;;  %v6619_v9 = vpop.eup %4665  ;;  %v2403_v10 = vadd.f32 %v2402_v4, %v2234_v23 }
 0x4c3   :  { %7150 = vst [vmem:[#allocation11_spill] sm:$0xff] %v6619_v9  ;;  %v2628_v35 = vadd.f32 %v2627_v62, %v2459_v51  ;;  %v4668_v13 = vpop.eup %4667  ;;  %v7152_v51 = vld [vmem:[#allocation16_spill] sm:$0xff]  ;;  %v7153_v62 = vld [vmem:[#allocation41_spill] sm:$0xff] }
 0x4c5   :  { %4669 = vtanh.f32 %v2628_v35  ;;  %v7155_v35 = vpack.c.bf16 %v7153_v62, %v7154_v7 }
 0x4c6   :  { %4671 = vtanh.f32 %v2403_v10 }
 0x4c7   :  { %v2235_v33 = vpop.f32.mrf.mxu2 }
 0x4c8   :  { %v2236_v49 = vadd.f32 %v2235_v33, %v6147_v47  ;;  %v2461_v59 = vpop.f32.mrf.mxu0 }
 0x4c9   :  { %v2404_v52 = vpop.f32.mrf.mxu3  ;;  %v2462_v23 = vadd.f32 %v2461_v59, %v6576_v36 }
 0x4ca   :  { %v2630_v63 = vpop.f32.mrf.mxu1  ;;  %v2405_v38 = vadd.f32 %v2404_v52, %v2236_v49 }
 0x4cb   :  { %v4670_v28 = vpop.eup %4669  ;;  %2500 = vmatmul.bf16.gmra.mxu0 %v7151_v45  ;;  %v2631_v11 = vadd.f32 %v2630_v63, %v2462_v23 }
 0x4cc   :  { %4673 = vtanh.f32 %v2405_v38  ;;  %2669 = vmatmul.bf16.gmra.mxu1 %v7152_v51  ;;  %3117 = vmatmul.bf16.gmra.mxu2 %v7155_v35  ;;  %v2908_v4 = vpack.c.bf16 %v4670_v28, %v4668_v13  ;;  %v6631_v52 = vpop.eup %4671 }
 0x4cd   :  { %7156 = vst [vmem:[#allocation15_spill] sm:$0xff] %v6631_v52  ;;  %4675 = vtanh.f32 %v2631_v11  ;;  %v7159_v11 = vld [vmem:[#allocation20_spill] sm:$0xff] }
 0x4ce   :  { %3286 = vmatmul.bf16.gmra.mxu3 %v2908_v4 }
 0x4cf   :  { %v2238_v33 = vpop.f32.mrf.mxu2 }
 0x4d0   :  { %v2239_v0 = vadd.f32 %v2238_v33, %v6147_v47  ;;  %v2463_v49 = vpop.f32.mrf.mxu0 }
 0x4d1   :  { %v2464_v10 = vadd.f32 %v2463_v49, %v6576_v36  ;;  %v2407_v59 = vpop.f32.mrf.mxu3  ;;  %v7157_v49 = vld [vmem:[#allocation21_spill] sm:$0xff] }
 0x4d2   :  { %v2632_v45 = vpop.f32.mrf.mxu1  ;;  %v6634_v38 = vpop.eup %4673  ;;  %v2408_v51 = vadd.f32 %v2407_v59, %v2239_v0 }
 0x4d3   :  { %v2633_v9 = vadd.f32 %v2632_v45, %v2464_v10  ;;  %v4676_v35 = vpop.eup %4675  ;;  %v7158_v10 = vld [vmem:[#allocation19_spill] sm:$0xff] }
 0x4d5   :  { %4677 = vtanh.f32 %v2633_v9  ;;  %v7160_v9 = vpack.c.bf16 %v6232_v24, %v7159_v11 }
 0x4d6   :  { %4679 = vtanh.f32 %v2408_v51 }
 0x4d7   :  { %v2240_v13 = vpop.f32.mrf.mxu2 }
 0x4d8   :  { %v2241_v63 = vadd.f32 %v2240_v13, %v6147_v47  ;;  %v2466_v28 = vpop.f32.mrf.mxu0 }
 0x4d9   :  { %v2409_v7 = vpop.f32.mrf.mxu3  ;;  %v2467_v0 = vadd.f32 %v2466_v28, %v6576_v36 }
 0x4da   :  { %v2635_v23 = vpop.f32.mrf.mxu1  ;;  %v2410_v4 = vadd.f32 %v2409_v7, %v2241_v63 }
 0x4db   :  { %v4678_v33 = vpop.eup %4677  ;;  %2505 = vmatmul.bf16.gmra.mxu0 %v7157_v49  ;;  %v2636_v13 = vadd.f32 %v2635_v23, %v2467_v0 }
 0x4dc   :  { %4681 = vtanh.f32 %v2410_v4  ;;  %2674 = vmatmul.bf16.gmra.mxu1 %v7158_v10  ;;  %3122 = vmatmul.bf16.gmra.mxu2 %v7160_v9  ;;  %v2910_v45 = vpack.c.bf16 %v4678_v33, %v4676_v35  ;;  %v6646_v7 = vpop.eup %4679 }
 0x4dd   :  { %4683 = vtanh.f32 %v2636_v13 }
 0x4de   :  { %3291 = vmatmul.bf16.gmra.mxu3 %v2910_v45 }
 0x4df   :  { %v2243_v59 = vpop.f32.mrf.mxu2 }
 0x4e0   :  { %v2244_v62 = vadd.f32 %v2243_v59, %v6147_v47  ;;  %v2468_v63 = vpop.f32.mrf.mxu0 }
 0x4e1   :  { %v2469_v51 = vadd.f32 %v2468_v63, %v6576_v36  ;;  %v2412_v28 = vpop.f32.mrf.mxu3  ;;  %v7161_v63 = vld [vmem:[#allocation24_spill] sm:$0xff] }
 0x4e2   :  { %v2637_v49 = vpop.f32.mrf.mxu1  ;;  %v6649_v4 = vpop.eup %4681  ;;  %v2413_v10 = vadd.f32 %v2412_v28, %v2244_v62 }
 0x4e3   :  { %v2638_v52 = vadd.f32 %v2637_v49, %v2469_v51  ;;  %v4684_v9 = vpop.eup %4683  ;;  %v7162_v51 = vld [vmem:[#allocation22_spill] sm:$0xff] }
 0x4e5   :  { %4685 = vtanh.f32 %v2638_v52  ;;  %v7163_v52 = vpack.c.bf16 %v6260_v2, %v6257_v22 }
 0x4e6   :  { %4687 = vtanh.f32 %v2413_v10 }
 0x4e7   :  { %v2245_v35 = vpop.f32.mrf.mxu2 }
 0x4e8   :  { %v2246_v23 = vadd.f32 %v2245_v35, %v6147_v47  ;;  %v2471_v33 = vpop.f32.mrf.mxu0 }
 0x4e9   :  { %v2414_v11 = vpop.f32.mrf.mxu3  ;;  %v2472_v62 = vadd.f32 %v2471_v33, %v6576_v36 }
 0x4ea   :  { %v2640_v0 = vpop.f32.mrf.mxu1  ;;  %v2415_v45 = vadd.f32 %v2414_v11, %v2246_v23 }
 0x4eb   :  { %v4686_v59 = vpop.eup %4685  ;;  %2510 = vmatmul.bf16.gmra.mxu0 %v7161_v63  ;;  %v2641_v28 = vadd.f32 %v2640_v0, %v2472_v62 }
 0x4ec   :  { %4689 = vtanh.f32 %v2415_v45  ;;  %2679 = vmatmul.bf16.gmra.mxu1 %v7162_v51  ;;  %3127 = vmatmul.bf16.gmra.mxu2 %v7163_v52  ;;  %v2912_v13 = vpack.c.bf16 %v4686_v59, %v4684_v9  ;;  %v6661_v11 = vpop.eup %4687 }
 0x4ed   :  { %4691 = vtanh.f32 %v2641_v28 }
 0x4ee   :  { %3296 = vmatmul.bf16.gmra.mxu3 %v2912_v13 }
 0x4ef   :  { %v2248_v49 = vpop.f32.mrf.mxu2 }
 0x4f0   :  { %v2249_v35 = vadd.f32 %v2248_v49, %v6147_v47  ;;  %v2473_v23 = vpop.f32.mrf.mxu0 }
 0x4f1   :  { %v2474_v10 = vadd.f32 %v2473_v23, %v6576_v36  ;;  %v2417_v33 = vpop.f32.mrf.mxu3  ;;  %v7164_v23 = vld [vmem:[#allocation23_spill] sm:$0xff] }
 0x4f2   :  { %v2642_v63 = vpop.f32.mrf.mxu1  ;;  %v6664_v45 = vpop.eup %4689  ;;  %v2418_v51 = vadd.f32 %v2417_v33, %v2249_v35 }
 0x4f3   :  { %v2643_v24 = vadd.f32 %v2642_v63, %v2474_v10  ;;  %v4692_v52 = vpop.eup %4691 }
 0x4f5   :  { %4693 = vtanh.f32 %v2643_v24  ;;  %v7165_v24 = vpack.c.bf16 %v6282_v17, %v6279_v42 }
 0x4f6   :  { %4695 = vtanh.f32 %v2418_v51 }
 0x4f7   :  { %v2250_v22 = vpop.f32.mrf.mxu2 }
 0x4f8   :  { %v2251_v0 = vadd.f32 %v2250_v22, %v6147_v47  ;;  %v2476_v9 = vpop.f32.mrf.mxu0 }
 0x4f9   :  { %v2419_v62 = vpop.f32.mrf.mxu3  ;;  %v2477_v35 = vadd.f32 %v2476_v9, %v6576_v36 }
 0x4fa   :  { %v2645_v59 = vpop.f32.mrf.mxu1  ;;  %v2420_v13 = vadd.f32 %v2419_v62, %v2251_v0 }
 0x4fb   :  { %v4694_v49 = vpop.eup %4693  ;;  %2515 = vmatmul.bf16.gmra.mxu0 %v5830_v6  ;;  %v2646_v63 = vadd.f32 %v2645_v59, %v2477_v35 }
 0x4fc   :  { %4697 = vtanh.f32 %v2420_v13  ;;  %2684 = vmatmul.bf16.gmra.mxu1 %v7164_v23  ;;  %3132 = vmatmul.bf16.gmra.mxu2 %v7165_v24  ;;  %v2914_v28 = vpack.c.bf16 %v4694_v49, %v4692_v52  ;;  %v6676_v0 = vpop.eup %4695 }
 0x4fd   :  { %4699 = vtanh.f32 %v2646_v63  ;;  %v7168_v63 = vpack.c.bf16 %v6298_v16, %v6295_v5 }
 0x4fe   :  { %3301 = vmatmul.bf16.gmra.mxu3 %v2914_v28 }
 0x4ff   :  { %v2253_v10 = vpop.f32.mrf.mxu2 }
 0x500   :  { %v2254_v33 = vadd.f32 %v2253_v10, %v6147_v47  ;;  %v2478_v22 = vpop.f32.mrf.mxu0 }
 0x501   :  { %v2479_v6 = vadd.f32 %v2478_v22, %v6576_v36  ;;  %v2422_v9 = vpop.f32.mrf.mxu3  ;;  %v7166_v22 = vld [vmem:[#allocation27_spill] sm:$0xff] }
 0x502   :  { %v2647_v51 = vpop.f32.mrf.mxu1  ;;  %v6679_v62 = vpop.eup %4697  ;;  %v2423_v13 = vadd.f32 %v2422_v9, %v2254_v33 }
 0x503   :  { %v2648_v23 = vadd.f32 %v2647_v51, %v2479_v6  ;;  %v4700_v24 = vpop.eup %4699  ;;  %v7167_v6 = vld [vmem:[#allocation25_spill] sm:$0xff] }
 0x505   :  { %4701 = vtanh.f32 %v2648_v23 }
 0x506   :  { %4703 = vtanh.f32 %v2423_v13 }
 0x507   :  { %v2255_v17 = vpop.f32.mrf.mxu2 }
 0x508   :  { %v2256_v59 = vadd.f32 %v2255_v17, %v6147_v47  ;;  %v2481_v52 = vpop.f32.mrf.mxu0 }
 0x509   :  { %v2424_v35 = vpop.f32.mrf.mxu3  ;;  %v2482_v33 = vadd.f32 %v2481_v52, %v6576_v36 }
 0x50a   :  { %v2650_v49 = vpop.f32.mrf.mxu1  ;;  %v2425_v28 = vadd.f32 %v2424_v35, %v2256_v59 }
 0x50b   :  { %v4702_v10 = vpop.eup %4701  ;;  %2520 = vmatmul.bf16.gmra.mxu0 %v7166_v22  ;;  %v2651_v23 = vadd.f32 %v2650_v49, %v2482_v33 }
 0x50c   :  { %4705 = vtanh.f32 %v2425_v28  ;;  %2689 = vmatmul.bf16.gmra.mxu1 %v7167_v6  ;;  %3137 = vmatmul.bf16.gmra.mxu2 %v7168_v63  ;;  %v2916_v51 = vpack.c.bf16 %v4702_v10, %v4700_v24  ;;  %v6691_v35 = vpop.eup %4703 }
 0x50d   :  { %4707 = vtanh.f32 %v2651_v23  ;;  %v7171_v23 = vld [vmem:[#allocation28_spill] sm:$0xff] }
 0x50e   :  { %3306 = vmatmul.bf16.gmra.mxu3 %v2916_v51 }
 0x50f   :  { %v2258_v9 = vpop.f32.mrf.mxu2 }
 0x510   :  { %v2259_v17 = vadd.f32 %v2258_v9, %v6147_v47  ;;  %v2483_v59 = vpop.f32.mrf.mxu0 }
 0x511   :  { %v2484_v13 = vadd.f32 %v2483_v59, %v6576_v36  ;;  %v2427_v52 = vpop.f32.mrf.mxu3  ;;  %v7169_v59 = vld [vmem:[#allocation29_spill] sm:$0xff] }
 0x512   :  { %v2652_v22 = vpop.f32.mrf.mxu1  ;;  %v6694_v28 = vpop.eup %4705  ;;  %v2428_v6 = vadd.f32 %v2427_v52, %v2259_v17 }
 0x513   :  { %v2653_v42 = vadd.f32 %v2652_v22, %v2484_v13  ;;  %v4708_v63 = vpop.eup %4707  ;;  %v7170_v13 = vld [vmem:[#allocation26_spill] sm:$0xff] }
 0x515   :  { %4709 = vtanh.f32 %v2653_v42  ;;  %v7172_v42 = vpack.c.bf16 %v6314_v32, %v7171_v23 }
 0x516   :  { %4711 = vtanh.f32 %v2428_v6 }
 0x517   :  { %v2260_v16 = vpop.f32.mrf.mxu2 }
 0x518   :  { %v2261_v49 = vadd.f32 %v2260_v16, %v6147_v47  ;;  %v2486_v24 = vpop.f32.mrf.mxu0 }
 0x519   :  { %v2429_v33 = vpop.f32.mrf.mxu3  ;;  %v2487_v17 = vadd.f32 %v2486_v24, %v6576_v36 }
 0x51a   :  { %v2655_v10 = vpop.f32.mrf.mxu1  ;;  %v2430_v51 = vadd.f32 %v2429_v33, %v2261_v49 }
 0x51b   :  { %v4710_v9 = vpop.eup %4709  ;;  %2525 = vmatmul.bf16.gmra.mxu0 %v7169_v59  ;;  %v2656_v16 = vadd.f32 %v2655_v10, %v2487_v17 }
 0x51c   :  { %4713 = vtanh.f32 %v2430_v51  ;;  %2694 = vmatmul.bf16.gmra.mxu1 %v7170_v13  ;;  %3142 = vmatmul.bf16.gmra.mxu2 %v7172_v42  ;;  %v2918_v22 = vpack.c.bf16 %v4710_v9, %v4708_v63  ;;  %v6706_v33 = vpop.eup %4711 }
 0x51d   :  { %4715 = vtanh.f32 %v2656_v16 }
 0x51e   :  { %3311 = vmatmul.bf16.gmra.mxu3 %v2918_v22 }
 0x51f   :  { %v2263_v52 = vpop.f32.mrf.mxu2 }
 0x520   :  { %v2264_v5 = vadd.f32 %v2263_v52, %v6147_v47  ;;  %v2488_v49 = vpop.f32.mrf.mxu0 }
 0x521   :  { %v2489_v6 = vadd.f32 %v2488_v49, %v6576_v36  ;;  %v2432_v24 = vpop.f32.mrf.mxu3  ;;  %v7173_v49 = vld [vmem:[#allocation31_spill] sm:$0xff] }
 0x522   :  { %v2657_v59 = vpop.f32.mrf.mxu1  ;;  %v6709_v51 = vpop.eup %4713  ;;  %v2433_v13 = vadd.f32 %v2432_v24, %v2264_v5 }
 0x523   :  { %v2658_v2 = vadd.f32 %v2657_v59, %v2489_v6  ;;  %v2963_v32 = vpack.c.bf16 %v6709_v51, %v6706_v33  ;;  %v4716_v42 = vpop.eup %4715  ;;  %v7174_v6 = vld [vmem:[#allocation30_spill] sm:$0xff] }
 0x525   :  { %4717 = vtanh.f32 %v2658_v2  ;;  %v7175_v2 = vpack.c.bf16 %v6342_v20, %v6339_v40 }
 0x526   :  { %4719 = vtanh.f32 %v2433_v13 }
 0x527   :  { %v2265_v63 = vpop.f32.mrf.mxu2 }
 0x528   :  { %v2266_v10 = vadd.f32 %v2265_v63, %v6147_v47  ;;  %v2491_v9 = vpop.f32.mrf.mxu0  ;;  %v6723_v47 = vld [vmem:[%s6953_s8] ss:$0 sm:$0xff] }
 0x529   :  { %v2434_v23 = vpop.f32.mrf.mxu3  ;;  %v2492_v5 = vadd.f32 %v2491_v9, %v6576_v36 }
 0x52a   :  { %v2660_v17 = vpop.f32.mrf.mxu1  ;;  %v2435_v22 = vadd.f32 %v2434_v23, %v2266_v10 }
 0x52b   :  { %v4718_v52 = vpop.eup %4717  ;;  %2530 = vmatmul.bf16.gmra.mxu0 %v7173_v49  ;;  %v2661_v24 = vadd.f32 %v2660_v17, %v2492_v5 }
 0x52c   :  { %4721 = vtanh.f32 %v2435_v22  ;;  %2699 = vmatmul.bf16.gmra.mxu1 %v7174_v6  ;;  %3147 = vmatmul.bf16.gmra.mxu2 %v7175_v2  ;;  %v2920_v16 = vpack.c.bf16 %v4718_v52, %v4716_v42  ;;  %v6726_v10 = vpop.eup %4719 }
 0x52d   :  { %4723 = vtanh.f32 %v2661_v24  ;;  %v7177_v24 = vpack.c.bf16 %v6364_v46, %v6361_v8 }
 0x52e   :  { %3316 = vmatmul.bf16.gmra.mxu3 %v2920_v16 }
 0x52f   :  { %v3108_v59 = vpop.f32.mrf.mxu2 }
 0x530   :  { %v3109_v13 = vadd.f32 %v6723_v47, %v3108_v59  ;;  %v2493_v63 = vpop.f32.mrf.mxu0 }
 0x531   :  { %v2494_v9 = vadd.f32 %v2493_v63, %v6576_v36  ;;  %v3277_v22 = vpop.f32.mrf.mxu3 }
 0x532   :  { %v2662_v23 = vpop.f32.mrf.mxu1  ;;  %v6729_v20 = vpop.eup %4721  ;;  %v3278_v40 = vadd.f32 %v3277_v22, %v3109_v13 }
 0x533   :  { %v2663_v42 = vadd.f32 %v2662_v23, %v2494_v9  ;;  %v4724_v16 = vpop.eup %4723  ;;  %v7176_v9 = vld [vmem:[#allocation32_spill] sm:$0xff] }
 0x534   :  { %3437 = vst [vmem:[#allocation2] sm:$0xff] %v3278_v40 }
 0x535   :  { %4725 = vtanh.f32 %v2663_v42 }
 0x537   :  { %v3110_v17 = vpop.f32.mrf.mxu2 }
 0x538   :  { %v3111_v49 = vadd.f32 %v6723_v47, %v3110_v17  ;;  %v2496_v5 = vpop.f32.mrf.mxu0 }
 0x539   :  { %v3279_v2 = vpop.f32.mrf.mxu3  ;;  %v2497_v13 = vadd.f32 %v2496_v5, %v6576_v36 }
 0x53a   :  { %v2665_v6 = vpop.f32.mrf.mxu1  ;;  %v3280_v59 = vadd.f32 %v3279_v2, %v3111_v49 }
 0x53b   :  { %v4726_v63 = vpop.eup %4725  ;;  %2535 = vmatmul.bf16.gmra.mxu0 %v5918_v39  ;;  %v2666_v40 = vadd.f32 %v2665_v6, %v2497_v13 }
 0x53c   :  { %3438 = vst [vmem:[#allocation2 + $0x8] sm:$0xff] %v3280_v59  ;;  %2704 = vmatmul.bf16.gmra.mxu1 %v7176_v9  ;;  %3152 = vmatmul.bf16.gmra.mxu2 %v7177_v24  ;;  %v2922_v23 = vpack.c.bf16 %v4726_v63, %v4724_v16  ;;  %v7178_v24 = vld [vmem:[#allocation34_spill] sm:$0xff] }
 0x53d   :  { %4727 = vtanh.f32 %v2666_v40 }
 0x53e   :  { %3321 = vmatmul.bf16.gmra.mxu3 %v2922_v23 }
 0x53f   :  { %v3113_v22 = vpop.f32.mrf.mxu2 }
 0x540   :  { %v3114_v42 = vadd.f32 %v6723_v47, %v3113_v22  ;;  %v2498_v17 = vpop.f32.mrf.mxu0  ;;  %v7179_v22 = vld [vmem:[#allocation33_spill] sm:$0xff] }
 0x541   :  { %v2499_v49 = vadd.f32 %v2498_v17, %v6576_v36  ;;  %v3282_v39 = vpop.f32.mrf.mxu3 }
 0x542   :  { %v2667_v2 = vpop.f32.mrf.mxu1  ;;  %v3283_v52 = vadd.f32 %v3282_v39, %v3114_v42 }
 0x543   :  { %v2668_v5 = vadd.f32 %v2667_v2, %v2499_v49  ;;  %v4728_v9 = vpop.eup %4727 }
 0x544   :  { %3439 = vst [vmem:[#allocation2 + $0x10] sm:$0xff] %v3283_v52  ;;  %v7180_v52 = vpack.c.bf16 %v6380_v54, %v6377_v55 }
 0x545   :  { %4729 = vtanh.f32 %v2668_v5 }
 0x547   :  { %v3115_v59 = vpop.f32.mrf.mxu2 }
 0x548   :  { %v3116_v8 = vadd.f32 %v6723_v47, %v3115_v59  ;;  %v2501_v46 = vpop.f32.mrf.mxu0 }
 0x549   :  { %v3284_v63 = vpop.f32.mrf.mxu3  ;;  %v2502_v23 = vadd.f32 %v2501_v46, %v6576_v36 }
 0x54a   :  { %v2670_v16 = vpop.f32.mrf.mxu1  ;;  %v3285_v6 = vadd.f32 %v3284_v63, %v3116_v8 }
 0x54b   :  { %v4730_v13 = vpop.eup %4729  ;;  %2540 = vmatmul.bf16.gmra.mxu0 %v7178_v24  ;;  %v2671_v17 = vadd.f32 %v2670_v16, %v2502_v23  ;;  %v7181_v23 = vld [vmem:[#allocation36_spill] sm:$0xff] }
 0x54c   :  { %3440 = vst [vmem:[#allocation2 + $0x18] sm:$0xff] %v3285_v6  ;;  %2709 = vmatmul.bf16.gmra.mxu1 %v7179_v22  ;;  %3157 = vmatmul.bf16.gmra.mxu2 %v7180_v52  ;;  %v2924_v40 = vpack.c.bf16 %v4730_v13, %v4728_v9  ;;  %v7182_v52 = vld [vmem:[#allocation35_spill] sm:$0xff] }
 0x54d   :  { %4731 = vtanh.f32 %v2671_v17 }
 0x54e   :  { %3326 = vmatmul.bf16.gmra.mxu3 %v2924_v40  ;;  %v7183_v40 = vpack.c.bf16 %v6396_v31, %v6393_v15 }
 0x54f   :  { %v3118_v42 = vpop.f32.mrf.mxu2 }
 0x550   :  { %v3119_v49 = vadd.f32 %v6723_v47, %v3118_v42  ;;  %v2503_v2 = vpop.f32.mrf.mxu0 }
 0x551   :  { %v2504_v39 = vadd.f32 %v2503_v2, %v6576_v36  ;;  %v3287_v59 = vpop.f32.mrf.mxu3 }
 0x552   :  { %v2672_v5 = vpop.f32.mrf.mxu1  ;;  %v3288_v8 = vadd.f32 %v3287_v59, %v3119_v49 }
 0x553   :  { %v2673_v46 = vadd.f32 %v2672_v5, %v2504_v39  ;;  %v4732_v13 = vpop.eup %4731 }
 0x554   :  { %3441 = vst [vmem:[#allocation2 + $0x20] sm:$0xff] %v3288_v8 }
 0x555   :  { %4733 = vtanh.f32 %v2673_v46 }
 0x557   :  { %v3120_v63 = vpop.f32.mrf.mxu2 }
 0x558   :  { %v3121_v55 = vadd.f32 %v6723_v47, %v3120_v63  ;;  %v2506_v54 = vpop.f32.mrf.mxu0 }
 0x559   :  { %v3289_v6 = vpop.f32.mrf.mxu3  ;;  %v2507_v22 = vadd.f32 %v2506_v54, %v6576_v36 }
 0x55a   :  { %v2675_v9 = vpop.f32.mrf.mxu1  ;;  %v3290_v16 = vadd.f32 %v3289_v6, %v3121_v55 }
 0x55b   :  { %v4734_v24 = vpop.eup %4733  ;;  %2545 = vmatmul.bf16.gmra.mxu0 %v7181_v23  ;;  %v2676_v49 = vadd.f32 %v2675_v9, %v2507_v22  ;;  %v7184_v23 = vld [vmem:[#allocation42_spill] sm:$0xff]  ;;  %v7185_v22 = vpack.c.bf16 %v6412_v3, %v6409_v58 }
 0x55c   :  { %3442 = vst [vmem:[#allocation2 + $0x28] sm:$0xff] %v3290_v16  ;;  %2714 = vmatmul.bf16.gmra.mxu1 %v7182_v52  ;;  %3162 = vmatmul.bf16.gmra.mxu2 %v7183_v40  ;;  %v2926_v42 = vpack.c.bf16 %v4734_v24, %v4732_v13 }
 0x55d   :  { %4735 = vtanh.f32 %v2676_v49 }
 0x55e   :  { %3331 = vmatmul.bf16.gmra.mxu3 %v2926_v42 }
 0x55f   :  { %v3123_v17 = vpop.f32.mrf.mxu2 }
 0x560   :  { %v3124_v2 = vadd.f32 %v6723_v47, %v3123_v17  ;;  %v2508_v39 = vpop.f32.mrf.mxu0 }
 0x561   :  { %v2509_v5 = vadd.f32 %v2508_v39, %v6576_v36  ;;  %v3292_v8 = vpop.f32.mrf.mxu3 }
 0x562   :  { %v2677_v59 = vpop.f32.mrf.mxu1  ;;  %v3293_v46 = vadd.f32 %v3292_v8, %v3124_v2 }
 0x563   :  { %v2678_v63 = vadd.f32 %v2677_v59, %v2509_v5  ;;  %v4736_v13 = vpop.eup %4735 }
 0x564   :  { %3443 = vst [vmem:[#allocation2 + $0x30] sm:$0xff] %v3293_v46 }
 0x565   :  { %4737 = vtanh.f32 %v2678_v63 }
 0x567   :  { %v3125_v55 = vpop.f32.mrf.mxu2 }
 0x568   :  { %v3126_v15 = vadd.f32 %v6723_v47, %v3125_v55  ;;  %v2511_v31 = vpop.f32.mrf.mxu0 }
 0x569   :  { %v3294_v6 = vpop.f32.mrf.mxu3  ;;  %v2512_v24 = vadd.f32 %v2511_v31, %v6576_v36 }
 0x56a   :  { %v2680_v54 = vpop.f32.mrf.mxu1  ;;  %v3295_v9 = vadd.f32 %v3294_v6, %v3126_v15  ;;  %v7186_v6 = vld [vmem:[#allocation43_spill] sm:$0xff] }
 0x56b   :  { %v4738_v16 = vpop.eup %4737  ;;  %2550 = vmatmul.bf16.gmra.mxu0 %v5984_v34  ;;  %v2681_v42 = vadd.f32 %v2680_v54, %v2512_v24 }
 0x56c   :  { %3444 = vst [vmem:[#allocation2 + $0x38] sm:$0xff] %v3295_v9  ;;  %2719 = vmatmul.bf16.gmra.mxu1 %v7184_v23  ;;  %3167 = vmatmul.bf16.gmra.mxu2 %v7185_v22  ;;  %v2928_v52 = vpack.c.bf16 %v4738_v16, %v4736_v13  ;;  %v7187_v13 = vpack.c.bf16 %v6434_v27, %v6431_v29 }
 0x56d   :  { %4739 = vtanh.f32 %v2681_v42 }
 0x56e   :  { %3336 = vmatmul.bf16.gmra.mxu3 %v2928_v52 }
 0x56f   :  { %v3128_v40 = vpop.f32.mrf.mxu2 }
 0x570   :  { %v3129_v17 = vadd.f32 %v6723_v47, %v3128_v40  ;;  %v2513_v49 = vpop.f32.mrf.mxu0 }
 0x571   :  { %v2514_v2 = vadd.f32 %v2513_v49, %v6576_v36  ;;  %v3297_v34 = vpop.f32.mrf.mxu3 }
 0x572   :  { %v2682_v39 = vpop.f32.mrf.mxu1  ;;  %v3298_v5 = vadd.f32 %v3297_v34, %v3129_v17 }
 0x573   :  { %v2683_v59 = vadd.f32 %v2682_v39, %v2514_v2  ;;  %v4740_v55 = vpop.eup %4739 }
 0x574   :  { %3445 = vst [vmem:[#allocation2 + $0x40] sm:$0xff] %v3298_v5 }
 0x575   :  { %4741 = vtanh.f32 %v2683_v59 }
 0x577   :  { %v3130_v8 = vpop.f32.mrf.mxu2 }
 0x578   :  { %v3131_v58 = vadd.f32 %v6723_v47, %v3130_v8  ;;  %v2516_v3 = vpop.f32.mrf.mxu0 }
 0x579   :  { %v3299_v63 = vpop.f32.mrf.mxu3  ;;  %v2517_v54 = vadd.f32 %v2516_v3, %v6576_v36  ;;  %v7189_v3 = vpack.c.bf16 %v6450_v26, %v6447_v61 }
 0x57a   :  { %v2685_v46 = vpop.f32.mrf.mxu1  ;;  %v3300_v15 = vadd.f32 %v3299_v63, %v3131_v58  ;;  %v7188_v58 = vld [vmem:[#allocation44_spill] sm:$0xff] }
 0x57b   :  { %v4742_v31 = vpop.eup %4741  ;;  %2555 = vmatmul.bf16.gmra.mxu0 %v6003_v21  ;;  %v2686_v24 = vadd.f32 %v2685_v46, %v2517_v54 }
 0x57c   :  { %3446 = vst [vmem:[#allocation2 + $0x48] sm:$0xff] %v3300_v15  ;;  %2724 = vmatmul.bf16.gmra.mxu1 %v7186_v6  ;;  %3172 = vmatmul.bf16.gmra.mxu2 %v7187_v13  ;;  %v2930_v9 = vpack.c.bf16 %v4742_v31, %v4740_v55 }
 0x57d   :  { %4743 = vtanh.f32 %v2686_v24 }
 0x57e   :  { %3341 = vmatmul.bf16.gmra.mxu3 %v2930_v9 }
 0x57f   :  { %v3133_v16 = vpop.f32.mrf.mxu2 }
 0x580   :  { %v3134_v23 = vadd.f32 %v6723_v47, %v3133_v16  ;;  %v2518_v22 = vpop.f32.mrf.mxu0 }
 0x581   :  { %v2519_v52 = vadd.f32 %v2518_v22, %v6576_v36  ;;  %v3302_v21 = vpop.f32.mrf.mxu3 }
 0x582   :  { %v2687_v40 = vpop.f32.mrf.mxu1  ;;  %v3303_v42 = vadd.f32 %v3302_v21, %v3134_v23 }
 0x583   :  { %v2688_v17 = vadd.f32 %v2687_v40, %v2519_v52  ;;  %v4744_v34 = vpop.eup %4743 }
 0x584   :  { %3447 = vst [vmem:[#allocation2 + $0x50] sm:$0xff] %v3303_v42  ;;  %v7190_v42 = vld [vmem:[#allocation45_spill] sm:$0xff] }
 0x585   :  { %4745 = vtanh.f32 %v2688_v17  ;;  %v7191_v17 = vpack.c.bf16 %v6466_v1, %v6463_v14 }
 0x587   :  { %v3135_v49 = vpop.f32.mrf.mxu2 }
 0x588   :  { %v3136_v29 = vadd.f32 %v6723_v47, %v3135_v49  ;;  %v2521_v27 = vpop.f32.mrf.mxu0 }
 0x589   :  { %v3304_v39 = vpop.f32.mrf.mxu3  ;;  %v2522_v8 = vadd.f32 %v2521_v27, %v6576_v36 }
 0x58a   :  { %v2690_v2 = vpop.f32.mrf.mxu1  ;;  %v3305_v5 = vadd.f32 %v3304_v39, %v3136_v29 }
 0x58b   :  { %v4746_v59 = vpop.eup %4745  ;;  %2560 = vmatmul.bf16.gmra.mxu0 %v6015_v57  ;;  %v2691_v55 = vadd.f32 %v2690_v2, %v2522_v8 }
 0x58c   :  { %3448 = vst [vmem:[#allocation2 + $0x58] sm:$0xff] %v3305_v5  ;;  %2729 = vmatmul.bf16.gmra.mxu1 %v7188_v58  ;;  %3177 = vmatmul.bf16.gmra.mxu2 %v7189_v3  ;;  %v2932_v46 = vpack.c.bf16 %v4746_v59, %v4744_v34 }
 0x58d   :  { %4747 = vtanh.f32 %v2691_v55 }
 0x58e   :  { %3346 = vmatmul.bf16.gmra.mxu3 %v2932_v46 }
 0x58f   :  { %v3138_v63 = vpop.f32.mrf.mxu2 }
 0x590   :  { %v3139_v15 = vadd.f32 %v6723_v47, %v3138_v63  ;;  %v2523_v31 = vpop.f32.mrf.mxu0 }
 0x591   :  { %v2524_v54 = vadd.f32 %v2523_v31, %v6576_v36  ;;  %v3307_v57 = vpop.f32.mrf.mxu3 }
 0x592   :  { %v2692_v6 = vpop.f32.mrf.mxu1  ;;  %v3308_v13 = vadd.f32 %v3307_v57, %v3139_v15 }
 0x593   :  { %v2693_v9 = vadd.f32 %v2692_v6, %v2524_v54  ;;  %v4748_v22 = vpop.eup %4747  ;;  %v7192_v54 = vld [vmem:[#allocation46_spill] sm:$0xff]  ;;  %v7193_v6 = vpack.c.bf16 %v6482_v43, %v6479_v18 }
 0x594   :  { %3449 = vst [vmem:[#allocation2 + $0x60] sm:$0xff] %v3308_v13 }
 0x595   :  { %4749 = vtanh.f32 %v2693_v9 }
 0x597   :  { %v3140_v16 = vpop.f32.mrf.mxu2 }
 0x598   :  { %v3141_v61 = vadd.f32 %v6723_v47, %v3140_v16  ;;  %v2526_v26 = vpop.f32.mrf.mxu0 }
 0x599   :  { %v3309_v23 = vpop.f32.mrf.mxu3  ;;  %v2527_v21 = vadd.f32 %v2526_v26, %v6576_v36 }
 0x59a   :  { %v2695_v24 = vpop.f32.mrf.mxu1  ;;  %v3310_v52 = vadd.f32 %v3309_v23, %v3141_v61 }
 0x59b   :  { %v4750_v40 = vpop.eup %4749  ;;  %2565 = vmatmul.bf16.gmra.mxu0 %v6039_v44  ;;  %v2696_v27 = vadd.f32 %v2695_v24, %v2527_v21 }
 0x59c   :  { %3450 = vst [vmem:[#allocation2 + $0x68] sm:$0xff] %v3310_v52  ;;  %2734 = vmatmul.bf16.gmra.mxu1 %v7190_v42  ;;  %3182 = vmatmul.bf16.gmra.mxu2 %v7191_v17  ;;  %v2934_v49 = vpack.c.bf16 %v4750_v40, %v4748_v22 }
 0x59d   :  { %4751 = vtanh.f32 %v2696_v27  ;;  %v7194_v27 = vld [vmem:[#allocation47_spill] sm:$0xff] }
 0x59e   :  { %3351 = vmatmul.bf16.gmra.mxu3 %v2934_v49 }
 0x59f   :  { %v3143_v29 = vpop.f32.mrf.mxu2 }
 0x5a0   :  { %v3144_v2 = vadd.f32 %v6723_v47, %v3143_v29  ;;  %v2528_v39 = vpop.f32.mrf.mxu0 }
 0x5a1   :  { %v2529_v34 = vadd.f32 %v2528_v39, %v6576_v36  ;;  %v3312_v44 = vpop.f32.mrf.mxu3 }
 0x5a2   :  { %v2697_v5 = vpop.f32.mrf.mxu1  ;;  %v3313_v59 = vadd.f32 %v3312_v44, %v3144_v2  ;;  %v7195_v2 = vpack.c.bf16 %v6504_v50, %v6501_v25 }
 0x5a3   :  { %v2698_v8 = vadd.f32 %v2697_v5, %v2529_v34  ;;  %v4752_v63 = vpop.eup %4751 }
 0x5a4   :  { %3451 = vst [vmem:[#allocation2 + $0x70] sm:$0xff] %v3313_v59 }
 0x5a5   :  { %4753 = vtanh.f32 %v2698_v8 }
 0x5a7   :  { %v3145_v58 = vpop.f32.mrf.mxu2 }
 0x5a8   :  { %v3146_v14 = vadd.f32 %v6723_v47, %v3145_v58  ;;  %v2531_v1 = vpop.f32.mrf.mxu0 }
 0x5a9   :  { %v3314_v46 = vpop.f32.mrf.mxu3  ;;  %v2532_v31 = vadd.f32 %v2531_v1, %v6576_v36 }
 0x5aa   :  { %v2700_v3 = vpop.f32.mrf.mxu1  ;;  %v3315_v55 = vadd.f32 %v3314_v46, %v3146_v14 }
 0x5ab   :  { %v4754_v15 = vpop.eup %4753  ;;  %2570 = vmatmul.bf16.gmra.mxu0 %v6057_v56  ;;  %v2701_v9 = vadd.f32 %v2700_v3, %v2532_v31 }
 0x5ac   :  { %3452 = vst [vmem:[#allocation2 + $0x78] sm:$0xff] %v3315_v55  ;;  %2739 = vmatmul.bf16.gmra.mxu1 %v7192_v54  ;;  %3187 = vmatmul.bf16.gmra.mxu2 %v7193_v6  ;;  %v2936_v57 = vpack.c.bf16 %v4754_v15, %v4752_v63  ;;  %v7196_v6 = vld [vmem:[#allocation48_spill] sm:$0xff] }
 0x5ad   :  { %4755 = vtanh.f32 %v2701_v9 }
 0x5ae   :  { %3356 = vmatmul.bf16.gmra.mxu3 %v2936_v57  ;;  %v7197_v57 = vpack.c.bf16 %v6520_v41, %v6517_v37 }
 0x5af   :  { %v3148_v13 = vpop.f32.mrf.mxu2 }
 0x5b0   :  { %v3149_v16 = vadd.f32 %v6723_v47, %v3148_v13  ;;  %v2533_v61 = vpop.f32.mrf.mxu0 }
 0x5b1   :  { %v2534_v26 = vadd.f32 %v2533_v61, %v6576_v36  ;;  %v3317_v56 = vpop.f32.mrf.mxu3 }
 0x5b2   :  { %v2702_v24 = vpop.f32.mrf.mxu1  ;;  %v3318_v23 = vadd.f32 %v3317_v56, %v3149_v16 }
 0x5b3   :  { %v2703_v22 = vadd.f32 %v2702_v24, %v2534_v26  ;;  %v4756_v42 = vpop.eup %4755 }
 0x5b4   :  { %3453 = vst [vmem:[#allocation2 + $0x80] sm:$0xff] %v3318_v23 }
 0x5b5   :  { %4757 = vtanh.f32 %v2703_v22 }
 0x5b7   :  { %v3150_v52 = vpop.f32.mrf.mxu2 }
 0x5b8   :  { %v3151_v18 = vadd.f32 %v6723_v47, %v3150_v52  ;;  %v2536_v43 = vpop.f32.mrf.mxu0 }
 0x5b9   :  { %v3319_v21 = vpop.f32.mrf.mxu3  ;;  %v2537_v29 = vadd.f32 %v2536_v43, %v6576_v36 }
 0x5ba   :  { %v2705_v40 = vpop.f32.mrf.mxu1  ;;  %v3320_v17 = vadd.f32 %v3319_v21, %v3151_v18 }
 0x5bb   :  { %v4758_v49 = vpop.eup %4757  ;;  %2575 = vmatmul.bf16.gmra.mxu0 %v6069_v19  ;;  %v2706_v5 = vadd.f32 %v2705_v40, %v2537_v29  ;;  %v7199_v29 = vpack.c.bf16 %v6536_v60, %v6533_v48 }
 0x5bc   :  { %3454 = vst [vmem:[#allocation2 + $0x88] sm:$0xff] %v3320_v17  ;;  %2744 = vmatmul.bf16.gmra.mxu1 %v7194_v27  ;;  %3192 = vmatmul.bf16.gmra.mxu2 %v7195_v2  ;;  %v2938_v39 = vpack.c.bf16 %v4758_v49, %v4756_v42  ;;  %v7198_v49 = vld [vmem:[#allocation49_spill] sm:$0xff] }
 0x5bd   :  { %4759 = vtanh.f32 %v2706_v5 }
 0x5be   :  { %3361 = vmatmul.bf16.gmra.mxu3 %v2938_v39 }
 0x5bf   :  { %v3153_v34 = vpop.f32.mrf.mxu2 }
 0x5c0   :  { %v3154_v44 = vadd.f32 %v6723_v47, %v3153_v34  ;;  %v2538_v59 = vpop.f32.mrf.mxu0 }
 0x5c1   :  { %v2539_v8 = vadd.f32 %v2538_v59, %v6576_v36  ;;  %v3322_v19 = vpop.f32.mrf.mxu3 }
 0x5c2   :  { %v2707_v58 = vpop.f32.mrf.mxu1  ;;  %v3323_v14 = vadd.f32 %v3322_v19, %v3154_v44 }
 0x5c3   :  { %v2708_v1 = vadd.f32 %v2707_v58, %v2539_v8  ;;  %v4760_v55 = vpop.eup %4759 }
 0x5c4   :  { %3455 = vst [vmem:[#allocation2 + $0x90] sm:$0xff] %v3323_v14 }
 0x5c5   :  { %4761 = vtanh.f32 %v2708_v1 }
 0x5c7   :  { %v3155_v3 = vpop.f32.mrf.mxu2 }
 0x5c8   :  { %v3156_v25 = vadd.f32 %v6723_v47, %v3155_v3  ;;  %v2541_v50 = vpop.f32.mrf.mxu0 }
 0x5c9   :  { %v3324_v63 = vpop.f32.mrf.mxu3  ;;  %v2542_v54 = vadd.f32 %v2541_v50, %v6576_v36 }
 0x5ca   :  { %v2710_v46 = vpop.f32.mrf.mxu1  ;;  %v3325_v15 = vadd.f32 %v3324_v63, %v3156_v25 }
 0x5cb   :  { %v4762_v31 = vpop.eup %4761  ;;  %2580 = vmatmul.bf16.gmra.mxu0 %v6081_v12  ;;  %v2711_v16 = vadd.f32 %v2710_v46, %v2542_v54  ;;  %v7200_v46 = vld [vmem:[#allocation37_spill] sm:$0xff] }
 0x5cc   :  { %3456 = vst [vmem:[#allocation2 + $0x98] sm:$0xff] %v3325_v15  ;;  %2749 = vmatmul.bf16.gmra.mxu1 %v7196_v6  ;;  %3197 = vmatmul.bf16.gmra.mxu2 %v7197_v57  ;;  %v2940_v13 = vpack.c.bf16 %v4762_v31, %v4760_v55  ;;  %v7201_v55 = vld [vmem:[#allocation50_spill] sm:$0xff]  ;;  %v7202_v15 = vld [vmem:[#allocation52_spill] sm:$0xff]  ;;  %v7203_v31 = vld [vmem:[#allocation51_spill] sm:$0xff] }
 0x5cd   :  { %4763 = vtanh.f32 %v2711_v16  ;;  %v7204_v54 = vpack.c.bf16 %v7202_v15, %v7203_v31  ;;  %v7211_v15 = vld [vmem:[#allocation9_spill] sm:$0xff]  ;;  %v7212_v31 = vld [vmem:[#allocation7_spill] sm:$0xff] }
 0x5ce   :  { %3366 = vmatmul.bf16.gmra.mxu3 %v2940_v13 }
 0x5cf   :  { %v3158_v9 = vpop.f32.mrf.mxu2 }
 0x5d0   :  { %v3159_v61 = vadd.f32 %v6723_v47, %v3158_v9  ;;  %v2543_v26 = vpop.f32.mrf.mxu0 }
 0x5d1   :  { %v2544_v24 = vadd.f32 %v2543_v26, %v6576_v36  ;;  %v3327_v12 = vpop.f32.mrf.mxu3 }
 0x5d2   :  { %v2712_v56 = vpop.f32.mrf.mxu1  ;;  %v3328_v23 = vadd.f32 %v3327_v12, %v3159_v61 }
 0x5d3   :  { %v2713_v22 = vadd.f32 %v2712_v56, %v2544_v24  ;;  %v4764_v40 = vpop.eup %4763 }
 0x5d4   :  { %3457 = vst [vmem:[#allocation2 + $0xa0] sm:$0xff] %v3328_v23 }
 0x5d5   :  { %4765 = vtanh.f32 %v2713_v22 }
 0x5d7   :  { %v3160_v52 = vpop.f32.mrf.mxu2 }
 0x5d8   :  { %v3161_v37 = vadd.f32 %v6723_v47, %v3160_v52  ;;  %v2546_v41 = vpop.f32.mrf.mxu0 }
 0x5d9   :  { %v3329_v43 = vpop.f32.mrf.mxu3  ;;  %v2547_v17 = vadd.f32 %v2546_v41, %v6576_v36 }
 0x5da   :  { %v2715_v18 = vpop.f32.mrf.mxu1  ;;  %v3330_v21 = vadd.f32 %v3329_v43, %v3161_v37 }
 0x5db   :  { %v4766_v42 = vpop.eup %4765  ;;  %2585 = vmatmul.bf16.gmra.mxu0 %v6105_v30  ;;  %v2716_v39 = vadd.f32 %v2715_v18, %v2547_v17  ;;  %v7206_v17 = vld [vmem:[#allocation6_spill] sm:$0xff] }
 0x5dc   :  { %3458 = vst [vmem:[#allocation2 + $0xa8] sm:$0xff] %v3330_v21  ;;  %2754 = vmatmul.bf16.gmra.mxu1 %v7198_v49  ;;  %3202 = vmatmul.bf16.gmra.mxu2 %v7199_v29  ;;  %v2942_v27 = vpack.c.bf16 %v4766_v42, %v4764_v40  ;;  %v7205_v21 = vld [vmem:[#allocation38_spill] sm:$0xff]  ;;  %v7207_v49 = vld [vmem:[#allocation53_spill] sm:$0xff] }
 0x5dd   :  { %4767 = vtanh.f32 %v2716_v39  ;;  %v7208_v29 = vld [vmem:[#allocation5_spill] sm:$0xff] }
 0x5de   :  { %3371 = vmatmul.bf16.gmra.mxu3 %v2942_v27  ;;  %v7209_v27 = vpack.c.bf16 %v7207_v49, %v7208_v29 }
 0x5df   :  { %v3163_v2 = vpop.f32.mrf.mxu2 }
 0x5e0   :  { %v3164_v34 = vadd.f32 %v6723_v47, %v3163_v2  ;;  %v2548_v5 = vpop.f32.mrf.mxu0 }
 0x5e1   :  { %v2549_v44 = vadd.f32 %v2548_v5, %v6576_v36  ;;  %v3332_v30 = vpop.f32.mrf.mxu3 }
 0x5e2   :  { %v2717_v59 = vpop.f32.mrf.mxu1  ;;  %v3333_v8 = vadd.f32 %v3332_v30, %v3164_v34 }
 0x5e3   :  { %v2718_v58 = vadd.f32 %v2717_v59, %v2549_v44  ;;  %v4768_v3 = vpop.eup %4767 }
 0x5e4   :  { %3459 = vst [vmem:[#allocation2 + $0xb0] sm:$0xff] %v3333_v8 }
 0x5e5   :  { %4769 = vtanh.f32 %v2718_v58 }
 0x5e7   :  { %v3165_v19 = vpop.f32.mrf.mxu2 }
 0x5e8   :  { %v3166_v48 = vadd.f32 %v6723_v47, %v3165_v19  ;;  %v2551_v60 = vpop.f32.mrf.mxu0 }
 0x5e9   :  { %v3334_v1 = vpop.f32.mrf.mxu3  ;;  %v2552_v63 = vadd.f32 %v2551_v60, %v6576_v36 }
 0x5ea   :  { %v2720_v14 = vpop.f32.mrf.mxu1  ;;  %v3335_v25 = vadd.f32 %v3334_v1, %v3166_v48 }
 0x5eb   :  { %v4770_v50 = vpop.eup %4769  ;;  %2590 = vmatmul.bf16.gmra.mxu0 %v7200_v46  ;;  %v2721_v13 = vadd.f32 %v2720_v14, %v2552_v63  ;;  %v7210_v63 = vld [vmem:[#allocation8_spill] sm:$0xff] }
 0x5ec   :  { %3460 = vst [vmem:[#allocation2 + $0xb8] sm:$0xff] %v3335_v25  ;;  %2759 = vmatmul.bf16.gmra.mxu1 %v7201_v55  ;;  %3207 = vmatmul.bf16.gmra.mxu2 %v7204_v54  ;;  %v2944_v6 = vpack.c.bf16 %v4770_v50, %v4768_v3  ;;  %v7213_v54 = vpack.c.bf16 %v6589_v53, %v7212_v31 }
 0x5ed   :  { %4771 = vtanh.f32 %v2721_v13 }
 0x5ee   :  { %3376 = vmatmul.bf16.gmra.mxu3 %v2944_v6 }
 0x5ef   :  { %v3168_v57 = vpop.f32.mrf.mxu2 }
 0x5f0   :  { %v3169_v9 = vadd.f32 %v6723_v47, %v3168_v57  ;;  %v2553_v16 = vpop.f32.mrf.mxu0 }
 0x5f1   :  { %v2554_v61 = vadd.f32 %v2553_v16, %v6576_v36  ;;  %v3337_v24 = vpop.f32.mrf.mxu3 }
 0x5f2   :  { %v2722_v26 = vpop.f32.mrf.mxu1  ;;  %v3338_v56 = vadd.f32 %v3337_v24, %v3169_v9 }
 0x5f3   :  { %v2723_v12 = vadd.f32 %v2722_v26, %v2554_v61  ;;  %v4772_v18 = vpop.eup %4771 }
 0x5f4   :  { %3461 = vst [vmem:[#allocation2 + $0xc0] sm:$0xff] %v3338_v56 }
 0x5f5   :  { %4773 = vtanh.f32 %v2723_v12 }
 0x5f7   :  { %v3170_v23 = vpop.f32.mrf.mxu2 }
 0x5f8   :  { %v3171_v22 = vadd.f32 %v6723_v47, %v3170_v23  ;;  %v2556_v52 = vpop.f32.mrf.mxu0 }
 0x5f9   :  { %v3339_v41 = vpop.f32.mrf.mxu3  ;;  %v2557_v42 = vadd.f32 %v2556_v52, %v6576_v36 }
 0x5fa   :  { %v2725_v37 = vpop.f32.mrf.mxu1  ;;  %v3340_v43 = vadd.f32 %v3339_v41, %v3171_v22 }
 0x5fb   :  { %v4774_v40 = vpop.eup %4773  ;;  %2595 = vmatmul.bf16.gmra.mxu0 %v7205_v21  ;;  %v2726_v34 = vadd.f32 %v2725_v37, %v2557_v42  ;;  %v7214_v21 = vld [vmem:[#allocation10_spill] sm:$0xff]  ;;  %v7215_v42 = vld [vmem:[#allocation12_spill] sm:$0xff] }
 0x5fc   :  { %3462 = vst [vmem:[#allocation2 + $0xc8] sm:$0xff] %v3340_v43  ;;  %2764 = vmatmul.bf16.gmra.mxu1 %v7206_v17  ;;  %3212 = vmatmul.bf16.gmra.mxu2 %v7209_v27  ;;  %v2946_v2 = vpack.c.bf16 %v4774_v40, %v4772_v18  ;;  %v7216_v17 = vpack.c.bf16 %v7214_v21, %v7215_v42 }
 0x5fd   :  { %4775 = vtanh.f32 %v2726_v34 }
 0x5fe   :  { %3381 = vmatmul.bf16.gmra.mxu3 %v2946_v2 }
 0x5ff   :  { %v3173_v39 = vpop.f32.mrf.mxu2 }
 0x600   :  { %v3174_v5 = vadd.f32 %v6723_v47, %v3173_v39  ;;  %v2558_v44 = vpop.f32.mrf.mxu0 }
 0x601   :  { %v2559_v59 = vadd.f32 %v2558_v44, %v6576_v36  ;;  %v3342_v8 = vpop.f32.mrf.mxu3 }
 0x602   :  { %v2727_v30 = vpop.f32.mrf.mxu1  ;;  %v3343_v58 = vadd.f32 %v3342_v8, %v3174_v5 }
 0x603   :  { %v2728_v19 = vadd.f32 %v2727_v30, %v2559_v59  ;;  %v4776_v25 = vpop.eup %4775 }
 0x604   :  { %3463 = vst [vmem:[#allocation2 + $0xd0] sm:$0xff] %v3343_v58 }
 0x605   :  { %4777 = vtanh.f32 %v2728_v19 }
 0x607   :  { %v3175_v48 = vpop.f32.mrf.mxu2 }
 0x608   :  { %v3176_v60 = vadd.f32 %v6723_v47, %v3175_v48  ;;  %v2561_v14 = vpop.f32.mrf.mxu0 }
 0x609   :  { %v3344_v3 = vpop.f32.mrf.mxu3  ;;  %v2562_v55 = vadd.f32 %v2561_v14, %v6576_v36 }
 0x60a   :  { %v2730_v1 = vpop.f32.mrf.mxu1  ;;  %v3345_v50 = vadd.f32 %v3344_v3, %v3176_v60 }
 0x60b   :  { %v4778_v46 = vpop.eup %4777  ;;  %2600 = vmatmul.bf16.gmra.mxu0 %v7210_v63  ;;  %v2731_v13 = vadd.f32 %v2730_v1, %v2562_v55 }
 0x60c   :  { %3464 = vst [vmem:[#allocation2 + $0xd8] sm:$0xff] %v3345_v50  ;;  %2769 = vmatmul.bf16.gmra.mxu1 %v7211_v15  ;;  %3217 = vmatmul.bf16.gmra.mxu2 %v7213_v54  ;;  %v2948_v6 = vpack.c.bf16 %v4778_v46, %v4776_v25  ;;  %v7217_v50 = vld [vmem:[#allocation11_spill] sm:$0xff] }
 0x60d   :  { %4779 = vtanh.f32 %v2731_v13  ;;  %v7218_v46 = vld [vmem:[#allocation39_spill] sm:$0xff] }
 0x60e   :  { %3386 = vmatmul.bf16.gmra.mxu3 %v2948_v6  ;;  %v7219_v63 = vpack.c.bf16 %v7217_v50, %v7218_v46 }
 0x60f   :  { %v3178_v57 = vpop.f32.mrf.mxu2 }
 0x610   :  { %v3179_v9 = vadd.f32 %v6723_v47, %v3178_v57  ;;  %v2563_v16 = vpop.f32.mrf.mxu0 }
 0x611   :  { %v2564_v61 = vadd.f32 %v2563_v16, %v6576_v36  ;;  %v3347_v24 = vpop.f32.mrf.mxu3 }
 0x612   :  { %v2732_v26 = vpop.f32.mrf.mxu1  ;;  %v3348_v56 = vadd.f32 %v3347_v24, %v3179_v9 }
 0x613   :  { %v2733_v12 = vadd.f32 %v2732_v26, %v2564_v61  ;;  %v4780_v41 = vpop.eup %4779 }
 0x614   :  { %3465 = vst [vmem:[#allocation2 + $0xe0] sm:$0xff] %v3348_v56 }
 0x615   :  { %4781 = vtanh.f32 %v2733_v12 }
 0x617   :  { %v3180_v23 = vpop.f32.mrf.mxu2 }
 0x618   :  { %v3181_v53 = vadd.f32 %v6723_v47, %v3180_v23  ;;  %v2566_v22 = vpop.f32.mrf.mxu0 }
 0x619   :  { %v3349_v37 = vpop.f32.mrf.mxu3  ;;  %v2567_v40 = vadd.f32 %v2566_v22, %v6576_v36 }
 0x61a   :  { %v2735_v52 = vpop.f32.mrf.mxu1  ;;  %v3350_v18 = vadd.f32 %v3349_v37, %v3181_v53 }
 0x61b   :  { %v4782_v43 = vpop.eup %4781  ;;  %v2736_v27 = vadd.f32 %v2735_v52, %v2567_v40 }
 0x61c   :  { %3466 = vst [vmem:[#allocation2 + $0xe8] sm:$0xff] %v3350_v18  ;;  %3222 = vmatmul.bf16.gmra.mxu2 %v7216_v17  ;;  %v2950_v49 = vpack.c.bf16 %v4782_v43, %v4780_v41  ;;  %v7220_v41 = vld [vmem:[#allocation15_spill] sm:$0xff] }
 0x61d   :  { %4783 = vtanh.f32 %v2736_v27  ;;  %v7221_v18 = vpack.c.bf16 %v6634_v38, %v7220_v41 }
 0x61e   :  { %3391 = vmatmul.bf16.gmra.mxu3 %v2950_v49 }
 0x61f   :  { %v3183_v29 = vpop.f32.mrf.mxu2 }
 0x620   :  { %v3184_v2 = vadd.f32 %v6723_v47, %v3183_v29  ;;  %v2568_v39 = vpop.f32.mrf.mxu0 }
 0x621   :  { %v2569_v34 = vadd.f32 %v2568_v39, %v6576_v36  ;;  %v3352_v44 = vpop.f32.mrf.mxu3 }
 0x622   :  { %v2737_v5 = vpop.f32.mrf.mxu1  ;;  %v3353_v59 = vadd.f32 %v3352_v44, %v3184_v2 }
 0x623   :  { %v2738_v30 = vadd.f32 %v2737_v5, %v2569_v34  ;;  %v4784_v14 = vpop.eup %4783 }
 0x624   :  { %3467 = vst [vmem:[#allocation2 + $0xf0] sm:$0xff] %v3353_v59 }
 0x625   :  { %4785 = vtanh.f32 %v2738_v30 }
 0x627   :  { %v3185_v8 = vpop.f32.mrf.mxu2 }
 0x628   :  { %v3186_v58 = vadd.f32 %v6723_v47, %v3185_v8  ;;  %v2571_v19 = vpop.f32.mrf.mxu0 }
 0x629   :  { %v3354_v60 = vpop.f32.mrf.mxu3  ;;  %v2572_v25 = vadd.f32 %v2571_v19, %v6576_v36 }
 0x62a   :  { %v2740_v48 = vpop.f32.mrf.mxu1  ;;  %v3355_v1 = vadd.f32 %v3354_v60, %v3186_v58 }
 0x62b   :  { %v4786_v3 = vpop.eup %4785  ;;  %v2741_v31 = vadd.f32 %v2740_v48, %v2572_v25  ;;  %v7222_v48 = vpack.c.bf16 %v6649_v4, %v6646_v7 }
 0x62c   :  { %3468 = vst [vmem:[#allocation2 + $0xf8] sm:$0xff] %v3355_v1  ;;  %3227 = vmatmul.bf16.gmra.mxu2 %v7219_v63  ;;  %v2952_v55 = vpack.c.bf16 %v4786_v3, %v4784_v14 }
 0x62d   :  { %4787 = vtanh.f32 %v2741_v31 }
 0x62e   :  { %3396 = vmatmul.bf16.gmra.mxu3 %v2952_v55 }
 0x62f   :  { %v3188_v15 = vpop.f32.mrf.mxu2 }
 0x630   :  { %v3189_v54 = vadd.f32 %v6723_v47, %v3188_v15  ;;  %v2573_v6 = vpop.f32.mrf.mxu0 }
 0x631   :  { %v2574_v57 = vadd.f32 %v2573_v6, %v6576_v36  ;;  %v3357_v9 = vpop.f32.mrf.mxu3 }
 0x632   :  { %v2742_v13 = vpop.f32.mrf.mxu1  ;;  %v3358_v16 = vadd.f32 %v3357_v9, %v3189_v54 }
 0x633   :  { %v2743_v61 = vadd.f32 %v2742_v13, %v2574_v57  ;;  %v4788_v53 = vpop.eup %4787 }
 0x634   :  { %3469 = vst [vmem:[#allocation2 + $0x100] sm:$0xff] %v3358_v16 }
 0x635   :  { %4789 = vtanh.f32 %v2743_v61  ;;  %v7223_v61 = vpack.c.bf16 %v6664_v45, %v6661_v11  ;;  %v6897_v11 = vld [vmem:[%s6953_s8] ss:$0 sm:$0xff]  ;;  %s4844_s8 = smov [#allocation2]  }
 0x636   :  { %s3505_s19 = sshll.u32 %s4844_s8, 4  ;;  %s3506_s19 = int_to_ptr.vmem [resolvable:$true] %s3505_s19 }
 0x637   :  { %v3190_v26 = vpop.f32.mrf.mxu2 }
 0x638   :  { %v3191_v24 = vadd.f32 %v6723_v47, %v3190_v26  ;;  %v2576_v56 = vpop.f32.mrf.mxu0 }
 0x639   :  { %v3359_v23 = vpop.f32.mrf.mxu3  ;;  %v2577_v37 = vadd.f32 %v2576_v56, %v6576_v36 }
 0x63a   :  { %v2745_v12 = vpop.f32.mrf.mxu1  ;;  %v3360_v22 = vadd.f32 %v3359_v23, %v3191_v24 }
 0x63b   :  { %v4790_v52 = vpop.eup %4789  ;;  %v2746_v21 = vadd.f32 %v2745_v12, %v2577_v37 }
 0x63c   :  { %3470 = vst [vmem:[#allocation2 + $0x108] sm:$0xff] %v3360_v22  ;;  %3232 = vmatmul.bf16.gmra.mxu2 %v7221_v18  ;;  %v2954_v43 = vpack.c.bf16 %v4790_v52, %v4788_v53 }
 0x63d   :  { %4791 = vtanh.f32 %v2746_v21 }
 0x63e   :  { %3401 = vmatmul.bf16.gmra.mxu3 %v2954_v43 }
 0x63f   :  { %v3193_v40 = vpop.f32.mrf.mxu2 }
 0x640   :  { %v3194_v42 = vadd.f32 %v6723_v47, %v3193_v40  ;;  %v2578_v17 = vpop.f32.mrf.mxu0 }
 0x641   :  { %v2579_v49 = vadd.f32 %v2578_v17, %v6576_v36  ;;  %v3362_v27 = vpop.f32.mrf.mxu3 }
 0x642   :  { %v2747_v29 = vpop.f32.mrf.mxu1  ;;  %v3363_v2 = vadd.f32 %v3362_v27, %v3194_v42 }
 0x643   :  { %v2748_v39 = vadd.f32 %v2747_v29, %v2579_v49  ;;  %v4792_v30 = vpop.eup %4791  ;;  %v7224_v29 = vpack.c.bf16 %v6679_v62, %v6676_v0 }
 0x644   :  { %3471 = vst [vmem:[#allocation2 + $0x110] sm:$0xff] %v3363_v2 }
 0x645   :  { %4793 = vtanh.f32 %v2748_v39 }
 0x647   :  { %v3195_v34 = vpop.f32.mrf.mxu2 }
 0x648   :  { %v3196_v38 = vadd.f32 %v6723_v47, %v3195_v34  ;;  %v2581_v5 = vpop.f32.mrf.mxu0 }
 0x649   :  { %v3364_v59 = vpop.f32.mrf.mxu3  ;;  %v2582_v19 = vadd.f32 %v2581_v5, %v6576_v36 }
 0x64a   :  { %v2750_v44 = vpop.f32.mrf.mxu1  ;;  %v3365_v8 = vadd.f32 %v3364_v59, %v3196_v38 }
 0x64b   :  { %v4794_v58 = vpop.eup %4793  ;;  %v2751_v1 = vadd.f32 %v2750_v44, %v2582_v19 }
 0x64c   :  { %3472 = vst [vmem:[#allocation2 + $0x118] sm:$0xff] %v3365_v8  ;;  %3237 = vmatmul.bf16.gmra.mxu2 %v7222_v48  ;;  %v2956_v60 = vpack.c.bf16 %v4794_v58, %v4792_v30 }
 0x64d   :  { %4795 = vtanh.f32 %v2751_v1 }
 0x64e   :  { %3406 = vmatmul.bf16.gmra.mxu3 %v2956_v60 }
 0x64f   :  { %v3198_v14 = vpop.f32.mrf.mxu2 }
 0x650   :  { %v3199_v3 = vadd.f32 %v6723_v47, %v3198_v14  ;;  %v2583_v25 = vpop.f32.mrf.mxu0 }
 0x651   :  { %v2584_v50 = vadd.f32 %v2583_v25, %v6576_v36  ;;  %v3367_v63 = vpop.f32.mrf.mxu3  ;;  %v7225_v25 = vpack.c.bf16 %v6694_v28, %v6691_v35 }
 0x652   :  { %v2752_v46 = vpop.f32.mrf.mxu1  ;;  %v3368_v55 = vadd.f32 %v3367_v63, %v3199_v3 }
 0x653   :  { %v2753_v15 = vadd.f32 %v2752_v46, %v2584_v50  ;;  %v4796_v57 = vpop.eup %4795 }
 0x654   :  { %3473 = vst [vmem:[#allocation2 + $0x120] sm:$0xff] %v3368_v55 }
 0x655   :  { %4797 = vtanh.f32 %v2753_v15 }
 0x657   :  { %v3200_v31 = vpop.f32.mrf.mxu2 }
 0x658   :  { %v3201_v7 = vadd.f32 %v6723_v47, %v3200_v31  ;;  %v2586_v4 = vpop.f32.mrf.mxu0 }
 0x659   :  { %v3369_v6 = vpop.f32.mrf.mxu3  ;;  %v2587_v16 = vadd.f32 %v2586_v4, %v6576_v36 }
 0x65a   :  { %v2755_v54 = vpop.f32.mrf.mxu1  ;;  %v3370_v13 = vadd.f32 %v3369_v6, %v3201_v7 }
 0x65b   :  { %v4798_v9 = vpop.eup %4797  ;;  %v2756_v56 = vadd.f32 %v2755_v54, %v2587_v16 }
 0x65c   :  { %3474 = vst [vmem:[#allocation2 + $0x128] sm:$0xff] %v3370_v13  ;;  %3242 = vmatmul.bf16.gmra.mxu2 %v7223_v61  ;;  %v2958_v26 = vpack.c.bf16 %v4798_v9, %v4796_v57 }
 0x65d   :  { %4799 = vtanh.f32 %v2756_v56 }
 0x65e   :  { %3411 = vmatmul.bf16.gmra.mxu3 %v2958_v26 }
 0x65f   :  { %v3203_v24 = vpop.f32.mrf.mxu2 }
 0x660   :  { %v3204_v12 = vadd.f32 %v6723_v47, %v3203_v24  ;;  %v2588_v23 = vpop.f32.mrf.mxu0 }
 0x661   :  { %v2589_v53 = vadd.f32 %v2588_v23, %v6576_v36  ;;  %v3372_v52 = vpop.f32.mrf.mxu3 }
 0x662   :  { %v2757_v22 = vpop.f32.mrf.mxu1  ;;  %v3373_v37 = vadd.f32 %v3372_v52, %v3204_v12 }
 0x663   :  { %v2758_v41 = vadd.f32 %v2757_v22, %v2589_v53  ;;  %v4800_v21 = vpop.eup %4799 }
 0x664   :  { %3475 = vst [vmem:[#allocation2 + $0x130] sm:$0xff] %v3373_v37 }
 0x665   :  { %4801 = vtanh.f32 %v2758_v41 }
 0x667   :  { %v3205_v18 = vpop.f32.mrf.mxu2 }
 0x668   :  { %v3206_v45 = vadd.f32 %v6897_v11, %v3205_v18  ;;  %v2591_v43 = vpop.f32.mrf.mxu0 }
 0x669   :  { %v3374_v40 = vpop.f32.mrf.mxu3  ;;  %v2592_v49 = vadd.f32 %v2591_v43, %v6576_v36 }
 0x66a   :  { %v2760_v47 = vpop.f32.mrf.mxu1  ;;  %v3375_v42 = vadd.f32 %v3374_v40, %v3206_v45 }
 0x66b   :  { %v4802_v17 = vpop.eup %4801  ;;  %v2761_v39 = vadd.f32 %v2760_v47, %v2592_v49 }
 0x66c   :  { %3476 = vst [vmem:[#allocation2 + $0x138] sm:$0xff] %v3375_v42  ;;  %3247 = vmatmul.bf16.gmra.mxu2 %v7224_v29  ;;  %v2960_v27 = vpack.c.bf16 %v4802_v17, %v4800_v21  ;;  %v7226_v21 = vpack.c.bf16 %v6729_v20, %v6726_v10 }
 0x66d   :  { %4803 = vtanh.f32 %v2761_v39 }
 0x66e   :  { %3416 = vmatmul.bf16.gmra.mxu3 %v2960_v27 }
 0x66f   :  { %v3208_v2 = vpop.f32.mrf.mxu2 }
 0x670   :  { %v3209_v34 = vadd.f32 %v6897_v11, %v3208_v2  ;;  %v2593_v38 = vpop.f32.mrf.mxu0 }
 0x671   :  { %v2594_v5 = vadd.f32 %v2593_v38, %v6576_v36  ;;  %v3377_v59 = vpop.f32.mrf.mxu3 }
 0x672   :  { %v2762_v44 = vpop.f32.mrf.mxu1  ;;  %v3378_v30 = vadd.f32 %v3377_v59, %v3209_v34 }
 0x673   :  { %v2763_v8 = vadd.f32 %v2762_v44, %v2594_v5  ;;  %v4804_v60 = vpop.eup %4803 }
 0x674   :  { %3477 = vst [vmem:[#allocation2 + $0x140] sm:$0xff] %v3378_v30 }
 0x675   :  { %4805 = vtanh.f32 %v2763_v8 }
 0x677   :  { %v3210_v58 = vpop.f32.mrf.mxu2 }
 0x678   :  { %v3211_v0 = vadd.f32 %v6897_v11, %v3210_v58  ;;  %v2596_v62 = vpop.f32.mrf.mxu0 }
 0x679   :  { %v3379_v48 = vpop.f32.mrf.mxu3  ;;  %v2597_v3 = vadd.f32 %v2596_v62, %v6576_v36 }
 0x67a   :  { %v2765_v19 = vpop.f32.mrf.mxu1  ;;  %v3380_v14 = vadd.f32 %v3379_v48, %v3211_v0 }
 0x67b   :  { %v4806_v1 = vpop.eup %4805  ;;  %v2766_v63 = vadd.f32 %v2765_v19, %v2597_v3 }
 0x67c   :  { %3478 = vst [vmem:[#allocation2 + $0x148] sm:$0xff] %v3380_v14  ;;  %3252 = vmatmul.bf16.gmra.mxu2 %v7225_v25  ;;  %v2962_v50 = vpack.c.bf16 %v4806_v1, %v4804_v60 }
 0x67d   :  { %4807 = vtanh.f32 %v2766_v63 }
 0x67e   :  { %3421 = vmatmul.bf16.gmra.mxu3 %v2962_v50 }
 0x67f   :  { %v3213_v46 = vpop.f32.mrf.mxu2 }
 0x680   :  { %v3214_v55 = vadd.f32 %v6897_v11, %v3213_v46  ;;  %v2598_v15 = vpop.f32.mrf.mxu0 }
 0x681   :  { %v2599_v31 = vadd.f32 %v2598_v15, %v6576_v36  ;;  %v3382_v4 = vpop.f32.mrf.mxu3 }
 0x682   :  { %v2767_v7 = vpop.f32.mrf.mxu1  ;;  %v3383_v54 = vadd.f32 %v3382_v4, %v3214_v55 }
 0x683   :  { %v2768_v6 = vadd.f32 %v2767_v7, %v2599_v31  ;;  %v4808_v16 = vpop.eup %4807 }
 0x684   :  { %3479 = vst [vmem:[#allocation2 + $0x150] sm:$0xff] %v3383_v54 }
 0x685   :  { %4809 = vtanh.f32 %v2768_v6 }
 0x687   :  { %v3215_v57 = vpop.f32.mrf.mxu2 }
 0x688   :  { %v3216_v35 = vadd.f32 %v6897_v11, %v3215_v57  ;;  %v2601_v28 = vpop.f32.mrf.mxu0 }
 0x689   :  { %v3384_v9 = vpop.f32.mrf.mxu3  ;;  %v2602_v24 = vadd.f32 %v2601_v28, %v6576_v36 }
 0x68a   :  { %v2770_v13 = vpop.f32.mrf.mxu1  ;;  %v3385_v61 = vadd.f32 %v3384_v9, %v3216_v35 }
 0x68b   :  { %v4810_v26 = vpop.eup %4809  ;;  %v2771_v23 = vadd.f32 %v2770_v13, %v2602_v24 }
 0x68c   :  { %3480 = vst [vmem:[#allocation2 + $0x158] sm:$0xff] %v3385_v61  ;;  %3257 = vmatmul.bf16.gmra.mxu2 %v2963_v32  ;;  %v2964_v56 = vpack.c.bf16 %v4810_v26, %v4808_v16 }
 0x68d   :  { %4811 = vtanh.f32 %v2771_v23 }
 0x68e   :  { %3426 = vmatmul.bf16.gmra.mxu3 %v2964_v56 }
 0x68f   :  { %v3218_v12 = vpop.f32.mrf.mxu2 }
 0x690   :  { %v3219_v53 = vadd.f32 %v6897_v11, %v3218_v12  ;;  %v2603_v22 = vpop.f32.mrf.mxu0 }
 0x691   :  { %v2604_v52 = vadd.f32 %v2603_v22, %v6576_v36  ;;  %v3387_v37 = vpop.f32.mrf.mxu3 }
 0x692   :  { %v2772_v41 = vpop.f32.mrf.mxu1  ;;  %v3388_v18 = vadd.f32 %v3387_v37, %v3219_v53 }
 0x693   :  { %v2773_v45 = vadd.f32 %v2772_v41, %v2604_v52  ;;  %v4812_v32 = vpop.eup %4811 }
 0x694   :  { %3481 = vst [vmem:[#allocation2 + $0x160] sm:$0xff] %v3388_v18 }
 0x695   :  { %4813 = vtanh.f32 %v2773_v45 }
 0x697   :  { %v3220_v43 = vpop.f32.mrf.mxu2 }
 0x698   :  { %v3221_v33 = vadd.f32 %v6897_v11, %v3220_v43 }
 0x699   :  { %v3389_v51 = vpop.f32.mrf.mxu3 }
 0x69a   :  { %v3390_v47 = vadd.f32 %v3389_v51, %v3221_v33 }
 0x69b   :  { %v4814_v40 = vpop.eup %4813 }
 0x69c   :  { %3482 = vst [vmem:[#allocation2 + $0x168] sm:$0xff] %v3390_v47  ;;  %3262 = vmatmul.bf16.gmra.mxu2 %v7226_v21  ;;  %v2966_v36 = vpack.c.bf16 %v4814_v40, %v4812_v32 }
 0x69e   :  { %3431 = vmatmul.bf16.gmra.mxu3 %v2966_v36 }
 0x69f   :  { %v3223_v42 = vpop.f32.mrf.mxu2 }
 0x6a0   :  { %v3224_v17 = vadd.f32 %v6897_v11, %v3223_v42 }
 0x6a1   :  { %v3392_v49 = vpop.f32.mrf.mxu3 }
 0x6a2   :  { %v3393_v29 = vadd.f32 %v3392_v49, %v3224_v17 }
 0x6a4   :  { %3483 = vst [vmem:[#allocation2 + $0x170] sm:$0xff] %v3393_v29 }
 0x6a7   :  { %v3225_v27 = vpop.f32.mrf.mxu2 }
 0x6a8   :  { %v3226_v2 = vadd.f32 %v6897_v11, %v3225_v27 }
 0x6a9   :  { %v3394_v39 = vpop.f32.mrf.mxu3 }
 0x6aa   :  { %v3395_v34 = vadd.f32 %v3394_v39, %v3226_v2 }
 0x6ac   :  { %3484 = vst [vmem:[#allocation2 + $0x178] sm:$0xff] %v3395_v34 }
 0x6af   :  { %v3228_v38 = vpop.f32.mrf.mxu2 }
 0x6b0   :  { %v3229_v5 = vadd.f32 %v6897_v11, %v3228_v38 }
 0x6b1   :  { %v3397_v44 = vpop.f32.mrf.mxu3 }
 0x6b2   :  { %v3398_v10 = vadd.f32 %v3397_v44, %v3229_v5 }
 0x6b4   :  { %3485 = vst [vmem:[#allocation2 + $0x180] sm:$0xff] %v3398_v10 }
 0x6b7   :  { %v3230_v20 = vpop.f32.mrf.mxu2 }
 0x6b8   :  { %v3231_v59 = vadd.f32 %v6897_v11, %v3230_v20 }
 0x6b9   :  { %v3399_v30 = vpop.f32.mrf.mxu3 }
 0x6ba   :  { %v3400_v8 = vadd.f32 %v3399_v30, %v3231_v59 }
 0x6bc   :  { %3486 = vst [vmem:[#allocation2 + $0x188] sm:$0xff] %v3400_v8 }
 0x6bf   :  { %v3233_v58 = vpop.f32.mrf.mxu2 }
 0x6c0   :  { %v3234_v0 = vadd.f32 %v6897_v11, %v3233_v58 }
 0x6c1   :  { %v3402_v62 = vpop.f32.mrf.mxu3 }
 0x6c2   :  { %v3403_v19 = vadd.f32 %v3402_v62, %v3234_v0 }
 0x6c4   :  { %3487 = vst [vmem:[#allocation2 + $0x190] sm:$0xff] %v3403_v19 }
 0x6c7   :  { %v3235_v48 = vpop.f32.mrf.mxu2 }
 0x6c8   :  { %v3236_v60 = vadd.f32 %v6897_v11, %v3235_v48 }
 0x6c9   :  { %v3404_v14 = vpop.f32.mrf.mxu3 }
 0x6ca   :  { %v3405_v1 = vadd.f32 %v3404_v14, %v3236_v60 }
 0x6cc   :  { %3488 = vst [vmem:[#allocation2 + $0x198] sm:$0xff] %v3405_v1 }
 0x6cf   :  { %v3238_v3 = vpop.f32.mrf.mxu2 }
 0x6d0   :  { %v3239_v25 = vadd.f32 %v6897_v11, %v3238_v3 }
 0x6d1   :  { %v3407_v50 = vpop.f32.mrf.mxu3 }
 0x6d2   :  { %v3408_v46 = vadd.f32 %v3407_v50, %v3239_v25 }
 0x6d4   :  { %3489 = vst [vmem:[#allocation2 + $0x1a0] sm:$0xff] %v3408_v46 }
 0x6d7   :  { %v3240_v63 = vpop.f32.mrf.mxu2 }
 0x6d8   :  { %v3241_v55 = vadd.f32 %v6897_v11, %v3240_v63 }
 0x6d9   :  { %v3409_v15 = vpop.f32.mrf.mxu3 }
 0x6da   :  { %v3410_v31 = vadd.f32 %v3409_v15, %v3241_v55 }
 0x6dc   :  { %3490 = vst [vmem:[#allocation2 + $0x1a8] sm:$0xff] %v3410_v31 }
 0x6df   :  { %v3243_v7 = vpop.f32.mrf.mxu2 }
 0x6e0   :  { %v3244_v4 = vadd.f32 %v6897_v11, %v3243_v7 }
 0x6e1   :  { %v3412_v54 = vpop.f32.mrf.mxu3 }
 0x6e2   :  { %v3413_v6 = vadd.f32 %v3412_v54, %v3244_v4 }
 0x6e4   :  { %3491 = vst [vmem:[#allocation2 + $0x1b0] sm:$0xff] %v3413_v6 }
 0x6e7   :  { %v3245_v57 = vpop.f32.mrf.mxu2 }
 0x6e8   :  { %v3246_v35 = vadd.f32 %v6897_v11, %v3245_v57 }
 0x6e9   :  { %v3414_v28 = vpop.f32.mrf.mxu3 }
 0x6ea   :  { %v3415_v13 = vadd.f32 %v3414_v28, %v3246_v35 }
 0x6ec   :  { %3492 = vst [vmem:[#allocation2 + $0x1b8] sm:$0xff] %v3415_v13 }
 0x6ef   :  { %v3248_v9 = vpop.f32.mrf.mxu2 }
 0x6f0   :  { %v3249_v16 = vadd.f32 %v6897_v11, %v3248_v9 }
 0x6f1   :  { %v3417_v61 = vpop.f32.mrf.mxu3 }
 0x6f2   :  { %v3418_v26 = vadd.f32 %v3417_v61, %v3249_v16 }
 0x6f4   :  { %3493 = vst [vmem:[#allocation2 + $0x1c0] sm:$0xff] %v3418_v26 }
 0x6f7   :  { %v3250_v24 = vpop.f32.mrf.mxu2 }
 0x6f8   :  { %v3251_v56 = vadd.f32 %v6897_v11, %v3250_v24 }
 0x6f9   :  { %v3419_v12 = vpop.f32.mrf.mxu3 }
 0x6fa   :  { %v3420_v23 = vadd.f32 %v3419_v12, %v3251_v56 }
 0x6fc   :  { %3494 = vst [vmem:[#allocation2 + $0x1c8] sm:$0xff] %v3420_v23 }
 0x6ff   :  { %v3253_v53 = vpop.f32.mrf.mxu2 }
 0x700   :  { %v3254_v22 = vadd.f32 %v6897_v11, %v3253_v53 }
 0x701   :  { %v3422_v52 = vpop.f32.mrf.mxu3 }
 0x702   :  { %v3423_v37 = vadd.f32 %v3422_v52, %v3254_v22 }
 0x704   :  { %3495 = vst [vmem:[#allocation2 + $0x1d0] sm:$0xff] %v3423_v37 }
 0x707   :  { %v3255_v41 = vpop.f32.mrf.mxu2 }
 0x708   :  { %v3256_v18 = vadd.f32 %v6897_v11, %v3255_v41 }
 0x709   :  { %v3424_v45 = vpop.f32.mrf.mxu3 }
 0x70a   :  { %v3425_v43 = vadd.f32 %v3424_v45, %v3256_v18 }
 0x70c   :  { %3496 = vst [vmem:[#allocation2 + $0x1d8] sm:$0xff] %v3425_v43 }
 0x70f   :  { %v3258_v33 = vpop.f32.mrf.mxu2 }
 0x710   :  { %v3259_v51 = vadd.f32 %v6897_v11, %v3258_v33 }
 0x711   :  { %v3427_v32 = vpop.f32.mrf.mxu3 }
 0x712   :  { %v3428_v47 = vadd.f32 %v3427_v32, %v3259_v51 }
 0x714   :  { %3497 = vst [vmem:[#allocation2 + $0x1e0] sm:$0xff] %v3428_v47 }
 0x717   :  { %v3260_v40 = vpop.f32.mrf.mxu2 }
 0x718   :  { %v3261_v21 = vadd.f32 %v6897_v11, %v3260_v40 }
 0x719   :  { %v3429_v36 = vpop.f32.mrf.mxu3 }
 0x71a   :  { %v3430_v42 = vadd.f32 %v3429_v36, %v3261_v21 }
 0x71c   :  { %3498 = vst [vmem:[#allocation2 + $0x1e8] sm:$0xff] %v3430_v42 }
 0x71f   :  { %v3263_v17 = vpop.f32.mrf.mxu2 }
 0x720   :  { %v3264_v49 = vadd.f32 %v6897_v11, %v3263_v17 }
 0x721   :  { %v3432_v29 = vpop.f32.mrf.mxu3 }
 0x722   :  { %v3433_v27 = vadd.f32 %v3432_v29, %v3264_v49 }
 0x724   :  { %3499 = vst [vmem:[#allocation2 + $0x1f0] sm:$0xff] %v3433_v27 }
 0x727   :  { %v3265_v2 = vpop.f32.mrf.mxu2 }
 0x728   :  { %v3266_v39 = vadd.f32 %v6897_v11, %v3265_v2 }
 0x729   :  { %v3434_v34 = vpop.f32.mrf.mxu3 }
 0x72a   :  { %v3435_v38 = vadd.f32 %v3434_v34, %v3266_v39 }
 0x72c   :  { %3500 = vst [vmem:[#allocation2 + $0x1f8] sm:$0xff] %v3435_v38 }
 0x72d   :  { %3513 = dma.vmem_to_hbm [thread:$0]  %s3506_s19, 8192, %s3508_s22, [#allocation3], %s4845_s23, %s4845_s23, %s4846_s4  }
 0x72e   :  { %4842 = dma.done.wait [#allocation3], 8192  }
 0x72f   :  { %4843 = vsyncadd [#allocation3], 4294959104 }
 0x730   :  { %3518 = vsyncpa [#allocation3], 1 }

</bundles_post_ra>
